<compile_context>
chip_gen: v7x
topology: tpu7x:2x2x1
jax: 0.10.0
libtpu: 0.0.40
codegen_flags: <defaults>
</compile_context>

<pallas_src>
import functools

import jax
import jax.numpy as jnp
from jax.experimental import pallas as pl
from jax.experimental.pallas import tpu as pltpu


# --------------------------------------------------------------------------------------
# Kernel 1: probabilistic fg/bg seed sampling (per batch item), lane-dense flat layout.
# --------------------------------------------------------------------------------------
def _sample_kernel(cam_row_ref, cam_col_ref, gfg_row_ref, gfg_col_ref,
                   gbg_row_ref, gbg_col_ref, fg_ref, bg_ref,
                   *, n, k_fg, k_bg, nbr_roi):
    npad = cam_row_ref.shape[-1]
    eps = jnp.float32(1e-6)
    neg_big = jnp.float32(-1e30)

    idx_row = jax.lax.broadcasted_iota(jnp.int32, (1, npad), 1)   # flat index j (lanes)
    idx_col = jax.lax.broadcasted_iota(jnp.int32, (npad, 1), 0)   # flat index i (sublanes)
    valid_row = idx_row < n
    valid_col = idx_col < n

    cam_row = cam_row_ref[...].astype(jnp.float32) + eps          # (1, Np)
    cam_col = cam_col_ref[...].astype(jnp.float32) + eps          # (Np, 1)

    # One scalar normalizer shared by both layouts (keeps row/col values bit-identical,
    # which the index tie-break below relies on).
    total = jnp.sum(jnp.where(valid_row, cam_row, 0.0))
    inv_total = 1.0 / total

    def rank(key_col, key_row):
        # rank[j] = #{ valid i : key_i beats key_j }, ties broken by smaller flat index.
        beats = (key_col > key_row) | ((key_col == key_row) & (idx_col < idx_row))
        beats = beats & valid_col
        return jnp.sum(beats.astype(jnp.int32), axis=0, keepdims=True)   # (1, Np)

    # ---- foreground: min(max_, H*W) ~ multinomial(p, without replacement).
    # Gumbel-top-k is invariant to the normalizer, so log(cam + eps) is used directly.
    kfg_row = jnp.where(valid_row, jnp.log(cam_row) + gfg_row_ref[...], neg_big)
    kfg_col = jnp.where(valid_col, jnp.log(cam_col) + gfg_col_ref[...], neg_big)
    fg = valid_row & (rank(kfg_col, kfg_row) < k_fg)
    fg_ref[...] = fg.astype(jnp.int32)

    # ---- background: restricted to the nbr_roi pixels with the largest q = 1 - p.
    q_row = 1.0 - cam_row * inv_total
    q_col = 1.0 - cam_col * inv_total
    qm_row = jnp.where(valid_row, q_row, neg_big)
    qm_col = jnp.where(valid_col, q_col, neg_big)
    beats_q = (qm_col > qm_row) | ((qm_col == qm_row) & (idx_col < idx_row))
    beats_q = (beats_q & valid_col & valid_row).astype(jnp.int32)
    q_rank_row = jnp.sum(beats_q, axis=0, keepdims=True)             # (1, Np)
    q_beaten_col = jnp.sum(beats_q, axis=1, keepdims=True)           # (Np, 1)
    q_rank_col = (n - 1) - q_beaten_col       # strict total order over the n valid pixels
    in_region_row = valid_row & (q_rank_row < nbr_roi)
    in_region_col = valid_col & (q_rank_col < nbr_roi)

    # TODO(synk): the PyTorch _ProbaAreaSampler maps sampled *sorted* positions onto the
    # region's *row-major* positions; here region pixels are sampled by their own (1 - p)
    # weight (the intended distribution; identical whenever region weights tie).
    kbg_row = jnp.where(in_region_row, jnp.log(q_row) + gbg_row_ref[...], neg_big)
    kbg_col = jnp.where(in_region_col, jnp.log(q_col) + gbg_col_ref[...], neg_big)
    bg = in_region_row & (rank(kbg_col, kbg_row) < k_bg)
    bg_ref[...] = bg.astype(jnp.int32)


# --------------------------------------------------------------------------------------
# Kernel 2: ksz x ksz binary dilation (band-matrix MXU sandwich) + label merge.
# --------------------------------------------------------------------------------------
def _dilate_merge_kernel(fg_ref, bg_ref, out_ref, *, ksz, ignore_idx):
    h, w = fg_ref.shape
    fg = fg_ref[...]
    bg = bg_ref[...]

    if ksz > 1:
        lo = -(ksz // 2)
        hi = (ksz - 1) // 2

        def band(size, flip):
            r = jax.lax.broadcasted_iota(jnp.int32, (size, size), 0)
            c = jax.lax.broadcasted_iota(jnp.int32, (size, size), 1)
            d = (r - c) if flip else (c - r)
            return ((d >= lo) & (d <= hi)).astype(jnp.float32)

        a = band(h, flip=False)     # a[i, i'] = 1  iff  i' - i in [lo, hi]
        b = band(w, flip=True)      # b[j', j] = 1  iff  j' - j in [lo, hi]

        def dilate(m):
            acc = jnp.dot(a, m.astype(jnp.float32), preferred_element_type=jnp.float32)
            acc = jnp.dot(acc, b, preferred_element_type=jnp.float32)
            return (acc > 0.5).astype(jnp.int32)

        fg = dilate(fg)
        bg = dilate(bg)

    both = (fg + bg) == 2
    fg = jnp.where(both, 0, fg)
    bg = jnp.where(both, 0, bg)
    out = jnp.full((h, w), ignore_idx, dtype=jnp.int32)
    out = jnp.where(fg == 1, 1, out)
    out = jnp.where(bg == 1, 0, out)
    out_ref[...] = out


# --------------------------------------------------------------------------------------
# Wrappers
# --------------------------------------------------------------------------------------
def _round_up(x, m):
    return ((x + m - 1) // m) * m


def sample_fg_bg(cam_flat, gumbel, *, k_fg, k_bg, nbr_roi):
    """cam_flat: (B, N) f32, gumbel: (B, 2, N) f32 -> (fg, bg) 0/1 int32 masks (B, N)."""
    bsz, n = cam_flat.shape
    npad = max(_round_up(n, 128), 128)
    pad = npad - n

    cam_row = jnp.pad(cam_flat.astype(jnp.float32), ((0, 0), (0, pad)))[:, None, :]
    g = jnp.pad(gumbel.astype(jnp.float32), ((0, 0), (0, 0), (0, pad)))
    gfg_row, gbg_row = g[:, 0:1, :], g[:, 1:2, :]
    cam_col = jnp.swapaxes(cam_row, 1, 2)
    gfg_col = jnp.swapaxes(gfg_row, 1, 2)
    gbg_col = jnp.swapaxes(gbg_row, 1, 2)

    row_spec = pl.BlockSpec((None, 1, npad), lambda i: (i, 0, 0))
    col_spec = pl.BlockSpec((None, npad, 1), lambda i: (i, 0, 0))

    kernel = functools.partial(_sample_kernel, n=n, k_fg=int(k_fg), k_bg=int(k_bg),
                               nbr_roi=int(nbr_roi))
    fg, bg = pl.pallas_call(
        kernel,
        grid=(bsz,),
        in_specs=[row_spec, col_spec, row_spec, col_spec, row_spec, col_spec],
        out_specs=(row_spec, row_spec),
        out_shape=(jax.ShapeDtypeStruct((bsz, 1, npad), jnp.int32),
                   jax.ShapeDtypeStruct((bsz, 1, npad), jnp.int32)),
        compiler_params=pltpu.CompilerParams(dimension_semantics=("parallel",)),
    )(cam_row, cam_col, gfg_row, gfg_col, gbg_row, gbg_col)
    return fg[:, 0, :n], bg[:, 0, :n]


def dilate_and_merge(fg, bg, *, ksz, ignore_idx):
    bsz, h, w = fg.shape
    spec = pl.BlockSpec((None, h, w), lambda i: (i, 0, 0))
    kernel = functools.partial(_dilate_merge_kernel, ksz=int(ksz),
                               ignore_idx=int(ignore_idx))
    return pl.pallas_call(
        kernel,
        grid=(bsz,),
        in_specs=[spec, spec],
        out_specs=spec,
        out_shape=jax.ShapeDtypeStruct((bsz, h, w), jnp.int32),
        compiler_params=pltpu.CompilerParams(dimension_semantics=("parallel",)),
    )(fg, bg)


@functools.partial(jax.jit,
                   static_argnames=("min_", "max_", "min_p", "ksz", "seg_ignore_idx"))
def mb_prob_neg_area_seeder_slfcams(x, key, *, min_=1, max_=1, min_p=0.2, ksz=3,
                                    seg_ignore_idx=-255):
    """Forward of MBProbNegAreaSeederSLFCAMS (neg_samples_partial=False path).

    x: (B, 1, H, W) float CAMs.  Returns (B, H, W) int32 pseudo labels in
    {1 (fg), 0 (bg), seg_ignore_idx (unknown)}.
    """
    assert x.ndim == 4 and x.shape[1] == 1
    bsz, _, h, w = x.shape
    n = h * w
    # TODO(synk): the O(N^2) rank-based sampler targets small CAMs; tile it for large maps.
    assert n <= 4096, "sampler sized for small CAMs (H*W <= 4096)"

    k_fg = min(int(max_), n)                 # _ProbaSampler(nbr=max_, trg=FG)
    nbr_roi = int(float(min_p) * n)          # _ProbaAreaSampler region size
    k_bg = min(int(min_), nbr_roi)           # _ProbaAreaSampler(nbr=min_, p=min_p, trg=BG)

    cam_flat = x.reshape(bsz, n).astype(jnp.float32)
    gumbel = jax.random.gumbel(key, (bsz, 2, n), dtype=jnp.float32)

    fg_flat, bg_flat = sample_fg_bg(cam_flat, gumbel, k_fg=k_fg, k_bg=k_bg,
                                    nbr_roi=nbr_roi)
    fg = fg_flat.reshape(bsz, h, w)
    bg = bg_flat.reshape(bsz, h, w)
    return dilate_and_merge(fg, bg, ksz=ksz, ignore_idx=seg_ignore_idx)


class MBProbNegAreaSeederSLFCAMS:
    """JAX/Pallas port of the PyTorch module (default forward path)."""

    def __init__(self, min_=1, max_=1, min_p=0.2, ksz=3, seg_ignore_idx=-255,
                 neg_samples_partial=False, equalize=False):
        assert isinstance(min_, int) and isinstance(max_, int)
        assert min_ >= 0 and max_ >= 0 and min_ + max_ > 0
        assert isinstance(ksz, int) and ksz > 0
        assert 0.0 <= float(min_p) <= 1.0
        if min_ > 0:
            assert float(min_p) > 0.0
        # TODO(synk): neg_samples_partial / class_idx == 0 branch (and the `equalize`
        # min_bg_ variant it uses) is not implemented; only the default path is.
        assert not neg_samples_partial
        del equalize  # only affects the unimplemented partial-negative path
        self.min_ = min_
        self.max_ = max_
        self.min_p = float(min_p)
        self.ksz = ksz
        self.ignore_idx = int(seg_ignore_idx)

    def __call__(self, x, key, class_idx=None):
        del class_idx
        return mb_prob_neg_area_seeder_slfcams(
            x, key, min_=self.min_, max_=self.max_, min_p=self.min_p,
            ksz=self.ksz, seg_ignore_idx=self.ignore_idx)


if __name__ == "__main__":
    root = jax.random.PRNGKey(0)
    k_cam, k_noise = jax.random.split(root)

    B, H, W = 2, 16, 16
    MIN_, MAX_, MIN_P, KSZ, IGN = 2, 3, 0.2, 3, -255

    x = jax.random.uniform(k_cam, (B, 1, H, W), dtype=jnp.float32)

    seeder = MBProbNegAreaSeederSLFCAMS(min_=MIN_, max_=MAX_, min_p=MIN_P, ksz=KSZ,
                                        seg_ignore_idx=IGN)
    out = seeder(x, k_noise)
    out = jax.block_until_ready(out)

    n = H * W
    k_fg = min(MAX_, n)
    nbr_roi = int(MIN_P * n)
    k_bg = min(MIN_, nbr_roi)

    # --- final label-map invariants ---
    assert out.shape == (B, H, W) and out.dtype == jnp.int32
    assert bool(jnp.all((out == IGN) | (out == 0) | (out == 1)))
    assert int(jnp.sum(out == 1)) <= B * k_fg * KSZ * KSZ
    assert int(jnp.sum(out == 0)) <= B * k_bg * KSZ * KSZ

    # --- sampler invariants: exact seed counts; bg restricted to the low-cam region ---
    cam_flat = x.reshape(B, n)
    gum = jax.random.gumbel(k_noise, (B, 2, n), dtype=jnp.float32)
    fg_m, bg_m = jax.block_until_ready(
        sample_fg_bg(cam_flat, gum, k_fg=k_fg, k_bg=k_bg, nbr_roi=nbr_roi))
    assert fg_m.shape == (B, n) and bg_m.shape == (B, n)
    assert int(jnp.min(fg_m)) >= 0 and int(jnp.max(fg_m)) <= 1
    assert int(jnp.min(bg_m)) >= 0 and int(jnp.max(bg_m)) <= 1
    for i in range(B):
        assert int(jnp.sum(fg_m[i])) == k_fg
        assert int(jnp.sum(bg_m[i])) == k_bg
        if k_bg > 0:
            thresh = jnp.sort(cam_flat[i])[nbr_roi - 1]
            assert bool(jnp.all(jnp.where(bg_m[i] == 1, cam_flat[i] <= thresh, True)))

    print("KERNEL_OK")
</pallas_src>

<mosaic_0001>
module attributes {stable_mosaic.version = 11 : i64} {
  func.func @_sample_kernel(%arg0: i32, %arg1: memref<1x1x256xf32, #tpu.memory_space<vmem>>, %arg2: memref<1x256x1xf32, #tpu.memory_space<vmem>>, %arg3: memref<1x1x256xf32, #tpu.memory_space<vmem>>, %arg4: memref<1x256x1xf32, #tpu.memory_space<vmem>>, %arg5: memref<1x1x256xf32, #tpu.memory_space<vmem>>, %arg6: memref<1x256x1xf32, #tpu.memory_space<vmem>>, %arg7: memref<1x1x256xi32, #tpu.memory_space<vmem>>, %arg8: memref<1x1x256xi32, #tpu.memory_space<vmem>>) attributes {dimension_semantics = [#tpu.dimension_semantics<parallel>], iteration_bounds = array<i64: 2>, scalar_prefetch = 0 : i64, scratch_operands = 0 : i64, tpu.core_type = #tpu.core_type<tc>, window_params = [{transform_indices = @transform_0, window_bounds = array<i64: 1, 1, 256>}, {transform_indices = @transform_1, window_bounds = array<i64: 1, 256, 1>}, {transform_indices = @transform_2, window_bounds = array<i64: 1, 1, 256>}, {transform_indices = @transform_3, window_bounds = array<i64: 1, 256, 1>}, {transform_indices = @transform_4, window_bounds = array<i64: 1, 1, 256>}, {transform_indices = @transform_5, window_bounds = array<i64: 1, 256, 1>}, {transform_indices = @transform_6, window_bounds = array<i64: 1, 1, 256>}, {transform_indices = @transform_7, window_bounds = array<i64: 1, 1, 256>}]} {
    %0 = tpu.iota {dimensions = array<i32: 1>} : vector<1x256xi32>
    %1 = tpu.iota {dimensions = array<i32: 0>} : vector<256x1xi32>
    %c256_i32 = arith.constant 256 : i32
    %2 = vector.broadcast %c256_i32 : i32 to vector<1x256xi32>
    %3 = arith.cmpi slt, %0, %2 : vector<1x256xi32>
    %c256_i32_0 = arith.constant 256 : i32
    %4 = vector.broadcast %c256_i32_0 : i32 to vector<256x1xi32>
    %5 = arith.cmpi slt, %1, %4 : vector<256x1xi32>
    %c0 = arith.constant 0 : index
    %c0_1 = arith.constant 0 : index
    %c0_2 = arith.constant 0 : index
    %6 = vector.load %arg1[%c0, %c0_1, %c0_2] : memref<1x1x256xf32, #tpu.memory_space<vmem>>, vector<1x1x256xf32>
    %7 = vector.shape_cast %6 : vector<1x1x256xf32> to vector<1x256xf32>
    %cst = arith.constant 9.99999997E-7 : f32
    %8 = vector.broadcast %cst : f32 to vector<1x256xf32>
    %9 = arith.addf %7, %8 : vector<1x256xf32>
    %c0_3 = arith.constant 0 : index
    %c0_4 = arith.constant 0 : index
    %c0_5 = arith.constant 0 : index
    %10 = vector.load %arg2[%c0_3, %c0_4, %c0_5] : memref<1x256x1xf32, #tpu.memory_space<vmem>>, vector<1x256x1xf32>
    %11 = vector.shape_cast %10 : vector<1x256x1xf32> to vector<256x1xf32>
    %cst_6 = arith.constant 9.99999997E-7 : f32
    %12 = vector.broadcast %cst_6 : f32 to vector<256x1xf32>
    %13 = arith.addf %11, %12 : vector<256x1xf32>
    %cst_7 = arith.constant 0.000000e+00 : f32
    %14 = vector.broadcast %cst_7 : f32 to vector<1x256xf32>
    %15 = arith.select %3, %9, %14 : vector<1x256xi1>, vector<1x256xf32>
    %16 = vector.shape_cast %15 : vector<1x256xf32> to vector<1x1x256xf32>
    %cst_8 = arith.constant dense<0.000000e+00> : vector<1xf32>
    %17 = vector.multi_reduction <add>, %16, %cst_8 [1, 2] : vector<1x1x256xf32> to vector<1xf32>
    %18 = vector.shape_cast %17 : vector<1xf32> to vector<1x1x1xf32>
    %19 = vector.extract %18[0, 0, 0] : f32 from vector<1x1x1xf32>
    %cst_9 = arith.constant 1.000000e+00 : f32
    %20 = arith.divf %cst_9, %19 : f32
    %21 = math.log %9 : vector<1x256xf32>
    %c0_10 = arith.constant 0 : index
    %c0_11 = arith.constant 0 : index
    %c0_12 = arith.constant 0 : index
    %22 = vector.load %arg3[%c0_10, %c0_11, %c0_12] : memref<1x1x256xf32, #tpu.memory_space<vmem>>, vector<1x1x256xf32>
    %23 = vector.shape_cast %22 : vector<1x1x256xf32> to vector<1x256xf32>
    %24 = arith.addf %21, %23 : vector<1x256xf32>
    %cst_13 = arith.constant -1.000000e+30 : f32
    %25 = vector.broadcast %cst_13 : f32 to vector<1x256xf32>
    %26 = arith.select %3, %24, %25 : vector<1x256xi1>, vector<1x256xf32>
    %27 = math.log %13 : vector<256x1xf32>
    %c0_14 = arith.constant 0 : index
    %c0_15 = arith.constant 0 : index
    %c0_16 = arith.constant 0 : index
    %28 = vector.load %arg4[%c0_14, %c0_15, %c0_16] : memref<1x256x1xf32, #tpu.memory_space<vmem>>, vector<1x256x1xf32>
    %29 = vector.shape_cast %28 : vector<1x256x1xf32> to vector<256x1xf32>
    %30 = arith.addf %27, %29 : vector<256x1xf32>
    %cst_17 = arith.constant -1.000000e+30 : f32
    %31 = vector.broadcast %cst_17 : f32 to vector<256x1xf32>
    %32 = arith.select %5, %30, %31 : vector<256x1xi1>, vector<256x1xf32>
    %33 = vector.broadcast %32 : vector<256x1xf32> to vector<256x256xf32>
    %34 = vector.broadcast %26 : vector<1x256xf32> to vector<256x256xf32>
    %35 = arith.cmpf ogt, %33, %34 : vector<256x256xf32>
    %36 = vector.broadcast %32 : vector<256x1xf32> to vector<256x256xf32>
    %37 = vector.broadcast %26 : vector<1x256xf32> to vector<256x256xf32>
    %38 = arith.cmpf oeq, %36, %37 : vector<256x256xf32>
    %39 = vector.broadcast %1 : vector<256x1xi32> to vector<256x256xi32>
    %40 = vector.broadcast %0 : vector<1x256xi32> to vector<256x256xi32>
    %41 = arith.cmpi slt, %39, %40 : vector<256x256xi32>
    %42 = arith.andi %38, %41 : vector<256x256xi1>
    %43 = arith.ori %35, %42 : vector<256x256xi1>
    %44 = vector.broadcast %5 : vector<256x1xi1> to vector<256x256xi1>
    %45 = arith.andi %43, %44 : vector<256x256xi1>
    %46 = arith.extui %45 : vector<256x256xi1> to vector<256x256xi32>
    %cst_18 = arith.constant dense<0> : vector<256xi32>
    %47 = vector.multi_reduction <add>, %46, %cst_18 [0] : vector<256x256xi32> to vector<256xi32>
    %48 = vector.shape_cast %47 : vector<256xi32> to vector<1x256xi32>
    %c3_i32 = arith.constant 3 : i32
    %49 = vector.broadcast %c3_i32 : i32 to vector<1x256xi32>
    %50 = arith.cmpi slt, %48, %49 : vector<1x256xi32>
    %51 = arith.andi %3, %50 : vector<1x256xi1>
    %52 = arith.extui %51 : vector<1x256xi1> to vector<1x256xi32>
    %c0_19 = arith.constant 0 : index
    %c0_20 = arith.constant 0 : index
    %c0_21 = arith.constant 0 : index
    %53 = vector.load %arg7[%c0_19, %c0_20, %c0_21] : memref<1x1x256xi32, #tpu.memory_space<vmem>>, vector<1x1x256xi32>
    %54 = vector.shape_cast %53 : vector<1x1x256xi32> to vector<1x256xi32>
    %55 = vector.shape_cast %52 : vector<1x256xi32> to vector<1x1x256xi32>
    tpu.vector_store %arg7[%c0_19, %c0_20, %c0_21], %55 {strides = array<i32>} : memref<1x1x256xi32, #tpu.memory_space<vmem>>, vector<1x1x256xi32>,
    %56 = vector.broadcast %20 : f32 to vector<1x256xf32>
    %57 = arith.mulf %9, %56 : vector<1x256xf32>
    %cst_22 = arith.constant 1.000000e+00 : f32
    %58 = vector.broadcast %cst_22 : f32 to vector<1x256xf32>
    %59 = arith.subf %58, %57 : vector<1x256xf32>
    %60 = vector.broadcast %20 : f32 to vector<256x1xf32>
    %61 = arith.mulf %13, %60 : vector<256x1xf32>
    %cst_23 = arith.constant 1.000000e+00 : f32
    %62 = vector.broadcast %cst_23 : f32 to vector<256x1xf32>
    %63 = arith.subf %62, %61 : vector<256x1xf32>
    %cst_24 = arith.constant -1.000000e+30 : f32
    %64 = vector.broadcast %cst_24 : f32 to vector<1x256xf32>
    %65 = arith.select %3, %59, %64 : vector<1x256xi1>, vector<1x256xf32>
    %cst_25 = arith.constant -1.000000e+30 : f32
    %66 = vector.broadcast %cst_25 : f32 to vector<256x1xf32>
    %67 = arith.select %5, %63, %66 : vector<256x1xi1>, vector<256x1xf32>
    %68 = vector.broadcast %67 : vector<256x1xf32> to vector<256x256xf32>
    %69 = vector.broadcast %65 : vector<1x256xf32> to vector<256x256xf32>
    %70 = arith.cmpf ogt, %68, %69 : vector<256x256xf32>
    %71 = vector.broadcast %67 : vector<256x1xf32> to vector<256x256xf32>
    %72 = vector.broadcast %65 : vector<1x256xf32> to vector<256x256xf32>
    %73 = arith.cmpf oeq, %71, %72 : vector<256x256xf32>
    %74 = vector.broadcast %1 : vector<256x1xi32> to vector<256x256xi32>
    %75 = vector.broadcast %0 : vector<1x256xi32> to vector<256x256xi32>
    %76 = arith.cmpi slt, %74, %75 : vector<256x256xi32>
    %77 = arith.andi %73, %76 : vector<256x256xi1>
    %78 = arith.ori %70, %77 : vector<256x256xi1>
    %79 = vector.broadcast %5 : vector<256x1xi1> to vector<256x256xi1>
    %80 = arith.andi %78, %79 : vector<256x256xi1>
    %81 = vector.broadcast %3 : vector<1x256xi1> to vector<256x256xi1>
    %82 = arith.andi %80, %81 : vector<256x256xi1>
    %83 = arith.extui %82 : vector<256x256xi1> to vector<256x256xi32>
    %cst_26 = arith.constant dense<0> : vector<256xi32>
    %84 = vector.multi_reduction <add>, %83, %cst_26 [0] : vector<256x256xi32> to vector<256xi32>
    %85 = vector.shape_cast %84 : vector<256xi32> to vector<1x256xi32>
    %cst_27 = arith.constant dense<0> : vector<256xi32>
    %86 = vector.multi_reduction <add>, %83, %cst_27 [1] : vector<256x256xi32> to vector<256xi32>
    %87 = vector.shape_cast %86 : vector<256xi32> to vector<256x1xi32>
    %c255_i32 = arith.constant 255 : i32
    %88 = vector.broadcast %c255_i32 : i32 to vector<256x1xi32>
    %89 = arith.subi %88, %87 : vector<256x1xi32>
    %c51_i32 = arith.constant 51 : i32
    %90 = vector.broadcast %c51_i32 : i32 to vector<1x256xi32>
    %91 = arith.cmpi slt, %85, %90 : vector<1x256xi32>
    %92 = arith.andi %3, %91 : vector<1x256xi1>
    %c51_i32_28 = arith.constant 51 : i32
    %93 = vector.broadcast %c51_i32_28 : i32 to vector<256x1xi32>
    %94 = arith.cmpi slt, %89, %93 : vector<256x1xi32>
    %95 = arith.andi %5, %94 : vector<256x1xi1>
    %96 = math.log %59 : vector<1x256xf32>
    %c0_29 = arith.constant 0 : index
    %c0_30 = arith.constant 0 : index
    %c0_31 = arith.constant 0 : index
    %97 = vector.load %arg5[%c0_29, %c0_30, %c0_31] : memref<1x1x256xf32, #tpu.memory_space<vmem>>, vector<1x1x256xf32>
    %98 = vector.shape_cast %97 : vector<1x1x256xf32> to vector<1x256xf32>
    %99 = arith.addf %96, %98 : vector<1x256xf32>
    %cst_32 = arith.constant -1.000000e+30 : f32
    %100 = vector.broadcast %cst_32 : f32 to vector<1x256xf32>
    %101 = arith.select %92, %99, %100 : vector<1x256xi1>, vector<1x256xf32>
    %102 = math.log %63 : vector<256x1xf32>
    %c0_33 = arith.constant 0 : index
    %c0_34 = arith.constant 0 : index
    %c0_35 = arith.constant 0 : index
    %103 = vector.load %arg6[%c0_33, %c0_34, %c0_35] : memref<1x256x1xf32, #tpu.memory_space<vmem>>, vector<1x256x1xf32>
    %104 = vector.shape_cast %103 : vector<1x256x1xf32> to vector<256x1xf32>
    %105 = arith.addf %102, %104 : vector<256x1xf32>
    %cst_36 = arith.constant -1.000000e+30 : f32
    %106 = vector.broadcast %cst_36 : f32 to vector<256x1xf32>
    %107 = arith.select %95, %105, %106 : vector<256x1xi1>, vector<256x1xf32>
    %108 = vector.broadcast %107 : vector<256x1xf32> to vector<256x256xf32>
    %109 = vector.broadcast %101 : vector<1x256xf32> to vector<256x256xf32>
    %110 = arith.cmpf ogt, %108, %109 : vector<256x256xf32>
    %111 = vector.broadcast %107 : vector<256x1xf32> to vector<256x256xf32>
    %112 = vector.broadcast %101 : vector<1x256xf32> to vector<256x256xf32>
    %113 = arith.cmpf oeq, %111, %112 : vector<256x256xf32>
    %114 = vector.broadcast %1 : vector<256x1xi32> to vector<256x256xi32>
    %115 = vector.broadcast %0 : vector<1x256xi32> to vector<256x256xi32>
    %116 = arith.cmpi slt, %114, %115 : vector<256x256xi32>
    %117 = arith.andi %113, %116 : vector<256x256xi1>
    %118 = arith.ori %110, %117 : vector<256x256xi1>
    %119 = vector.broadcast %5 : vector<256x1xi1> to vector<256x256xi1>
    %120 = arith.andi %118, %119 : vector<256x256xi1>
    %121 = arith.extui %120 : vector<256x256xi1> to vector<256x256xi32>
    %cst_37 = arith.constant dense<0> : vector<256xi32>
    %122 = vector.multi_reduction <add>, %121, %cst_37 [0] : vector<256x256xi32> to vector<256xi32>
    %123 = vector.shape_cast %122 : vector<256xi32> to vector<1x256xi32>
    %c2_i32 = arith.constant 2 : i32
    %124 = vector.broadcast %c2_i32 : i32 to vector<1x256xi32>
    %125 = arith.cmpi slt, %123, %124 : vector<1x256xi32>
    %126 = arith.andi %92, %125 : vector<1x256xi1>
    %127 = arith.extui %126 : vector<1x256xi1> to vector<1x256xi32>
    %c0_38 = arith.constant 0 : index
    %c0_39 = arith.constant 0 : index
    %c0_40 = arith.constant 0 : index
    %128 = vector.load %arg8[%c0_38, %c0_39, %c0_40] : memref<1x1x256xi32, #tpu.memory_space<vmem>>, vector<1x1x256xi32>
    %129 = vector.shape_cast %128 : vector<1x1x256xi32> to vector<1x256xi32>
    %130 = vector.shape_cast %127 : vector<1x256xi32> to vector<1x1x256xi32>
    tpu.vector_store %arg8[%c0_38, %c0_39, %c0_40], %130 {strides = array<i32>} : memref<1x1x256xi32, #tpu.memory_space<vmem>>, vector<1x1x256xi32>,
    return
  }
  func.func @transform_0(%arg0: i32) -> (i32, i32, i32) {
    %c0_i32 = arith.constant 0 : i32
    %c0_i32_0 = arith.constant 0 : i32
    %c0_i32_1 = arith.constant 0 : i32
    return %arg0, %c0_i32, %c0_i32_0 : i32, i32, i32
  }
  func.func @transform_1(%arg0: i32) -> (i32, i32, i32) {
    %c0_i32 = arith.constant 0 : i32
    %c0_i32_0 = arith.constant 0 : i32
    %c0_i32_1 = arith.constant 0 : i32
    return %arg0, %c0_i32, %c0_i32_0 : i32, i32, i32
  }
  func.func @transform_2(%arg0: i32) -> (i32, i32, i32) {
    %c0_i32 = arith.constant 0 : i32
    %c0_i32_0 = arith.constant 0 : i32
    %c0_i32_1 = arith.constant 0 : i32
    return %arg0, %c0_i32, %c0_i32_0 : i32, i32, i32
  }
  func.func @transform_3(%arg0: i32) -> (i32, i32, i32) {
    %c0_i32 = arith.constant 0 : i32
    %c0_i32_0 = arith.constant 0 : i32
    %c0_i32_1 = arith.constant 0 : i32
    return %arg0, %c0_i32, %c0_i32_0 : i32, i32, i32
  }
  func.func @transform_4(%arg0: i32) -> (i32, i32, i32) {
    %c0_i32 = arith.constant 0 : i32
    %c0_i32_0 = arith.constant 0 : i32
    %c0_i32_1 = arith.constant 0 : i32
    return %arg0, %c0_i32, %c0_i32_0 : i32, i32, i32
  }
  func.func @transform_5(%arg0: i32) -> (i32, i32, i32) {
    %c0_i32 = arith.constant 0 : i32
    %c0_i32_0 = arith.constant 0 : i32
    %c0_i32_1 = arith.constant 0 : i32
    return %arg0, %c0_i32, %c0_i32_0 : i32, i32, i32
  }
  func.func @transform_6(%arg0: i32) -> (i32, i32, i32) {
    %c0_i32 = arith.constant 0 : i32
    %c0_i32_0 = arith.constant 0 : i32
    %c0_i32_1 = arith.constant 0 : i32
    return %arg0, %c0_i32, %c0_i32_0 : i32, i32, i32
  }
  func.func @transform_7(%arg0: i32) -> (i32, i32, i32) {
    %c0_i32 = arith.constant 0 : i32
    %c0_i32_0 = arith.constant 0 : i32
    %c0_i32_1 = arith.constant 0 : i32
    return %arg0, %c0_i32, %c0_i32_0 : i32, i32, i32
  }
}

module attributes {stable_mosaic.version = 11 : i64} {
  func.func @_dilate_merge_kernel(%arg0: i32, %arg1: memref<1x16x16xi32, #tpu.memory_space<vmem>>, %arg2: memref<1x16x16xi32, #tpu.memory_space<vmem>>, %arg3: memref<1x16x16xi32, #tpu.memory_space<vmem>>) attributes {dimension_semantics = [#tpu.dimension_semantics<parallel>], iteration_bounds = array<i64: 2>, scalar_prefetch = 0 : i64, scratch_operands = 0 : i64, tpu.core_type = #tpu.core_type<tc>, window_params = [{transform_indices = @transform_0, window_bounds = array<i64: 1, 16, 16>}, {transform_indices = @transform_1, window_bounds = array<i64: 1, 16, 16>}, {transform_indices = @transform_2, window_bounds = array<i64: 1, 16, 16>}]} {
    %c0 = arith.constant 0 : index
    %c0_0 = arith.constant 0 : index
    %c0_1 = arith.constant 0 : index
    %0 = vector.load %arg1[%c0, %c0_0, %c0_1] : memref<1x16x16xi32, #tpu.memory_space<vmem>>, vector<1x16x16xi32>
    %1 = vector.shape_cast %0 : vector<1x16x16xi32> to vector<16x16xi32>
    %c0_2 = arith.constant 0 : index
    %c0_3 = arith.constant 0 : index
    %c0_4 = arith.constant 0 : index
    %2 = vector.load %arg2[%c0_2, %c0_3, %c0_4] : memref<1x16x16xi32, #tpu.memory_space<vmem>>, vector<1x16x16xi32>
    %3 = vector.shape_cast %2 : vector<1x16x16xi32> to vector<16x16xi32>
    %4 = tpu.iota {dimensions = array<i32: 0>} : vector<16x16xi32>
    %5 = tpu.iota {dimensions = array<i32: 1>} : vector<16x16xi32>
    %6 = arith.subi %5, %4 : vector<16x16xi32>
    %c-1_i32 = arith.constant -1 : i32
    %7 = vector.broadcast %c-1_i32 : i32 to vector<16x16xi32>
    %8 = arith.cmpi sge, %6, %7 : vector<16x16xi32>
    %c1_i32 = arith.constant 1 : i32
    %9 = vector.broadcast %c1_i32 : i32 to vector<16x16xi32>
    %10 = arith.cmpi sle, %6, %9 : vector<16x16xi32>
    %11 = arith.andi %8, %10 : vector<16x16xi1>
    %12 = arith.extui %11 : vector<16x16xi1> to vector<16x16xi32>
    %13 = arith.sitofp %12 : vector<16x16xi32> to vector<16x16xf32>
    %14 = tpu.iota {dimensions = array<i32: 0>} : vector<16x16xi32>
    %15 = tpu.iota {dimensions = array<i32: 1>} : vector<16x16xi32>
    %16 = arith.subi %14, %15 : vector<16x16xi32>
    %c-1_i32_5 = arith.constant -1 : i32
    %17 = vector.broadcast %c-1_i32_5 : i32 to vector<16x16xi32>
    %18 = arith.cmpi sge, %16, %17 : vector<16x16xi32>
    %c1_i32_6 = arith.constant 1 : i32
    %19 = vector.broadcast %c1_i32_6 : i32 to vector<16x16xi32>
    %20 = arith.cmpi sle, %16, %19 : vector<16x16xi32>
    %21 = arith.andi %18, %20 : vector<16x16xi1>
    %22 = arith.extui %21 : vector<16x16xi1> to vector<16x16xi32>
    %23 = arith.sitofp %22 : vector<16x16xi32> to vector<16x16xf32>
    %24 = arith.sitofp %1 : vector<16x16xi32> to vector<16x16xf32>
    %cst = arith.constant dense<0.000000e+00> : vector<16x16xf32>
    %25 = tpu.matmul %13, %24, %cst {dimension_numbers = #tpu.dot_dimension_numbers<[1], [0], [0], [1], [0, 0, 1, 1], [], []>} : vector<16x16xf32>, vector<16x16xf32>, vector<16x16xf32> -> vector<16x16xf32>
    %cst_7 = arith.constant dense<0.000000e+00> : vector<16x16xf32>
    %26 = tpu.matmul %25, %23, %cst_7 {dimension_numbers = #tpu.dot_dimension_numbers<[1], [0], [0], [1], [0, 0, 1, 1], [], []>} : vector<16x16xf32>, vector<16x16xf32>, vector<16x16xf32> -> vector<16x16xf32>
    %cst_8 = arith.constant 5.000000e-01 : f32
    %27 = vector.broadcast %cst_8 : f32 to vector<16x16xf32>
    %28 = arith.cmpf ogt, %26, %27 : vector<16x16xf32>
    %29 = arith.extui %28 : vector<16x16xi1> to vector<16x16xi32>
    %30 = arith.sitofp %3 : vector<16x16xi32> to vector<16x16xf32>
    %cst_9 = arith.constant dense<0.000000e+00> : vector<16x16xf32>
    %31 = tpu.matmul %13, %30, %cst_9 {dimension_numbers = #tpu.dot_dimension_numbers<[1], [0], [0], [1], [0, 0, 1, 1], [], []>} : vector<16x16xf32>, vector<16x16xf32>, vector<16x16xf32> -> vector<16x16xf32>
    %cst_10 = arith.constant dense<0.000000e+00> : vector<16x16xf32>
    %32 = tpu.matmul %31, %23, %cst_10 {dimension_numbers = #tpu.dot_dimension_numbers<[1], [0], [0], [1], [0, 0, 1, 1], [], []>} : vector<16x16xf32>, vector<16x16xf32>, vector<16x16xf32> -> vector<16x16xf32>
    %cst_11 = arith.constant 5.000000e-01 : f32
    %33 = vector.broadcast %cst_11 : f32 to vector<16x16xf32>
    %34 = arith.cmpf ogt, %32, %33 : vector<16x16xf32>
    %35 = arith.extui %34 : vector<16x16xi1> to vector<16x16xi32>
    %36 = arith.addi %29, %35 : vector<16x16xi32>
    %c2_i32 = arith.constant 2 : i32
    %37 = vector.broadcast %c2_i32 : i32 to vector<16x16xi32>
    %38 = arith.cmpi eq, %36, %37 : vector<16x16xi32>
    %c0_i32 = arith.constant 0 : i32
    %39 = vector.broadcast %c0_i32 : i32 to vector<16x16xi32>
    %40 = arith.select %38, %39, %29 : vector<16x16xi1>, vector<16x16xi32>
    %c0_i32_12 = arith.constant 0 : i32
    %41 = vector.broadcast %c0_i32_12 : i32 to vector<16x16xi32>
    %42 = arith.select %38, %41, %35 : vector<16x16xi1>, vector<16x16xi32>
    %c-255_i32 = arith.constant -255 : i32
    %43 = vector.broadcast %c-255_i32 : i32 to vector<16x16xi32>
    %c1_i32_13 = arith.constant 1 : i32
    %44 = vector.broadcast %c1_i32_13 : i32 to vector<16x16xi32>
    %45 = arith.cmpi eq, %40, %44 : vector<16x16xi32>
    %c1_i32_14 = arith.constant 1 : i32
    %46 = vector.broadcast %c1_i32_14 : i32 to vector<16x16xi32>
    %47 = arith.select %45, %46, %43 : vector<16x16xi1>, vector<16x16xi32>
    %c1_i32_15 = arith.constant 1 : i32
    %48 = vector.broadcast %c1_i32_15 : i32 to vector<16x16xi32>
    %49 = arith.cmpi eq, %42, %48 : vector<16x16xi32>
    %c0_i32_16 = arith.constant 0 : i32
    %50 = vector.broadcast %c0_i32_16 : i32 to vector<16x16xi32>
    %51 = arith.select %49, %50, %47 : vector<16x16xi1>, vector<16x16xi32>
    %c0_17 = arith.constant 0 : index
    %c0_18 = arith.constant 0 : index
    %c0_19 = arith.constant 0 : index
    %52 = vector.load %arg3[%c0_17, %c0_18, %c0_19] : memref<1x16x16xi32, #tpu.memory_space<vmem>>, vector<1x16x16xi32>
    %53 = vector.shape_cast %52 : vector<1x16x16xi32> to vector<16x16xi32>
    %54 = vector.shape_cast %51 : vector<16x16xi32> to vector<1x16x16xi32>
    tpu.vector_store %arg3[%c0_17, %c0_18, %c0_19], %54 {strides = array<i32>} : memref<1x16x16xi32, #tpu.memory_space<vmem>>, vector<1x16x16xi32>,
    return
  }
  func.func @transform_0(%arg0: i32) -> (i32, i32, i32) {
    %c0_i32 = arith.constant 0 : i32
    %c0_i32_0 = arith.constant 0 : i32
    %c0_i32_1 = arith.constant 0 : i32
    return %arg0, %c0_i32, %c0_i32_0 : i32, i32, i32
  }
  func.func @transform_1(%arg0: i32) -> (i32, i32, i32) {
    %c0_i32 = arith.constant 0 : i32
    %c0_i32_0 = arith.constant 0 : i32
    %c0_i32_1 = arith.constant 0 : i32
    return %arg0, %c0_i32, %c0_i32_0 : i32, i32, i32
  }
  func.func @transform_2(%arg0: i32) -> (i32, i32, i32) {
    %c0_i32 = arith.constant 0 : i32
    %c0_i32_0 = arith.constant 0 : i32
    %c0_i32_1 = arith.constant 0 : i32
    return %arg0, %c0_i32, %c0_i32_0 : i32, i32, i32
  }
}

</mosaic_0001>

<bundles_post_ra>
// kernel: squeeze.7
= control target key start
LH: loop header
LB: loop body
LE: loop exit
PB: predicated region body
PF: predicated region fallthrough
CT: control target
= control target key end

     0   :  { %vm11_vm0 = vcmask 130048   ;;  %s77_s10 = smov 80   ;;  %s78_s15 = smov 96   ;;  %s135_s0 = inlined_call_operand.vmem [shape: s32[2,256], index: 0, kind: input, shape index: {}]   ;;  %s136_s1 = inlined_call_operand.vmem [shape: s32[2,16,16], index: 1, kind: output, shape index: {}]  }
   0x1   :  { %v60_v0 = vld [vmem:[%s135_s0 + $0x2] sm:$0x3]  ;;  %v8_v1 = vld [vmem:[%s135_s0] sm:$0x3]  ;;  %s76_s0 = smov 112   ;;  %s79_s16 = smov 64  }
   0x2   :  { %7 = vst [vmem:[#allocation0 + $0x8] sm:$0x3] %v60_v0  ;;  %9 = vst [vmem:[#allocation0] sm:$0x3] %v8_v1  ;;  %s80_s17 = smov 48   ;;  %s81_s18 = smov 32  }
   0x3   :  { %s82_s19 = smov 16  }
   0x9   :  { %v18_v2 = vld.sshfl [vmem:[#allocation0] sm:$0xff pattern:$0x99999180]  }
   0xa   :  { %v10_v3 = vld [vmem:[#allocation0] sm:$0x3]   ;;  %19 = vrot.lane.b32.xlu0 %v18_v2, %s76_s0  ;;  %31 = vrot.lane.b32.xlu1 %v18_v2, %s77_s10  ;;  %v14_v4 = vld [vmem:[#allocation0 + $0x8] sm:$0x3]  }
   0xb   :  { %12 = vst.msk [vmem:[%s136_s1] ss:$16 sm:$0x3] %vm11_vm0, %v10_v3   ;;  %61 = vst.msk [vmem:[%s136_s1 + $0x8] ss:$16 sm:$0x3] %vm11_vm0, %v14_v4  }
   0xe   :  { %25 = vrot.lane.b32.xlu0 %v18_v2, %s78_s15  ;;  %37 = vrot.lane.b32.xlu1 %v18_v2, %s79_s16 }
  0x12   :  { %43 = vrot.lane.b32.xlu0 %v18_v2, %s80_s17  ;;  %49 = vrot.lane.b32.xlu1 %v18_v2, %s81_s18 }
  0x16   :  { %55 = vrot.lane.b32.xlu0 %v18_v2, %s82_s19 }
  0x7c   :  { %v20_v5 = vpop.permute.xlu0 %19   ;;  %v32_v6 = vpop.permute.xlu1 %31  }
  0x7d   :  { %62 = vst.msk [vmem:[%s136_s1 + $0x1] ss:$8 sm:$0xf] %vm11_vm0, %v20_v5   ;;  %64 = vst.msk [vmem:[%s136_s1 + $0x3] ss:$8 sm:$0xf] %vm11_vm0, %v32_v6  }
  0x80   :  { %v26_v7 = vpop.permute.xlu0 %25   ;;  %v38_v8 = vpop.permute.xlu1 %37  }
  0x81   :  { %63 = vst.msk [vmem:[%s136_s1 + $0x2] ss:$8 sm:$0xf] %vm11_vm0, %v26_v7   ;;  %65 = vst.msk [vmem:[%s136_s1 + $0x4] ss:$8 sm:$0xf] %vm11_vm0, %v38_v8  }
  0x84   :  { %v44_v9 = vpop.permute.xlu0 %43   ;;  %v50_v10 = vpop.permute.xlu1 %49  }
  0x85   :  { %66 = vst.msk [vmem:[%s136_s1 + $0x5] ss:$8 sm:$0xf] %vm11_vm0, %v44_v9   ;;  %67 = vst.msk [vmem:[%s136_s1 + $0x6] ss:$8 sm:$0xf] %vm11_vm0, %v50_v10  }
  0x88   :  { %v56_v11 = vpop.permute.xlu0 %55  }
  0x89   :  { %68 = vst.msk [vmem:[%s136_s1 + $0x7] ss:$8 sm:$0xf] %vm11_vm0, %v56_v11  }

// kernel: mb_prob_neg_area_seeder_slfcams.3
= control target key start
LH: loop header
LB: loop body
LE: loop exit
PB: predicated region body
PF: predicated region fallthrough
CT: control target
= control target key end

     0   :  { %7 = vsyncpa [#allocation3], 0  ;;  %s976_s0 = inlined_call_operand.vmem [shape: s32[2,16,16], index: 0, kind: input, shape index: {}]   ;;  %s977_s1 = inlined_call_operand.vmem [shape: s32[2,16,16], index: 1, kind: input, shape index: {}]   ;;  %s978_s2 = inlined_call_operand.hbm [shape: s32[2,16,16], index: 2, kind: output, shape index: {}]  }
   0x1   :  { %9 = vsyncpa [#allocation3 + $0x1], 0  ;;  %s856_s9 = smov 0   ;;  %s858_s10 = smov 0  }
   0x2   :  { %s860_s11 = smov 0   ;;  %s862_s12 = smov 0  }
   0x3 LB: > { %s877_s13 = sadd.s32 4294967295, %s832_s12   ;;  %s632_s14 = sadd.s32 4294967294, %s832_s12   ;;  %s832_s12 = sphi %s862_s12, %s984_s12   ;;  %s828_s11 = sphi %s860_s11, %s983_s11   ;;  %s824_s10 = sphi %s858_s10, %s982_s10   ;;  %s820_s9 = sphi %s856_s9, %s981_s9  }
   0x4   : > { %s881_s15 = sadd.s32 1, %s832_s12   ;;  %s74_s16 = sadd.s32 1, %s828_s11 }
   0x5   : > { %s71_s17 = ssub.s32 %s832_s12, %s881_s15  ;;  %p84_p0 = scmp.ne.s32.totalorder %s828_s11, %s824_s10 }
   0x6   : > { %p72_p1 = scmp.eq.s32.totalorder %s71_s17, 0  ;;  %p85_p2 = scmp.eq.s32.totalorder %s877_s13, 1 }
   0x7   : > { %p90_p3 = scmp.ne.s32.totalorder %s824_s10, %s820_s9  ;;  %p91_p4 = scmp.eq.s32.totalorder %s632_s14, 1 }
   0x8   : > { %s892_s18 = scalar_select %p72_p1, %s828_s11, %s74_s16  }
   0x9   : > { %p894_p5 = por %p85_p2, %p84_p0  ;;  %p898_p6 = por %p91_p4, %p90_p3 }
   0xa   : > { %p635_p7 = scmp.ge.s32.totalorder %s832_s12, 1  ;;  %p125_p8 = scmp.lt.s32.totalorder %s832_s12, 3 }
   0xc   : > { %p126_p9 = pnand %p635_p7, %p125_p8 }
   0xd   : > { %p152_p10 = scmp.lt.s32.totalorder (!%p126_p9), %s877_s13, 1  ;;  %v166_v0 = vlaneseq (!%p126_p9)  ;;  %vm197_vm0 = vcmask (!%p126_p9), 130048   ;;  %v834_v15 = vmov (!%p126_p9), 0.0   ;;  %v835_v21 = vmov (!%p126_p9), 1.0|1.0   ;;  %s149_s29 = sand.u32 (!%p126_p9), 1, %s824_s10  }
   0xe   : > { %129 = sbr.rel (%p126_p9) target bundleno = 489 (0x1e9), region = 28  ;;  %s636_s30 = sshll.u32 (!%p126_p9), %s149_s29, 4  ;;  %v836_v30 = vmov (!%p126_p9), 0   ;;  %v837_v41 = vmov (!%p126_p9), 4294967041  }
   0xf   : > { %v167_v1 = vshrl.u32 (!%p126_p9), %v166_v0, 7  ;;  %v170_v2 = vand.u32 (!%p126_p9), 127, %v166_v0  ;;  %s151_s3 = scalar_lea.vmem (!%p126_p9), [#allocation2], %s636_s30  ;;  %s664_s5 = sshll.u32 (!%p126_p9), %s877_s13, 8 }
  0x10   : > { %s558_s4 = sshll.u32 (!%p126_p9), %s151_s3, 4  ;;  %s929_s8 = scalar_lea.hbm (!%p126_p9), %s978_s2, %s664_s5  ;;  %s924_s4 = int_to_ptr.vmem [resolvable:$true] %s558_s4 }
  0x11   : > { %v168_v3 = vadd.s32 (!%p126_p9), 8, %v167_v1  ;;  %v171_v4 = vsub.s32 (!%p126_p9), %v170_v2, %v167_v1  ;;  %v183_v5 = vsub.s32 (!%p126_p9), %v167_v1, %v170_v2  ;;  %s770_s14 = scalar_lea.vmem (!%p126_p9), %s924_s4, 256  ;;  %s838_s16 = smov (!%p126_p9), [#allocation2]  }
  0x12   : > { %p771_p11 = scmp.ne.s32.totalorder (!%p126_p9), %s924_s4, %s770_s14  ;;  %s774_s17 = sshll.u32 (!%p126_p9), %s838_s16, 4  ;;  %s775_s17 = int_to_ptr.vmem [resolvable:$false] %s774_s17 }
  0x13   : > { %v172_v8 = vsub.s32 (!%p126_p9), %v170_v2, %v168_v3  ;;  %vm173_vm1 = vcmp.ge.s32.totalorder (!%p126_p9), %v171_v4, 4294967295  ;;  %vm175_vm2 = vcmp.le.s32.totalorder (!%p126_p9), %v171_v4, 1  ;;  %v184_v10 = vsub.s32 (!%p126_p9), %v168_v3, %v170_v2  ;;  %p777_p0 = scmp.lt.s32.totalorder (!%p126_p9), %s924_s4, %s775_s17 }
  0x14   : > { %vm177_vm3 = vmand (!%p126_p9), %vm173_vm1, %vm175_vm2  ;;  %vm185_vm4 = vcmp.ge.s32.totalorder (!%p126_p9), %v183_v5, 4294967295  ;;  %vm187_vm9 = vcmp.le.s32.totalorder (!%p126_p9), %v183_v5, 1  ;;  %p772_p12 = pnand (!%p126_p9), %p771_p11, %p894_p5 }
  0x15   : > { %s153_s21 = scalar_select %p152_p10, %s877_s13, 1  ;;  %vm174_vm5 = vcmp.ge.s32.totalorder %v172_v8, 4294967295  ;;  %vm176_vm6 = vcmp.le.s32.totalorder %v172_v8, 1  ;;  %v641_v16 = vsel %vm177_vm3, 1.0, %v834_v15  ;;  %vm186_vm8 = vcmp.ge.s32.totalorder %v184_v10, 4294967295  ;;  %vm189_vm11 = vmand %vm185_vm4, %vm187_vm9 }
  0x16   : > { %vm178_vm7 = vmand %vm174_vm5, %vm176_vm6  ;;  %685 = vmatprep.mubr.msk.f32.mxu0 %vm197_vm0, %v641_v16  ;;  %vm188_vm10 = vcmp.le.s32.totalorder %v184_v10, 1  ;;  %s935_s13 = scalar_lea.sflag [#allocation3], %s149_s29  ;;  %p773_p13 = pneg %p772_p12 }
  0x17   : > { %s662_s22 = sshll.u32 %s153_s21, 4  ;;  %vm190_vm12 = vmand %vm186_vm8, %vm188_vm10  ;;  %v642_v20 = vsel %vm178_vm7, 1.0, %v834_v15  ;;  %s776_s21 = scalar_lea.vmem %s775_s17, 512 }
  0x18   : > { %s156_s25 = scalar_lea.vmem %s976_s0, %s662_s22  ;;  %s161_s28 = scalar_lea.vmem %s977_s1, %s662_s22  ;;  %vm713_vm13 = vmpackc.low %vm190_vm12, %vm189_vm11 }
  0x19   : > { %v162_v6 = vld [vmem:[%s156_s25] sm:$0xff]  ;;  %v163_v7 = vld [vmem:[%s156_s25 + $0x8] sm:$0xff]  ;;  %714 = vmatprep.subr.msk.bf16.mxu1 %vm713_vm13, %v835_v21  ;;  %p778_p1 = scmp.lt.s32.totalorder %s776_s21, %s770_s14 }
  0x1a   : > { %v164_v9 = vld [vmem:[%s161_s28] sm:$0xff]  ;;  %v195_v11 = vcvt.s32.f32 %v162_v6  ;;  %v196_v12 = vcvt.s32.f32 %v163_v7  ;;  %v165_v13 = vld [vmem:[%s161_s28 + $0x8] sm:$0xff]  ;;  %716 = vmatpush3.bf16.msk.msra.mxu1 %vm713_vm13, %v835_v21 }
  0x1b   : > { %v364_v14 = vcvt.s32.f32 %v164_v9  ;;  %v365_v17 = vcvt.s32.f32 %v165_v13  ;;  %722 = vmatprep.subr.msk.bf16.mxu1 %vm713_vm13, %v835_v21  ;;  %p779_p2 = por %p778_p1, %p777_p0 }
  0x1c   : > { %v709_v18 = vpack.c.bf16 %v196_v12, %v195_v11 }
  0x1d   : > { %v717_v19 = vpack.c.bf16 %v365_v17, %v364_v14  ;;  %p780_p3 = pnand %p779_p2, %p773_p13 }
  0x1e   : > { %710 = vmatprep.subr.bf16.mxu0 %v709_v18 }
  0x1f   : > { %712 = vmatpush3.bf16.msra.mxu0 %v709_v18 }
  0x20   : > { %718 = vmatprep.subr.bf16.mxu0 %v717_v19 }
  0x22   : > { %686 = vmatmul.mubr.msk.f32.vlgmr.msra.gmra.mrb[0].mxu0 %vm197_vm0, %v642_v20 }
  0x23   : > { %720 = vmatpush3.bf16.msra.mxu0 %v717_v19  ;;  %699 = vmatprep.mubr.msk.f32.mxu0 %vm197_vm0, %v641_v16 }
  0x26   : > { %700 = vmatmul.mubr.msk.f32.vlgmr.msra.gmra.mrb[2].mxu0 %vm197_vm0, %v642_v20 }
  0xf5   : > { %v687_v22 = vpop.f32.mrb[0].mxu0 }
  0xf6   : > { %v270_v23 = vpop.f32.mrb[1].mxu0 }
  0xf7   : > { %692 = vmatprep.mubr.msk.f32.mxu1 %vm197_vm0, %v270_v23 }
  0xf8   : > { %693 = vmatmul.mubr.msk.f32.vlgmr.msra.gmra.mrb[0].mxu1 %vm197_vm0, %v687_v22 }
  0xf9   : > { %v701_v24 = vpop.f32.mrb[2].mxu0  ;;  %724 = vmatpush3.bf16.msk.msra.mxu1 %vm713_vm13, %v835_v21 }
  0xfa   : > { %v432_v25 = vpop.f32.mrb[3].mxu0 }
  0xfb   : > { %706 = vmatprep.mubr.msk.f32.mxu1 %vm197_vm0, %v432_v25 }
  0xfc   : > { %707 = vmatmul.mubr.msk.f32.vlgmr.msra.gmra.mrb[2].mxu1 %vm197_vm0, %v701_v24 }
 0x1cb   : > { %v694_v26 = vpop.f32.mrb[0].mxu1 }
 0x1cc   : > { %v351_v27 = vpop.f32.mrb[1].mxu1  ;;  %vm361_vm14 = vcmp.gt.f32.partialorder %v694_v26, 0.5 }
 0x1cd   : > { %vm360_vm15 = vcmp.gt.f32.partialorder %v351_v27, 0.5  ;;  %v363_v31 = vsel %vm361_vm14, 1, %v836_v30 }
 0x1ce   : > { %v362_v33 = vsel %vm360_vm15, 1, %v836_v30 }
 0x1cf   : > { %v708_v28 = vpop.f32.mrb[2].mxu1 }
 0x1d0   : > { %vm523_vm1 = vcmp.gt.f32.partialorder %v708_v28, 0.5  ;;  %v513_v29 = vpop.f32.mrb[3].mxu1 }
 0x1d1   : > { %v525_v32 = vsel %vm523_vm1, 1, %v836_v30  ;;  %vm522_vm2 = vcmp.gt.f32.partialorder %v513_v29, 0.5 }
 0x1d2   : > { %v527_v34 = vadd.s32 %v525_v32, %v363_v31  ;;  %v524_v35 = vsel %vm522_vm2, 1, %v836_v30 }
 0x1d3   : > { %v526_v36 = vadd.s32 %v524_v35, %v362_v33 }
 0x1d4   : > { %vm529_vm3 = vcmp.eq.s32.totalorder %v527_v34, 2 }
 0x1d5   : > { %v531_v37 = vsel %vm529_vm3, 0, %v363_v31  ;;  %v533_v38 = vsel %vm529_vm3, 0, %v525_v32  ;;  %vm528_vm4 = vcmp.eq.s32.totalorder %v526_v36, 2 }
 0x1d6   : > { %vm535_vm5 = vcmp.eq.s32.totalorder %v531_v37, 1  ;;  %vm539_vm6 = vcmp.eq.s32.totalorder %v533_v38, 1  ;;  %v530_v39 = vsel %vm528_vm4, 0, %v362_v33  ;;  %v532_v40 = vsel %vm528_vm4, 0, %v524_v35 }
 0x1d7   : > { %v537_v42 = vsel %vm535_vm5, 1, %v837_v41  ;;  %vm534_vm7 = vcmp.eq.s32.totalorder %v530_v39, 1  ;;  %vm538_vm8 = vcmp.eq.s32.totalorder %v532_v40, 1 }
 0x1d8   : > { %v541_v43 = vsel %vm539_vm6, 0, %v537_v42  ;;  %v536_v44 = vsel %vm534_vm7, 1, %v837_v41 }
 0x1d9   : > { %543 = vst.msk [vmem:[%s151_s3 + $0x8] sm:$0xff] %vm197_vm0, %v541_v43  ;;  %v540_v45 = vsel %vm538_vm8, 0, %v536_v44 }
 0x1da   : > { %542 = vst.msk [vmem:[%s151_s3] sm:$0xff] %vm197_vm0, %v540_v45 }
 0x1db   : > { %783 = shalt.err (!%p780_p3)
}
 0x1dc   : > { %s784_s22 = scalar_lea.hbm %s929_s8, 256  ;;  %s788_s25 = scalar_lea.hbm %s978_s2, 512 }
 0x1dd   : > { %p785_p4 = scmp.ne.s32.totalorder %s929_s8, %s784_s22  ;;  %p789_p9 = scmp.lt.u32.totalorder %s929_s8, %s978_s2 }
 0x1de   : > { %p790_p10 = scmp.lt.u32.totalorder %s788_s25, %s784_s22  ;;  %p792_p12 = scmp.lt.u32.totalorder %s784_s22, %s929_s8 }
 0x1df   : > { %p786_p7 = pnand %p785_p4, %p894_p5 }
 0x1e0   : > { %p791_p11 = por %p790_p10, %p789_p9 }
 0x1e1   : > { %p787_p8 = pneg %p786_p7 }
 0x1e2   : > { %p793_p13 = por %p792_p12, %p791_p11 }
 0x1e4   : > { %p794_p0 = pnand %p793_p13, %p787_p8 }
 0x1e6   : > { %797 = shalt.err (!%p794_p0)
}
 0x1e7   : > { %s839_s28 = smov 128   ;;  %s840_s29 = smov 8  }
 0x1e8   : > { %725 = dma.vmem_to_hbm [thread:$0]  (%p894_p5), %s924_s4, 256, %s929_s8, %s935_s13, %s839_s28, %s839_s28, %s840_s29  }
 0x1e9 PF: > { %p731_p1 = scmp.ge.s32.totalorder %s832_s12, 2  ;;  %s573_s30 = sand.u32 1, %s820_s9  }
 0x1ea   : > { %s574_s3 = scalar_lea.sflag [#allocation3], %s573_s30 }
 0x1eb   : > { %p728_p2 = pnand %p731_p1, %p898_p6 }
 0x1ed   : > { %815 = dma.done.wait (!%p728_p2), %s574_s3, 256  }
 0x1ee   : > { %817 = vsyncadd (!%p728_p2), %s574_s3, 4294967040  ;;  %p12_p3 = scmp.ge.s32.totalorder %s881_s15, 4   ;;  %s981_s9 = smov %s824_s10 }
 0x1ef   : > { %s982_s10 = smov %s828_s11  ;;  %s983_s11 = smov %s892_s18 }
 0x1f0   : > { %s984_s12 = smov %s881_s15  ;;  %14 = sbr.rel (!%p12_p3) target bundleno = 3 (0x3), region = 66 }
 0x1f7   :  { %579 = vsyncpa [#allocation3], 1 }
 0x1f8   :  { %581 = vsyncpa [#allocation3 + $0x1], 1 }

// kernel: mb_prob_neg_area_seeder_slfcams.2
= control target key start
LH: loop header
LB: loop body
LE: loop exit
PB: predicated region body
PF: predicated region fallthrough
CT: control target
= control target key end

     0   :  { %s4013_s24 = smov 0   ;;  %s7383_s0 = inlined_call_operand.vmem [shape: f32[2,1,256], index: 0, kind: input, shape index: {}]   ;;  %s7384_s1 = inlined_call_operand.vmem [shape: f32[2,256,1], index: 1, kind: input, shape index: {}]   ;;  %s7385_s2 = inlined_call_operand.vmem [shape: f32[2,1,256], index: 2, kind: input, shape index: {}]   ;;  %s7386_s3 = inlined_call_operand.vmem [shape: f32[2,256,1], index: 3, kind: input, shape index: {}]   ;;  %s7387_s4 = inlined_call_operand.vmem [shape: f32[2,1,256], index: 4, kind: input, shape index: {}]   ;;  %s7388_s5 = inlined_call_operand.vmem [shape: f32[2,256,1], index: 5, kind: input, shape index: {}]   ;;  %s7389_s6 = inlined_call_operand.vmem [shape: s32[2,1,256], index: 6, kind: output, shape index: {0}]   ;;  %s7390_s7 = inlined_call_operand.vmem [shape: s32[2,1,256], index: 7, kind: output, shape index: {1}]  }
   0x1 LB: > { %s3792_s25 = sadd.s32 4294967295, %s3969_s24   ;;  %p3796_p0 = scmp.ge.s32.totalorder %s3969_s24, 1  ;;  %s3969_s24 = sphi %s4013_s24, %s18_s24  }
   0x2   : > { %p287_p1 = scmp.lt.s32.totalorder %s3969_s24, 3 }
   0x4   : > { %p288_p2 = pnand %p3796_p0, %p287_p1 }
   0x6   : > { %291 = sbr.rel (%p288_p2) target bundleno = 902 (0x386), region = 44 }
   0xd   : > { %p344_p3 = scmp.lt.s32.totalorder %s3792_s25, 1  ;;  %v7392_v0 = vlaneseq  ;;  %v7401_v1 = vmov 0   ;;  %vm528_vm0 = vcmask 1040384  }
   0xe   : > { %3828 = vset.pattern.permute.xlu1 %v7401_v1  ;;  %3827 = vset.pattern.permute.xlu0 %v7401_v1 }
   0xf   : > { %s8121_s25 = smov (!%p344_p3, %s3792_s25), 1  ;;  %v4024_v2 = vshrl.u32 %v7392_v0, 7 }
  0x10   : > { %s4026_s26 = sshll.u32 %s8121_s25, 1  ;;  %s4028_s27 = sshll.u32 %s8121_s25, 8 }
  0x11   : > { %7497 = vst [vmem:[#allocation2_spill] sm:$0xff] %v4024_v2  ;;  %s347_s30 = scalar_lea.vmem %s7383_s0, %s4026_s26  ;;  %s4038_s10 = scalar_lea.vmem %s7384_s1, %s4028_s27  ;;  %v4041_v3 = vsub.s32 0, %v4024_v2  ;;  %v4044_v4 = vsub.s32 1, %v4024_v2 }
  0x12   : > { %v449_v5 = vld [vmem:[%s347_s30] sm:$0x3]  ;;  %v452_v6 = vld [vmem:[%s4038_s10 + $0x8] sm:$0xff]  ;;  %v453_v7 = vld [vmem:[%s4038_s10 + $0x10] sm:$0xff]  ;;  %s4077_s13 = scalar_lea.vmem %s7386_s3, %s4028_s27  ;;  %s356_s16 = scalar_lea.vmem %s7385_s2, %s4026_s26 }
  0x13   : > { %7498 = vst [vmem:[#allocation3_spill] sm:$0xff] %v4041_v3  ;;  %7499 = vst [vmem:[#allocation4_spill] sm:$0xff] %v4044_v4  ;;  %v4048_v8 = vadd.f32 1e-06, %v449_v5  ;;  %v4050_v9 = vadd.f32 1e-06, %v452_v6  ;;  %s374_s20 = scalar_lea.vmem %s7389_s6, %s4026_s26  ;;  %s5346_s25 = scalar_lea.vmem %s7388_s5, %s4028_s27 }
  0x14   : > { %v4052_v10 = vadd.f32 1e-06, %v453_v7  ;;  %v454_v11 = vld [vmem:[%s4038_s10 + $0x18] sm:$0xff]  ;;  %v455_v15 = vld [vmem:[%s4038_s10 + $0x20] sm:$0xff]  ;;  %v456_v20 = vld [vmem:[%s4038_s10 + $0x28] sm:$0xff]  ;;  %s365_s29 = scalar_lea.vmem %s7387_s4, %s4026_s26  ;;  %s378_s9 = scalar_lea.vmem %s7390_s7, %s4026_s26 }
  0x15   : > { %7500 = vst [vmem:[#allocation5_spill] sm:$0xff] %v4048_v8  ;;  %v519_v12 = vrot.slane %v4048_v8, %v4041_v3  ;;  %v523_v13 = vrot.slane %v4048_v8, %v4044_v4  ;;  %v4059_v14 = vadd.f32 1e-06, %v454_v11  ;;  %3829 = vlog2.f32 %v4050_v9  ;;  %v451_v21 = vld [vmem:[%s4038_s10] sm:$0xff]  ;;  %v464_v23 = vld [vmem:[%s4038_s10 + $0x68] sm:$0xff]  ;;  %v457_v24 = vld [vmem:[%s4038_s10 + $0x30] sm:$0xff] }
  0x16   : > { %3831 = vlog2.f32 %v4052_v10  ;;  %v4065_v19 = vadd.f32 1e-06, %v455_v15  ;;  %v4070_v22 = vadd.f32 1e-06, %v456_v20  ;;  %v4080_v25 = vadd.f32 1e-06, %v451_v21 }
  0x17   : > { %v529_v16 = vsel %vm528_vm0, %v519_v12, 0.0  ;;  %v530_v17 = vsel %vm528_vm0, %v523_v13, 0.0  ;;  %3833 = vlog2.f32 %v4059_v14  ;;  %v466_v26 = vld [vmem:[%s4038_s10 + $0x78] sm:$0xff]  ;;  %v4083_v27 = vadd.f32 1e-06, %v464_v23  ;;  %v626_v29 = vld [vmem:[%s4077_s13 + $0x8] sm:$0xff] }
  0x18   : > { %v531_v18 = vadd.f32 %v530_v17, %v529_v16  ;;  %3835 = vlog2.f32 %v4065_v19  ;;  %v4087_v30 = vadd.f32 1e-06, %v457_v24  ;;  %v468_v31 = vld [vmem:[%s4038_s10 + $0x88] sm:$0xff]  ;;  %v458_v34 = vld [vmem:[%s4038_s10 + $0x38] sm:$0xff]  ;;  %v4092_v35 = vadd.f32 1e-06, %v466_v26 }
  0x19   : > { %3837 = vlog2.f32 %v4070_v22  ;;  %v627_v38 = vld [vmem:[%s4077_s13 + $0x10] sm:$0xff]  ;;  %v4096_v40 = vadd.f32 1e-06, %v468_v31  ;;  %v4099_v41 = vadd.f32 1e-06, %v458_v34  ;;  %v470_v42 = vld [vmem:[%s4038_s10 + $0x98] sm:$0xff] }
  0x1a   : > { %532 = vadd.xlane.f32.xlu0 %v531_v18  ;;  %3839 = vlog2.f32 %v4080_v25  ;;  %v459_v45 = vld [vmem:[%s4038_s10 + $0x40] sm:$0xff]  ;;  %v628_v47 = vld [vmem:[%s4077_s13 + $0x18] sm:$0xff]  ;;  %v4106_v48 = vadd.f32 1e-06, %v470_v42  ;;  %v472_v50 = vld [vmem:[%s4038_s10 + $0xa8] sm:$0xff] }
  0x1b   : > { %3841 = vlog2.f32 %v4083_v27  ;;  %v4109_v49 = vadd.f32 1e-06, %v459_v45  ;;  %v460_v53 = vld [vmem:[%s4038_s10 + $0x48] sm:$0xff]  ;;  %v629_v55 = vld [vmem:[%s4077_s13 + $0x20] sm:$0xff]  ;;  %v4116_v58 = vadd.f32 1e-06, %v472_v50 }
  0x1c   : > { %3843 = vlog2.f32 %v4087_v30  ;;  %v625_v57 = vld [vmem:[%s4077_s13] sm:$0xff]  ;;  %v4119_v59 = vadd.f32 1e-06, %v460_v53  ;;  %v474_v61 = vld [vmem:[%s4038_s10 + $0xb8] sm:$0xff]  ;;  %v461_v6 = vld [vmem:[%s4038_s10 + $0x50] sm:$0xff] }
  0x1d   : > { %3845 = vlog2.f32 %v4092_v35  ;;  %v638_v7 = vld [vmem:[%s4077_s13 + $0x68] sm:$0xff]  ;;  %v4126_v17 = vadd.f32 1e-06, %v474_v61  ;;  %v4129_v18 = vadd.f32 1e-06, %v461_v6  ;;  %v640_v31 = vld [vmem:[%s4077_s13 + $0x78] sm:$0xff] }
  0x1e   : > { %3847 = vlog2.f32 %v4096_v40  ;;  %v630_v12 = vld [vmem:[%s4077_s13 + $0x28] sm:$0xff]  ;;  %v463_v45 = vld [vmem:[%s4038_s10 + $0x60] sm:$0xff]  ;;  %v632_v50 = vld [vmem:[%s4077_s13 + $0x38] sm:$0xff] }
  0x1f   : > { %v3830_v28 = vpop.eup %3829  ;;  %3849 = vlog2.f32 %v4099_v41  ;;  %v476_v23 = vld [vmem:[%s4038_s10 + $0xc8] sm:$0xff]  ;;  %v465_v61 = vld [vmem:[%s4038_s10 + $0x70] sm:$0xff] }
  0x20   : > { %v3832_v32 = vpop.eup %3831  ;;  %v564_v33 = vmul.f32 0.6931472, %v3830_v28  ;;  %3851 = vlog2.f32 %v4106_v48  ;;  %v4136_v34 = vadd.f32 1e-06, %v476_v23  ;;  %v646_v23 = vld [vmem:[%s4077_s13 + $0xa8] sm:$0xff] }
  0x21   : > { %v3834_v36 = vpop.eup %3833  ;;  %v566_v37 = vmul.f32 0.6931472, %v3832_v32  ;;  %3853 = vlog2.f32 %v4109_v49 }
  0x22   : > { %v658_v39 = vadd.f32 %v626_v29, %v564_v33  ;;  %v568_v44 = vmul.f32 0.6931472, %v3834_v36  ;;  %v3836_v46 = vpop.eup %3835  ;;  %3855 = vlog2.f32 %v4116_v58  ;;  %v462_v29 = vld [vmem:[%s4038_s10 + $0x58] sm:$0xff]  ;;  %v631_v33 = vld [vmem:[%s4077_s13 + $0x30] sm:$0xff]  ;;  %7501 = vst [vmem:[#allocation6_spill] sm:$0xff] %v4136_v34 }
  0x23   : > { %v659_v43 = vadd.f32 %v627_v38, %v566_v37  ;;  %v570_v52 = vmul.f32 0.6931472, %v3836_v46  ;;  %v3838_v54 = vpop.eup %3837  ;;  %3857 = vlog2.f32 %v4119_v59  ;;  %v4139_v36 = vadd.f32 1e-06, %v462_v29  ;;  %v642_v46 = vld [vmem:[%s4077_s13 + $0x88] sm:$0xff] }
  0x24   : > { %728 = vperm.xlu1 %3828, %v658_v39   ;;  %v660_v51 = vadd.f32 %v628_v47, %v568_v44  ;;  %v3840_v56 = vpop.eup %3839  ;;  %v572_v5 = vmul.f32 0.6931472, %v3838_v54  ;;  %3859 = vlog2.f32 %v4126_v17  ;;  %v478_v39 = vld [vmem:[%s4038_s10 + $0xd8] sm:$0xff] }
  0x25   : > { %v562_v60 = vmul.f32 0.6931472, %v3840_v56  ;;  %v3842_v62 = vpop.eup %3841  ;;  %v661_v63 = vadd.f32 %v629_v55, %v570_v52  ;;  %3861 = vlog2.f32 %v4129_v18  ;;  %v4149_v52 = vadd.f32 1e-06, %v463_v45  ;;  %v480_v55 = vld [vmem:[%s4038_s10 + $0xe8] sm:$0xff] }
  0x26   : > { %v3844_v11 = vpop.eup %3843  ;;  %v588_v15 = vmul.f32 0.6931472, %v3842_v62  ;;  %v662_v26 = vadd.f32 %v630_v12, %v572_v5  ;;  %3863 = vlog2.f32 %v4136_v34  ;;  %v644_v62 = vld [vmem:[%s4077_s13 + $0x98] sm:$0xff]  ;;  %v633_v5 = vld [vmem:[%s4077_s13 + $0x40] sm:$0xff]  ;;  %v4156_v6 = vadd.f32 1e-06, %v480_v55 }
  0x27   : > { %v657_v13 = vadd.f32 %v625_v57, %v562_v60  ;;  %v3846_v16 = vpop.eup %3845  ;;  %v574_v28 = vmul.f32 0.6931472, %v3844_v11  ;;  %3865 = vlog2.f32 %v4139_v36  ;;  %v471_v55 = vld [vmem:[%s4038_s10 + $0xa0] sm:$0xff] }
  0x28   : > { %733 = vperm.xlu1 %3828, %v659_v43   ;;  %v670_v20 = vadd.f32 %v638_v7, %v588_v15  ;;  %v592_v21 = vmul.f32 0.6931472, %v3846_v16  ;;  %v3848_v24 = vpop.eup %3847  ;;  %7503 = vst [vmem:[#allocation8_spill] sm:$0xff] %v4156_v6  ;;  %v4159_v7 = vadd.f32 1e-06, %v465_v61 }
  0x29   : > { %v3850_v32 = vpop.eup %3849  ;;  %v596_v38 = vmul.f32 0.6931472, %v3848_v24  ;;  %v663_v43 = vadd.f32 %v631_v33, %v574_v28  ;;  %v4182_v61 = vadd.f32 1e-06, %v471_v55  ;;  %v641_v55 = vld [vmem:[%s4077_s13 + $0x80] sm:$0xff] }
  0x2a   : > { %v672_v37 = vadd.f32 %v640_v31, %v592_v21  ;;  %v3852_v42 = vpop.eup %3851  ;;  %v576_v44 = vmul.f32 0.6931472, %v3850_v32  ;;  %v467_v21 = vld [vmem:[%s4038_s10 + $0x80] sm:$0xff] }
  0x2b   : > { %v3854_v47 = vpop.eup %3853  ;;  %v674_v53 = vadd.f32 %v642_v46, %v596_v38  ;;  %v600_v54 = vmul.f32 0.6931472, %v3852_v42  ;;  %v4169_v29 = vadd.f32 1e-06, %v467_v21  ;;  %v648_v42 = vld [vmem:[%s4077_s13 + $0xb8] sm:$0xff] }
  0x2c   : > { %738 = vperm.xlu1 %3828, %v660_v51   ;;  %v4146_v51 = vadd.f32 1e-06, %v478_v39  ;;  %v3856_v56 = vpop.eup %3855  ;;  %v664_v57 = vadd.f32 %v632_v50, %v576_v44  ;;  %v578_v60 = vmul.f32 0.6931472, %v3854_v47  ;;  %v469_v39 = vld [vmem:[%s4038_s10 + $0x90] sm:$0xff] }
  0x2d   : > { %v676_v11 = vadd.f32 %v644_v62, %v600_v54  ;;  %v604_v12 = vmul.f32 0.6931472, %v3856_v56  ;;  %v635_v44 = vld [vmem:[%s4077_s13 + $0x50] sm:$0xff]  ;;  %v4176_v45 = vadd.f32 1e-06, %v469_v39  ;;  %v650_v56 = vld [vmem:[%s4077_s13 + $0xc8] sm:$0xff] }
  0x2e   : > { %7502 = vst [vmem:[#allocation7_spill] sm:$0xff] %v4146_v51  ;;  %3867 = vlog2.f32 %v4146_v51  ;;  %v665_v16 = vadd.f32 %v633_v5, %v578_v60  ;;  %v636_v60 = vld [vmem:[%s4077_s13 + $0x58] sm:$0xff]  ;;  %v639_v39 = vld [vmem:[%s4077_s13 + $0x70] sm:$0xff] }
  0x2f   : > { %3869 = vlog2.f32 %v4149_v52  ;;  %v678_v31 = vadd.f32 %v646_v23, %v604_v12 }
  0x30   : > { %723 = vperm.xlu0 %3827, %v657_v13   ;;  %743 = vperm.xlu1 %3828, %v661_v63   ;;  %v3858_v63 = vpop.eup %3857  ;;  %v482_v13 = vld [vmem:[%s4038_s10 + $0xf8] sm:$0xff]  ;;  %3871 = vlog2.f32 %v4156_v6 }
  0x31   : > { %v3860_v15 = vpop.eup %3859  ;;  %v4166_v28 = vadd.f32 1e-06, %v482_v13  ;;  %3873 = vlog2.f32 %v4159_v7  ;;  %v473_v13 = vld [vmem:[%s4038_s10 + $0xb0] sm:$0xff] }
  0x32   : > { %v3862_v24 = vpop.eup %3861  ;;  %v608_v32 = vmul.f32 0.6931472, %v3860_v15  ;;  %v652_v15 = vld [vmem:[%s4077_s13 + $0xd8] sm:$0xff]  ;;  %v4188_v21 = vadd.f32 1e-06, %v473_v13 }
  0x33   : > { %7504 = vst [vmem:[#allocation9_spill] sm:$0xff] %v4166_v28  ;;  %v3864_v33 = vpop.eup %3863  ;;  %v582_v38 = vmul.f32 0.6931472, %v3862_v24  ;;  %3875 = vlog2.f32 %v4166_v28 }
  0x34   : > { %788 = vperm.xlu0 %3827, %v670_v20   ;;  %748 = vperm.xlu1 %3828, %v662_v26   ;;  %v580_v20 = vmul.f32 0.6931472, %v3858_v63  ;;  %v634_v26 = vld [vmem:[%s4077_s13 + $0x48] sm:$0xff]  ;;  %3877 = vlog2.f32 %v4169_v29  ;;  %v680_v46 = vadd.f32 %v648_v42, %v608_v32  ;;  %v612_v47 = vmul.f32 0.6931472, %v3864_v33  ;;  %7505 = vst [vmem:[#allocation10_spill] sm:$0xff] %v4188_v21 }
  0x35   : > { %3879 = vlog2.f32 %v4176_v45  ;;  %v475_v33 = vld [vmem:[%s4038_s10 + $0xc0] sm:$0xff] }
  0x36   : > { %v682_v62 = vadd.f32 %v650_v56, %v612_v47  ;;  %3881 = vlog2.f32 %v4182_v61  ;;  %v4194_v42 = vadd.f32 1e-06, %v475_v33  ;;  %v647_v33 = vld [vmem:[%s4077_s13 + $0xb0] sm:$0xff] }
  0x37   : > { %3883 = vlog2.f32 %v4188_v21  ;;  %v4709_v21 = vadd.s32 136, %v4024_v2 }
  0x38   : > { %798 = vperm.xlu0 %3827, %v672_v37   ;;  %753 = vperm.xlu1 %3828, %v663_v43   ;;  %v666_v37 = vadd.f32 %v634_v26, %v580_v20  ;;  %v3866_v43 = vpop.eup %3865  ;;  %v637_v20 = vld [vmem:[%s4077_s13 + $0x60] sm:$0xff]  ;;  %7506 = vst [vmem:[#allocation11_spill] sm:$0xff] %v4194_v42  ;;  %3885 = vlog2.f32 %v4194_v42  ;;  %v4668_v42 = vadd.s32 72, %v4024_v2 }
  0x39   : > { %v3868_v50 = vpop.eup %3867  ;;  %v584_v54 = vmul.f32 0.6931472, %v3866_v43  ;;  %7600 = vst [vmem:[#allocation33_spill] sm:$0xff] %v4709_v21 }
  0x3a   : > { %v616_v63 = vmul.f32 0.6931472, %v3868_v50  ;;  %v477_v50 = vld [vmem:[%s4038_s10 + $0xd0] sm:$0xff]  ;;  %7593 = vst [vmem:[#allocation31_spill] sm:$0xff] %v4668_v42 }
  0x3b   : > { %v4200_v56 = vadd.f32 1e-06, %v477_v50  ;;  %v651_v50 = vld [vmem:[%s4077_s13 + $0xd0] sm:$0xff] }
  0x3c   : > { %808 = vperm.xlu0 %3827, %v674_v53   ;;  %758 = vperm.xlu1 %3828, %v664_v57   ;;  %v667_v53 = vadd.f32 %v635_v44, %v582_v38  ;;  %v3870_v57 = vpop.eup %3869  ;;  %v684_v23 = vadd.f32 %v652_v15, %v616_v63  ;;  %v479_v63 = vld [vmem:[%s4038_s10 + $0xe0] sm:$0xff] }
  0x3d   : > { %v3872_v5 = vpop.eup %3871  ;;  %v586_v12 = vmul.f32 0.6931472, %v3870_v57  ;;  %7507 = vst [vmem:[#allocation12_spill] sm:$0xff] %v4200_v56  ;;  %3887 = vlog2.f32 %v4200_v56  ;;  %v7555_v56 = vmov 0  }
  0x3e   : > { %v620_v24 = vmul.f32 0.6931472, %v3872_v5 }
  0x40   : > { %818 = vperm.xlu0 %3827, %v676_v11   ;;  %763 = vperm.xlu1 %3828, %v665_v16   ;;  %v668_v11 = vadd.f32 %v636_v60, %v584_v54  ;;  %v3874_v16 = vpop.eup %3873 }
  0x41   : > { %v3876_v26 = vpop.eup %3875  ;;  %v590_v32 = vmul.f32 0.6931472, %v3874_v16  ;;  %v481_v16 = vld [vmem:[%s4038_s10 + $0xf0] sm:$0xff] }
  0x42   : > { %v3878_v38 = vpop.eup %3877  ;;  %v624_v44 = vmul.f32 0.6931472, %v3876_v26 }
  0x43   : > { %v594_v47 = vmul.f32 0.6931472, %v3878_v38  ;;  %v3880_v54 = vpop.eup %3879 }
  0x44   : > { %828 = vperm.xlu0 %3827, %v678_v31   ;;  %768 = vperm.xlu1 %3828, %v666_v37   ;;  %v669_v31 = vadd.f32 %v637_v20, %v586_v12  ;;  %v654_v37 = vld [vmem:[%s4077_s13 + $0xe8] sm:$0xff]  ;;  %v3882_v5 = vpop.eup %3881  ;;  %v4205_v12 = vadd.f32 1e-06, %v479_v63  ;;  %v655_v63 = vld [vmem:[%s4077_s13 + $0xf0] sm:$0xff] }
  0x45   : > { %v686_v43 = vadd.f32 %v654_v37, %v620_v24  ;;  %v673_v60 = vadd.f32 %v641_v55, %v594_v47  ;;  %v602_v15 = vmul.f32 0.6931472, %v3882_v5  ;;  %v3884_v20 = vpop.eup %3883  ;;  %v4210_v24 = vadd.f32 1e-06, %v481_v16  ;;  %v546_v16 = vld [vmem:[%s356_s16] sm:$0x3] }
  0x46   : > { %7508 = vst [vmem:[#allocation13_spill] sm:$0xff] %v4205_v12  ;;  %3889 = vlog2.f32 %v4205_v12  ;;  %v4450_v12 = vadd.s32 80, %v4024_v2 }
  0x47   : > { %7509 = vst [vmem:[#allocation14_spill] sm:$0xff] %v4210_v24  ;;  %3891 = vlog2.f32 %v4210_v24 }
  0x48   : > { %838 = vperm.xlu0 %3827, %v680_v46   ;;  %773 = vperm.xlu1 %3828, %v667_v53   ;;  %v671_v46 = vadd.f32 %v639_v39, %v590_v32  ;;  %v656_v53 = vld [vmem:[%s4077_s13 + $0xf8] sm:$0xff]  ;;  %v3886_v32 = vpop.eup %3885  ;;  %3893 = vlog2.f32 %v4048_v8  ;;  %7554 = vst [vmem:[#allocation23_spill] sm:$0xff] %v4450_v12 }
  0x49   : > { %v688_v57 = vadd.f32 %v656_v53, %v624_v44  ;;  %v610_v38 = vmul.f32 0.6931472, %v3886_v32  ;;  %v3888_v39 = vpop.eup %3887 }
  0x4c   : > { %848 = vperm.xlu0 %3827, %v682_v62   ;;  %778 = vperm.xlu1 %3828, %v668_v11   ;;  %v598_v62 = vmul.f32 0.6931472, %v3880_v54  ;;  %v643_v11 = vld [vmem:[%s4077_s13 + $0x90] sm:$0xff] }
  0x4e   : > { %v675_v13 = vadd.f32 %v643_v11, %v598_v62 }
  0x50   : > { %858 = vperm.xlu0 %3827, %v684_v23   ;;  %783 = vperm.xlu1 %3828, %v669_v31   ;;  %v645_v23 = vld [vmem:[%s4077_s13 + $0xa0] sm:$0xff]  ;;  %v606_v31 = vmul.f32 0.6931472, %v3884_v20  ;;  %v3890_v47 = vpop.eup %3889 }
  0x51   : > { %v677_v26 = vadd.f32 %v645_v23, %v602_v15  ;;  %v618_v54 = vmul.f32 0.6931472, %v3890_v47  ;;  %v3892_v55 = vpop.eup %3891 }
  0x52   : > { %v679_v37 = vadd.f32 %v647_v33, %v606_v31  ;;  %v622_v62 = vmul.f32 0.6931472, %v3892_v55  ;;  %v3894_v11 = vpop.eup %3893 }
  0x54   : > { %868 = vperm.xlu0 %3827, %v686_v43   ;;  %793 = vperm.xlu1 %3828, %v671_v46   ;;  %v649_v43 = vld [vmem:[%s4077_s13 + $0xc0] sm:$0xff]  ;;  %v614_v46 = vmul.f32 0.6931472, %v3888_v39  ;;  %v687_v5 = vadd.f32 %v655_v63, %v622_v62  ;;  %v7511_v62 = vmov 0  ;;  %v4267_v63 = vand.u32 127, %v7392_v0 }
  0x55   : > { %v681_v44 = vadd.f32 %v649_v43, %v610_v38 }
  0x56   : > { %v683_v53 = vadd.f32 %v651_v50, %v614_v46  ;;  %7513 = vst [vmem:[#allocation16_spill] sm:$0xff] %v4267_v63 }
  0x58   : > { %878 = vperm.xlu0 %3827, %v688_v57   ;;  %803 = vperm.xlu1 %3828, %v673_v60   ;;  %v653_v57 = vld [vmem:[%s4077_s13 + $0xe0] sm:$0xff] }
  0x59   : > { %v685_v60 = vadd.f32 %v653_v57, %v618_v54  ;;  %v4249_v57 = vadd.s32 104, %v4024_v2 }
  0x5b   : > { %7510 = vst [vmem:[#allocation15_spill] sm:$0xff] %v4249_v57  ;;  %vm7391_vm14 = vcmp.lt.s32.totalorder %v4249_v57, %v4267_v63 }
  0x5c   : > { %813 = vperm.xlu1 %3828, %v675_v13   ;;  %v545_v13 = vmul.f32 0.6931472, %v3894_v11  ;;  %v4605_v11 = vadd.s32 40, %v4024_v2 }
  0x5e   : > { %v547_v23 = vadd.f32 %v546_v16, %v545_v13  ;;  %v7517_v16 = vmov 0  ;;  %7584 = vst [vmem:[#allocation29_spill] sm:$0xff] %v4605_v11 }
  0x60   : > { %823 = vperm.xlu1 %3828, %v677_v26  }
  0x64   : > { %833 = vperm.xlu1 %3828, %v679_v37   ;;  %v556_v37 = vrot.slane %v547_v23, %v4044_v4 }
  0x66   : > { %v4233_v46 = vrot.slane %v556_v37, %v4041_v3  ;;  %v4492_v37 = vadd.s32 112, %v4024_v2 }
  0x68   : > { %843 = vperm.xlu1 %3828, %v681_v44   ;;  %7565 = vst [vmem:[#allocation25_spill] sm:$0xff] %v4492_v37 }
  0x6c   : > { %853 = vperm.xlu1 %3828, %v683_v53   ;;  %v552_v53 = vrot.slane %v547_v23, %v4041_v3 }
  0x70   : > { %863 = vperm.xlu1 %3828, %v685_v60   ;;  %v4252_v60 = vrot.slane %v552_v53, %v4041_v3 }
  0x74   : > { %873 = vperm.xlu1 %3828, %v687_v5   ;;  %v4270_v5 = vadd.s32 120, %v4024_v2 }
  0x76   : > { %7514 = vst [vmem:[#allocation17_spill] sm:$0xff] %v4270_v5 }
  0xa3   : > { %v4223_v15 = vpop.permute.xlu1 %728 }
  0xa4   : > { %vm892_vm1 = vcmp.gt.f32.partialorder %v4223_v15, %v4233_v46  ;;  %vm956_vm2 = vcmp.eq.f32.partialorder %v4223_v15, %v4233_v46 }
  0xa5   : > { %vm4258_vm7 = vmor %vm892_vm1, %vm956_vm2 }
  0xa6   : > { %v7512_v62 = vsel %vm4258_vm7, 4294967295, %v7511_v62  ;;  %vm7526_vm7 = vcmp.lt.s32.totalorder %v4270_v5, %v4267_v63 }
  0xa7   : > { %v533_v20 = vpop.xlane.xlu0 %532  ;;  %v4225_v31 = vpop.permute.xlu1 %733 }
  0xa8   : > { %v534_v26 = vrot.slane %v533_v20, 4  ;;  %vm894_vm3 = vcmp.gt.f32.partialorder %v4225_v31, %v4233_v46  ;;  %vm958_vm4 = vcmp.eq.f32.partialorder %v4225_v31, %v4233_v46 }
  0xa9   : > { %vm4272_vm10 = vmor %vm894_vm3, %vm958_vm4 }
  0xaa   : > { %v535_v32 = vadd.f32 %v534_v26, %v533_v20  ;;  %v7519_v20 = vmov 0  ;;  %v1342_v0 = vsel %vm4272_vm10, 1, %v7401_v1 }
  0xab   : > { %v4228_v38 = vpop.permute.xlu1 %738 }
  0xac   : > { %v536_v33 = vrot.slane %v535_v32, 2  ;;  %vm896_vm5 = vcmp.gt.f32.partialorder %v4228_v38, %v4233_v46  ;;  %vm960_vm6 = vcmp.eq.f32.partialorder %v4228_v38, %v4233_v46 }
  0xad   : > { %vm4282_vm13 = vmor %vm896_vm5, %vm960_vm6 }
  0xae   : > { %v537_v39 = vadd.f32 %v536_v33, %v535_v32  ;;  %v7518_v16 = vsel %vm4282_vm13, 4294967295, %v7517_v16  ;;  %v4316_v33 = vadd.s32 16, %v4024_v2 }
  0xaf   : > { %v4230_v43 = vpop.permute.xlu0 %723  ;;  %v4235_v47 = vpop.permute.xlu1 %743 }
  0xb0   : > { %v538_v44 = vrot.slane %v537_v39, 1  ;;  %vm898_vm8 = vcmp.gt.f32.partialorder %v4235_v47, %v4233_v46  ;;  %vm962_vm9 = vcmp.eq.f32.partialorder %v4235_v47, %v4233_v46  ;;  %vm890_vm11 = vcmp.gt.f32.partialorder %v4230_v43, %v4233_v46  ;;  %7523 = vst [vmem:[#allocation18_spill] sm:$0xff] %v4316_v33 }
  0xb1   : > { %vm954_vm12 = vcmp.eq.f32.partialorder %v4230_v43, %v4233_v46  ;;  %vm4289_vm0 = vmor %vm898_vm8, %vm962_vm9 }
  0xb2   : > { %v539_v50 = vadd.f32 %v538_v44, %v537_v39  ;;  %v7520_v20 = vsel %vm4289_vm0, 4294967295, %v7519_v20  ;;  %vm4299_vm3 = vmor %vm890_vm11, %vm954_vm12  ;;  %v4336_v44 = vadd.s32 32, %v4024_v2  ;;  %v4807_v39 = vadd.s32 160, %v4024_v2 }
  0xb3   : > { %v4242_v54 = vpop.permute.xlu1 %748  ;;  %v789_v55 = vpop.permute.xlu0 %788  ;;  %v1338_v4 = vsel %vm4299_vm3, 1, %v7401_v1 }
  0xb4   : > { %3813 = vpush %v539_v50  ;;  %vm979_vm15 = vcmp.eq.f32.partialorder %v789_v55, %v4252_v60  ;;  %vm900_vm1 = vcmp.gt.f32.partialorder %v4242_v54, %v4233_v46  ;;  %vm964_vm2 = vcmp.eq.f32.partialorder %v4242_v54, %v4233_v46  ;;  %vm915_vm6 = vcmp.gt.f32.partialorder %v789_v55, %v4252_v60 }
  0xb5   : > { %vm916_vm8 = vcmp.gt.f32.partialorder %v789_v55, %v4233_v46  ;;  %vm980_vm9 = vcmp.eq.f32.partialorder %v789_v55, %v4233_v46  ;;  %vm1107_vm11 = vmand %vm979_vm15, %vm7391_vm14  ;;  %7529 = vst [vmem:[#allocation19_spill] sm:$0xff] %v4336_v44  ;;  %v4349_v55 = vadd.s32 48, %v4024_v2  ;;  %v1438_v28 = vadd.s32 %v1342_v0, %v1338_v4 }
  0xb6   : > { %vm4318_vm12 = vmor %vm900_vm1, %vm964_vm2  ;;  %vm953_vm1 = vcmp.eq.f32.partialorder %v4230_v43, %v4252_v60  ;;  %7619 = vst [vmem:[#allocation36_spill] sm:$0xff] %v4807_v39 }
  0xb7   : > { %v4276_v13 = vpop.permute.xlu1 %753  ;;  %v4297_v23 = vpop.permute.xlu0 %798  ;;  %vm4340_vm2 = vmor %vm915_vm6, %vm1107_vm11  ;;  %7534 = vst [vmem:[#allocation20_spill] sm:$0xff] %v4349_v55  ;;  %vm7414_vm11 = vcmp.lt.s32.totalorder %v4336_v44, %v4267_v63 }
  0xb8   : > { %vm983_vm5 = vcmp.eq.f32.partialorder %v4297_v23, %v4252_v60  ;;  %vm902_vm4 = vcmp.gt.f32.partialorder %v4276_v13, %v4233_v46  ;;  %vm966_vm0 = vcmp.eq.f32.partialorder %v4276_v13, %v4233_v46  ;;  %vm919_vm13 = vcmp.gt.f32.partialorder %v4297_v23, %v4252_v60  ;;  %vm4344_vm14 = vmor %vm916_vm8, %vm980_vm9 }
  0xb9   : > { %vm4331_vm15 = vmand %vm983_vm5, %vm7526_vm7  ;;  %vm7403_vm7 = vcmp.lt.s32.totalorder %v4024_v2, %v4267_v63  ;;  %vm957_vm5 = vcmp.eq.f32.partialorder %v4225_v31, %v4252_v60  ;;  %vm7408_vm8 = vcmp.lt.s32.totalorder %v4316_v33, %v4267_v63  ;;  %vm7540_vm9 = vnez %v7518_v16 }
  0xba   : > { %vm4358_vm6 = vmor %vm902_vm4, %vm966_vm0  ;;  %vm7539_vm4 = vnez %v7512_v62  ;;  %v1344_v3 = vsel %vm7540_vm9, 1, %v7401_v1  ;;  %v4409_v62 = vadd.s32 96, %v4024_v2  ;;  %v4412_v16 = vadd.s32 64, %v4024_v2 }
  0xbb   : > { %v4307_v32 = vpop.permute.xlu1 %758  ;;  %vm4382_vm3 = vmor %vm919_vm13, %vm4331_vm15  ;;  %v1340_v26 = vsel %vm7539_vm4, 1, %v7401_v1  ;;  %v4547_v1 = vsel %vm4340_vm2, 1, %v7555_v56  ;;  %v4577_v0 = vpop.permute.xlu0 %808 }
  0xbc   : > { %vm4402_vm13 = vmand %vm953_vm1, %vm7403_vm7  ;;  %7543 = vst [vmem:[#allocation21_spill] sm:$0xff] %v4409_v62  ;;  %vm7547_vm7 = vcmp.eq.f32.partialorder %v4307_v32, %v4233_v46  ;;  %vm7548_vm15 = vcmp.gt.f32.partialorder %v4307_v32, %v4233_v46  ;;  %v1439_v6 = vadd.s32 %v1344_v3, %v1340_v26  ;;  %v1348_v3 = vsel %vm4318_vm12, 1, %v7555_v56 }
  0xbd   : > { %7544 = vst [vmem:[#allocation22_spill] sm:$0xff] %v4412_v16  ;;  %vm4422_vm1 = vmand %vm957_vm5, %vm7408_vm8  ;;  %v4502_v26 = vadd.s32 24, %v4024_v2  ;;  %vm7569_vm12 = vcmp.gt.f32.partialorder %v4297_v23, %v4233_v46 }
  0xbe   : > { %vm4434_vm9 = vmor %vm7548_vm15, %vm7547_vm7  ;;  %vm7556_vm7 = vnez %v7520_v20  ;;  %vm7557_vm15 = vcmp.eq.f32.partialorder %v4235_v47, %v4252_v60  ;;  %v4485_v20 = vadd.s32 8, %v4024_v2 }
  0xbf   : > { %v4362_v57 = vpop.permute.xlu1 %763  ;;  %v1346_v51 = vsel %vm7556_vm7, 1, %v7555_v56  ;;  %vm4465_vm4 = vmand %vm7557_vm15, %vm7414_vm11  ;;  %vm7560_vm7 = vcmp.lt.s32.totalorder %v4349_v55, %v4267_v63  ;;  %7567 = vst [vmem:[#allocation26_spill] sm:$0xff] %v4502_v26  ;;  %vm7568_vm11 = vcmp.eq.f32.partialorder %v4297_v23, %v4233_v46  ;;  %v1350_v23 = vsel %vm4358_vm6, 1, %v7555_v56 }
  0xc0   : > { %vm970_vm0 = vcmp.eq.f32.partialorder %v4362_v57, %v4233_v46  ;;  %vm7551_vm10 = vcmp.gt.f32.partialorder %v4362_v57, %v4233_v46  ;;  %7564 = vst [vmem:[#allocation24_spill] sm:$0xff] %v4485_v20  ;;  %v1440_v44 = vadd.s32 %v1438_v28, %v1346_v51  ;;  %vm4512_vm8 = vmor %vm7569_vm12, %vm7568_vm11  ;;  %v1441_v28 = vadd.s32 %v1439_v6, %v1348_v3 }
  0xc1   : > { %vm4441_vm5 = vmor %vm7551_vm10, %vm970_vm0  ;;  %vm7561_vm10 = vcmp.eq.f32.partialorder %v4276_v13, %v4252_v60  ;;  %vm901_vm12 = vcmp.gt.f32.partialorder %v4276_v13, %v4252_v60  ;;  %v4552_v6 = vsel %vm4344_vm14, 1, %v7555_v56  ;;  %vm7575_vm6 = vcmp.lt.s32.totalorder %v4412_v16, %v4267_v63 }
  0xc2   : > { %vm4480_vm0 = vmand %vm7561_vm10, %vm7560_vm7  ;;  %vm7566_vm10 = vcmp.gt.f32.partialorder %v4230_v43, %v4252_v60  ;;  %v4517_v43 = vadd.s32 128, %v4267_v63  ;;  %vm7579_vm14 = vcmp.lt.s32.totalorder %v4450_v12, %v4267_v63  ;;  %v1442_v16 = vadd.s32 %v1440_v44, %v1350_v23 }
  0xc3   : > { %v4445_v24 = vpop.permute.xlu1 %768  ;;  %vm1145_vm7 = vmor %vm7566_vm10, %vm4402_vm13  ;;  %vm7573_vm10 = vcmp.gt.f32.partialorder %v4225_v31, %v4252_v60  ;;  %v4587_v12 = vsel %vm4382_vm3, 1, %v7555_v56  ;;  %v4597_v44 = vadd.s32 128, %v4024_v2  ;;  %v1354_v23 = vsel %vm4441_vm5, 1, %v7555_v56 }
  0xc4   : > { %7572 = vst [vmem:[#allocation27_spill] sm:$0xff] %v4517_v43  ;;  %vm1149_vm15 = vmor %vm7573_vm10, %vm4422_vm1  ;;  %v1337_v51 = vsel %vm1145_vm7, 1, %v7555_v56  ;;  %vm7574_vm1 = vcmp.gt.f32.partialorder %v4235_v47, %v4252_v60  ;;  %vm908_vm2 = vcmp.gt.f32.partialorder %v4445_v24, %v4233_v46  ;;  %vm972_vm7 = vcmp.eq.f32.partialorder %v4445_v24, %v4233_v46 }
  0xc5   : > { %vm1153_vm10 = vmor %vm7574_vm1, %vm4465_vm4  ;;  %vm7576_vm4 = vcmp.eq.f32.partialorder %v4362_v57, %v4252_v60  ;;  %v1341_v47 = vsel %vm1149_vm15, 1, %v7555_v56  ;;  %7582 = vst [vmem:[#allocation28_spill] sm:$0xff] %v4597_v44  ;;  %vm7431_vm5 = vcmp.lt.s32.totalorder %v4502_v26, %v4267_v63 }
  0xc6   : > { %vm4560_vm1 = vmand %vm7576_vm4, %vm7575_vm6  ;;  %v1345_v50 = vsel %vm1153_vm10, 1, %v7555_v56  ;;  %v1401_v53 = vadd.s32 %v1341_v47, %v1337_v51  ;;  %v1352_v51 = vsel %vm4434_vm9, 1, %v7555_v56  ;;  %v4636_v47 = vadd.s32 56, %v4024_v2 }
  0xc7   : > { %v774_v55 = vpop.permute.xlu1 %773  ;;  %vm7430_vm9 = vcmp.lt.s32.totalorder %v4485_v20, %v4267_v63 }
  0xc8   : > { %vm973_vm13 = vcmp.eq.f32.partialorder %v774_v55, %v4252_v60  ;;  %vm909_vm15 = vcmp.gt.f32.partialorder %v774_v55, %v4252_v60  ;;  %vm910_vm10 = vcmp.gt.f32.partialorder %v774_v55, %v4233_v46  ;;  %vm974_vm4 = vcmp.eq.f32.partialorder %v774_v55, %v4233_v46  ;;  %7587 = vst [vmem:[#allocation30_spill] sm:$0xff] %v4636_v47  ;;  %v4662_v55 = vpop.permute.xlu0 %818 }
  0xc9   : > { %vm4572_vm11 = vmand %vm973_vm13, %vm7579_vm14  ;;  %vm7583_vm14 = vcmp.gt.f32.partialorder %v4362_v57, %v4252_v60  ;;  %v1403_v4 = vadd.s32 %v1401_v53, %v1345_v50  ;;  %v4770_v53 = vadd.s32 144, %v4024_v2 }
  0xca   : > { %vm1157_vm13 = vmor %vm901_vm12, %vm4480_vm0 }
  0xcb   : > { %v4580_v3 = vpop.permute.xlu1 %778  ;;  %vm1161_vm3 = vmor %vm7583_vm14, %vm4560_vm1  ;;  %v1349_v57 = vsel %vm1157_vm13, 1, %v7555_v56  ;;  %vm7592_vm14 = vcmp.lt.s32.totalorder %v4409_v62, %v4267_v63  ;;  %7610 = vst [vmem:[#allocation34_spill] sm:$0xff] %v4770_v53 }
  0xcc   : > { %vm4615_vm0 = vmor %vm908_vm2, %vm972_vm7  ;;  %vm912_vm12 = vcmp.gt.f32.partialorder %v4580_v3, %v4233_v46  ;;  %vm976_vm1 = vcmp.eq.f32.partialorder %v4580_v3, %v4233_v46  ;;  %v1353_v31 = vsel %vm1161_vm3, 1, %v7555_v56  ;;  %v1405_v5 = vadd.s32 %v1403_v4, %v1349_v57 }
  0xcd   : > { %vm1165_vm7 = vmor %vm909_vm15, %vm4572_vm11  ;;  %v1443_v57 = vadd.s32 %v1441_v28, %v1352_v51  ;;  %v1356_v34 = vsel %vm4615_vm0, 1, %v7555_v56  ;;  %v4680_v28 = vsel %vm4512_vm8, 1, %v7555_v56  ;;  %v4685_v51 = vadd.s32 88, %v4024_v2 }
  0xce   : > { %vm4642_vm2 = vmor %vm910_vm10, %vm974_vm4  ;;  %v1357_v50 = vsel %vm1165_vm7, 1, %v7555_v56  ;;  %v1407_v4 = vadd.s32 %v1405_v5, %v1353_v31  ;;  %v1444_v5 = vadd.s32 %v1442_v16, %v1354_v23  ;;  %v4904_v16 = vadd.s32 184, %v4024_v2 }
  0xcf   : > { %v784_v33 = vpop.permute.xlu1 %783  ;;  %vm4654_vm11 = vmor %vm912_vm12, %vm976_vm1  ;;  %vm7432_vm12 = vcmp.lt.s32.totalorder %v4605_v11, %v4267_v63  ;;  %7594 = vst [vmem:[#allocation32_spill] sm:$0xff] %v4685_v51  ;;  %v1445_v23 = vadd.s32 %v1443_v57, %v1356_v34  ;;  %v4758_v57 = vpop.permute.xlu0 %828 }
  0xd0   : > { %vm913_vm15 = vcmp.gt.f32.partialorder %v784_v33, %v4252_v60  ;;  %vm914_vm13 = vcmp.gt.f32.partialorder %v784_v33, %v4233_v46  ;;  %vm977_vm10 = vcmp.eq.f32.partialorder %v784_v33, %v4252_v60  ;;  %vm978_vm4 = vcmp.eq.f32.partialorder %v784_v33, %v4233_v46  ;;  %7633 = vst [vmem:[#allocation39_spill] sm:$0xff] %v4904_v16 }
  0xd1   : > { %vm1105_vm3 = vmand %vm977_vm10, %vm7592_vm14  ;;  %vm7595_vm14 = vcmp.eq.f32.partialorder %v4223_v15, %v4252_v60  ;;  %v1409_v20 = vadd.s32 %v1407_v4, %v1357_v50  ;;  %v1358_v50 = vsel %vm4642_vm2, 1, %v7555_v56  ;;  %vm7607_vm10 = vcmp.lt.s32.totalorder %v4492_v37, %v4267_v63 }
  0xd2   : > { %vm1169_vm7 = vmor %vm913_vm15, %vm1105_vm3  ;;  %vm7601_vm15 = vcmp.eq.f32.partialorder %v4228_v38, %v4252_v60  ;;  %v1360_v34 = vsel %vm4654_vm11, 1, %v7555_v56 }
  0xd3   : > { %vm4693_vm1 = vmand %vm7595_vm14, %vm7430_vm9  ;;  %v1361_v31 = vsel %vm1169_vm7, 1, %v7555_v56  ;;  %v794_v62 = vpop.permute.xlu1 %793  ;;  %vm7616_vm9 = vcmp.lt.s32.totalorder %v4597_v44, %v4517_v43 }
  0xd4   : > { %vm4703_vm0 = vmor %vm914_vm13, %vm978_vm4  ;;  %vm917_vm4 = vcmp.gt.f32.partialorder %v794_v62, %v4252_v60  ;;  %vm918_vm7 = vcmp.gt.f32.partialorder %v794_v62, %v4233_v46  ;;  %vm981_vm14 = vcmp.eq.f32.partialorder %v794_v62, %v4252_v60  ;;  %vm982_vm8 = vcmp.eq.f32.partialorder %v794_v62, %v4233_v46 }
  0xd5   : > { %vm4717_vm3 = vmand %vm7601_vm15, %vm7431_vm5  ;;  %vm7604_vm15 = vcmp.eq.f32.partialorder %v4242_v54, %v4252_v60  ;;  %v1411_v8 = vadd.s32 %v1409_v20, %v1361_v31  ;;  %v4773_v20 = vadd.s32 152, %v4024_v2  ;;  %v1446_v31 = vadd.s32 %v1444_v5, %v1358_v50 }
  0xd6   : > { %vm4734_vm5 = vmand %vm7604_vm15, %vm7432_vm12  ;;  %vm975_vm12 = vcmp.eq.f32.partialorder %v4580_v3, %v4252_v60  ;;  %v1447_v5 = vadd.s32 %v1445_v23, %v1360_v34  ;;  %v1362_v50 = vsel %vm4703_vm0, 1, %v7555_v56  ;;  %vm7621_vm0 = vcmp.eq.f32.partialorder %v4445_v24, %v4252_v60 }
  0xd7   : > { %vm1109_vm6 = vmand %vm981_vm14, %vm7607_vm10  ;;  %v804_v11 = vpop.permute.xlu1 %803  ;;  %7611 = vst [vmem:[#allocation35_spill] sm:$0xff] %v4773_v20 }
  0xd8   : > { %vm1173_vm2 = vmor %vm917_vm4, %vm1109_vm6  ;;  %vm921_vm6 = vcmp.gt.f32.partialorder %v804_v11, %v4252_v60  ;;  %vm922_vm11 = vcmp.gt.f32.partialorder %v804_v11, %v4233_v46  ;;  %vm7612_vm4 = vcmp.lt.s32.totalorder %v4636_v47, %v4267_v63 }
  0xd9   : > { %vm4762_vm10 = vmor %vm918_vm7, %vm982_vm8  ;;  %v1365_v37 = vsel %vm1173_vm2, 1, %v7555_v56  ;;  %vm986_vm8 = vcmp.eq.f32.partialorder %v804_v11, %v4233_v46  ;;  %vm7613_vm7 = vcmp.eq.f32.partialorder %v4307_v32, %v4252_v60  ;;  %v1369_v23 = vsel %vm921_vm6, 1, %v7555_v56 }
  0xda   : > { %vm4784_vm2 = vmand %vm7613_vm7, %vm7612_vm4  ;;  %v1413_v47 = vadd.s32 %v1411_v8, %v1365_v37  ;;  %vm927_vm7 = vcmp.gt.f32.partialorder %v4662_v55, %v4252_v60  ;;  %v1366_v26 = vsel %vm4762_vm10, 1, %v7555_v56  ;;  %vm928_vm4 = vcmp.gt.f32.partialorder %v4662_v55, %v4233_v46 }
  0xdb   : > { %vm1114_vm14 = vmand %vm986_vm8, %vm7616_vm9  ;;  %vm7620_vm9 = vcmp.lt.s32.totalorder %v4668_v42, %v4267_v63  ;;  %vm7624_vm8 = vcmp.gt.f32.partialorder %v4577_v0, %v4252_v60  ;;  %v4830_v8 = vpop.permute.xlu1 %813  ;;  %v1448_v42 = vadd.s32 %v1446_v31, %v1362_v50  ;;  %v4849_v31 = vadd.s32 168, %v4024_v2  ;;  %v4853_v50 = vpop.permute.xlu0 %838 }
  0xdc   : > { %vm4798_vm15 = vmor %vm922_vm11, %vm1114_vm14  ;;  %v4826_v37 = vsel %vm7624_vm8, 1, %v7555_v56  ;;  %vm925_vm8 = vcmp.gt.f32.partialorder %v4830_v8, %v4252_v60  ;;  %vm931_vm11 = vcmp.gt.f32.partialorder %v4758_v57, %v4252_v60  ;;  %vm7630_vm10 = vcmp.gt.f32.partialorder %v4228_v38, %v4252_v60 }
  0xdd   : > { %vm4816_vm14 = vmand %vm7621_vm0, %vm7620_vm9  ;;  %vm7625_vm9 = vcmp.lt.s32.totalorder %v4685_v51, %v4267_v63  ;;  %7628 = vst [vmem:[#allocation37_spill] sm:$0xff] %v4849_v31  ;;  %v1449_v51 = vadd.s32 %v1447_v5, %v4552_v6  ;;  %v4872_v63 = vsel %vm927_vm7, 1, %v7555_v56  ;;  %v1415_v6 = vadd.s32 %v1413_v47, %v1369_v23 }
  0xde   : > { %vm4838_vm0 = vmand %vm975_vm12, %vm7625_vm9  ;;  %vm911_vm12 = vcmp.gt.f32.partialorder %v4580_v3, %v4252_v60  ;;  %vm7629_vm9 = vcmp.gt.f32.partialorder %v4223_v15, %v4252_v60  ;;  %v4883_v15 = vadd.s32 176, %v4024_v2  ;;  %vm7632_vm7 = vcmp.gt.f32.partialorder %v4242_v54, %v4252_v60 }
  0xdf   : > { %vm1147_vm6 = vmor %vm7629_vm9, %vm4693_vm1  ;;  %vm7450_vm1 = vcmp.lt.s32.totalorder %v4807_v39, %v4517_v43  ;;  %v1373_v38 = vsel %vm925_vm8, 1, %v7555_v56  ;;  %v4895_v33 = vpop.permute.xlu1 %823  ;;  %v4901_v4 = vsel %vm931_vm11, 1, %v7555_v56  ;;  %v1450_v54 = vadd.s32 %v1448_v42, %v1366_v26  ;;  %v4948_v11 = vpop.permute.xlu0 %848 }
  0xe0   : > { %vm1151_vm13 = vmor %vm7630_vm10, %vm4717_vm3  ;;  %v1339_v13 = vsel %vm1147_vm6, 1, %v7555_v56  ;;  %7631 = vst [vmem:[#allocation38_spill] sm:$0xff] %v4883_v15  ;;  %vm7449_vm11 = vcmp.lt.s32.totalorder %v4849_v31, %v4517_v43  ;;  %vm996_vm6 = vcmp.eq.f32.partialorder %v4758_v57, %v4233_v46  ;;  %v1370_v42 = vsel %vm4798_vm15, 1, %v7555_v56 }
  0xe1   : > { %vm1155_vm9 = vmor %vm7632_vm7, %vm4734_vm5  ;;  %v1343_v47 = vsel %vm1151_vm13, 1, %v7555_v56  ;;  %vm7634_vm5 = vcmp.gt.f32.partialorder %v4307_v32, %v4252_v60  ;;  %vm929_vm13 = vcmp.gt.f32.partialorder %v4895_v33, %v4252_v60  ;;  %v1451_v26 = vadd.s32 %v1449_v51, %v4680_v28 }
  0xe2   : > { %vm1159_vm3 = vmor %vm7634_vm5, %vm4784_vm2  ;;  %v1347_v5 = vsel %vm1155_vm9, 1, %v7555_v56  ;;  %v1402_v23 = vadd.s32 %v1343_v47, %v1339_v13  ;;  %vm7635_vm2 = vcmp.gt.f32.partialorder %v4445_v24, %v4252_v60  ;;  %vm932_vm10 = vcmp.gt.f32.partialorder %v4758_v57, %v4233_v46 }
  0xe3   : > { %vm1163_vm8 = vmor %vm7635_vm2, %vm4816_vm14  ;;  %v1351_v32 = vsel %vm1159_vm3, 1, %v7555_v56  ;;  %vm935_vm7 = vcmp.gt.f32.partialorder %v4853_v50, %v4252_v60  ;;  %vm990_vm14 = vcmp.eq.f32.partialorder %v4830_v8, %v4233_v46  ;;  %v1417_v28 = vadd.s32 %v1415_v6, %v1373_v38  ;;  %v834_v34 = vpop.permute.xlu1 %833 }
  0xe4   : > { %vm4937_vm15 = vmor %vm911_vm12, %vm4838_vm0  ;;  %v1404_v24 = vadd.s32 %v1402_v23, %v1347_v5  ;;  %v4946_v51 = vadd.s32 192, %v4024_v2  ;;  %v1355_v44 = vsel %vm1163_vm8, 1, %v7555_v56  ;;  %vm7639_vm0 = vcmp.lt.s32.totalorder %v4709_v21, %v4517_v43 }
  0xe5   : > { %vm7640_vm12 = vcmp.eq.f32.partialorder %v4577_v0, %v4233_v46  ;;  %vm926_vm3 = vcmp.gt.f32.partialorder %v4830_v8, %v4233_v46  ;;  %v1377_v3 = vsel %vm929_vm13, 1, %v7555_v56  ;;  %v4964_v6 = vadd.s32 200, %v4024_v2  ;;  %s3814_s17 = spop %3813 }
  0xe6   : > { %7638 = vst [vmem:[#allocation40_spill] sm:$0xff] %v4946_v51  ;;  %vm1116_vm5 = vmand %vm7640_vm12, %vm7639_vm0  ;;  %v1452_v13 = vadd.s32 %v1450_v54, %v1370_v42  ;;  %v1406_v47 = vadd.s32 %v1404_v24, %v1351_v32  ;;  %vm7642_vm2 = vcmp.gt.f32.partialorder %v4577_v0, %v4233_v46  ;;  %vm933_vm0 = vcmp.gt.f32.partialorder %v834_v34, %v4252_v60 }
  0xe7   : > { %7641 = vst [vmem:[#allocation41_spill] sm:$0xff] %v4964_v6  ;;  %vm1180_vm8 = vmor %vm7642_vm2, %vm1116_vm5  ;;  %vm939_vm13 = vcmp.gt.f32.partialorder %v4948_v11, %v4252_v60  ;;  %v541_v38 = vstv %s3814_s17  ;;  %v1359_v54 = vsel %vm4937_vm15, 1, %v7555_v56  ;;  %vm7643_vm5 = vcmp.lt.s32.totalorder %v4770_v53, %v4517_v43  ;;  %v844_v62 = vpop.permute.xlu1 %843 }
  0xe8   : > { %v1372_v5 = vsel %vm1180_vm8, 1, %v7555_v56  ;;  %vm1118_vm2 = vmand %vm990_vm14, %vm7643_vm5  ;;  %vm994_vm9 = vcmp.eq.f32.partialorder %v4895_v33, %v4233_v46  ;;  %3895 = vrcp.f32 %v541_v38  ;;  %v1408_v0 = vadd.s32 %v1406_v47, %v1355_v44  ;;  %v5017_v44 = vpop.permute.xlu0 %858 }
  0xe9   : > { %v1453_v23 = vadd.s32 %v1451_v26, %v1372_v5  ;;  %vm1182_vm15 = vmor %vm926_vm3, %vm1118_vm2  ;;  %v1419_v42 = vadd.s32 %v1417_v28, %v1377_v3  ;;  %vm7644_vm8 = vcmp.lt.s32.totalorder %v4773_v20, %v4517_v43  ;;  %vm7645_vm14 = vcmp.eq.f32.partialorder %v4662_v55, %v4233_v46 }
  0xea   : > { %v1374_v32 = vsel %vm1182_vm15, 1, %v7555_v56  ;;  %vm1120_vm5 = vmand %vm7645_vm14, %vm7644_vm8  ;;  %vm930_vm12 = vcmp.gt.f32.partialorder %v4895_v33, %v4233_v46  ;;  %v1381_v26 = vsel %vm933_vm0, 1, %v7555_v56  ;;  %v5009_v8 = vsel %vm935_vm7, 1, %v7555_v56 }
  0xeb   : > { %v1410_v24 = vadd.s32 %v1408_v0, %v1359_v54  ;;  %v1454_v28 = vadd.s32 %v1452_v13, %v1374_v32  ;;  %vm1184_vm3 = vmor %vm928_vm4, %vm1120_vm5  ;;  %vm937_vm2 = vcmp.gt.f32.partialorder %v844_v62, %v4252_v60  ;;  %vm1004_vm15 = vcmp.eq.f32.partialorder %v4948_v11, %v4233_v46  ;;  %v854_v5 = vpop.permute.xlu1 %853 }
  0xec   : > { %v1376_v3 = vsel %vm1184_vm3, 1, %v7555_v56  ;;  %vm1122_vm7 = vmand %vm994_vm9, %vm7450_vm1  ;;  %vm7478_vm0 = vcmp.lt.s32.totalorder %v4946_v51, %v4517_v43  ;;  %vm7475_vm4 = vcmp.lt.s32.totalorder %v4964_v6, %v4517_v43  ;;  %vm940_vm8 = vcmp.gt.f32.partialorder %v4948_v11, %v4233_v46 }
  0xed   : > { %v5036_v55 = vsel %vm939_vm13, 1, %v7555_v56  ;;  %v1412_v13 = vadd.s32 %v1410_v24, %v4547_v1  ;;  %v1455_v47 = vadd.s32 %v1453_v23, %v1376_v3  ;;  %vm1186_vm9 = vmor %vm930_vm12, %vm1122_vm7  ;;  %vm998_vm14 = vcmp.eq.f32.partialorder %v834_v34, %v4233_v46  ;;  %v5079_v24 = vpop.permute.xlu0 %868 }
  0xee   : > { %v1421_v38 = vadd.s32 %v1419_v42, %v1381_v26  ;;  %v1378_v54 = vsel %vm1186_vm9, 1, %v7555_v56  ;;  %vm1124_vm13 = vmand %vm996_vm6, %vm7449_vm11  ;;  %vm934_vm5 = vcmp.gt.f32.partialorder %v834_v34, %v4233_v46  ;;  %v1385_v1 = vsel %vm937_vm2, 1, %v7555_v56 }
  0xef   : > { %v5055_v33 = vadd.s32 208, %v4024_v2  ;;  %v1414_v0 = vadd.s32 %v1412_v13, %v4587_v12  ;;  %v1456_v23 = vadd.s32 %v1454_v28, %v1378_v54  ;;  %vm1188_vm12 = vmor %vm932_vm10, %vm1124_vm13  ;;  %vm941_vm3 = vcmp.gt.f32.partialorder %v854_v5, %v4252_v60  ;;  %v864_v34 = vpop.permute.xlu1 %863 }
  0xf0   : > { %v5063_v42 = vadd.s32 216, %v4024_v2  ;;  %v1380_v32 = vsel %vm1188_vm12, 1, %v7555_v56  ;;  %vm7648_vm6 = vcmp.lt.s32.totalorder %v4883_v15, %v4517_v43  ;;  %vm943_vm7 = vcmp.gt.f32.partialorder %v5017_v44, %v4252_v60 }
  0xf1   : > { %7646 = vst [vmem:[#allocation42_spill] sm:$0xff] %v5055_v33  ;;  %vm1126_vm2 = vmand %vm998_vm14, %vm7648_vm6  ;;  %vm1008_vm10 = vcmp.eq.f32.partialorder %v5017_v44, %v4233_v46  ;;  %v1416_v12 = vadd.s32 %v1414_v0, %v4826_v37  ;;  %v1457_v57 = vadd.s32 %v1455_v47, %v1380_v32  ;;  %vm1002_vm12 = vcmp.eq.f32.partialorder %v844_v62, %v4233_v46 }
  0xf2   : > { %7647 = vst [vmem:[#allocation43_spill] sm:$0xff] %v5063_v42  ;;  %vm1190_vm13 = vmor %vm934_vm5, %vm1126_vm2  ;;  %v1423_v26 = vadd.s32 %v1421_v38, %v1385_v1  ;;  %vm7649_vm14 = vcmp.lt.s32.totalorder %v4904_v16, %v4517_v43  ;;  %vm7650_vm6 = vcmp.eq.f32.partialorder %v4853_v50, %v4233_v46  ;;  %vm938_vm1 = vcmp.gt.f32.partialorder %v844_v62, %v4233_v46  ;;  %v3896_v3 = vpop.eup %3895 }
  0xf3   : > { %v1382_v28 = vsel %vm1190_vm13, 1, %v7555_v56  ;;  %vm1128_vm11 = vmand %vm7650_vm6, %vm7649_vm14  ;;  %vm7474_vm9 = vcmp.lt.s32.totalorder %v5055_v33, %v4517_v43  ;;  %v1389_v37 = vsel %vm941_vm3, 1, %v7555_v56  ;;  %v1418_v13 = vadd.s32 %v1416_v12, %v4872_v63  ;;  %3815 = vpush %v3896_v3  ;;  %v874_v62 = vpop.permute.xlu1 %873 }
  0xf4   : > { %v1458_v47 = vadd.s32 %v1456_v23, %v1382_v28  ;;  %vm7651_vm5 = vcmp.gt.f32.partialorder %v4853_v50, %v4233_v46  ;;  %vm7473_vm13 = vcmp.lt.s32.totalorder %v5063_v42, %v4517_v43  ;;  %vm945_vm14 = vcmp.gt.f32.partialorder %v864_v34, %v4252_v60  ;;  %vm1130_vm3 = vmand %vm1002_vm12, %vm7478_vm0 }
  0xf5   : > { %vm1192_vm2 = vmor %vm7651_vm5, %vm1128_vm11  ;;  %v1391_v63 = vsel %vm943_vm7, 1, %v7555_v56  ;;  %v5112_v50 = vadd.s32 224, %v4024_v2  ;;  %v5115_v54 = vadd.s32 232, %v4024_v2  ;;  %v1420_v1 = vadd.s32 %v1418_v13, %v4901_v4 }
  0xf6   : > { %v1384_v38 = vsel %vm1192_vm2, 1, %v7555_v56  ;;  %vm1194_vm11 = vmor %vm938_vm1, %vm1130_vm3  ;;  %vm1006_vm6 = vcmp.eq.f32.partialorder %v854_v5, %v4233_v46  ;;  %v1425_v23 = vadd.s32 %v1423_v26, %v1389_v37  ;;  %vm942_vm12 = vcmp.gt.f32.partialorder %v854_v5, %v4233_v46  ;;  %v879_v26 = vpop.permute.xlu0 %878 }
  0xf7   : > { %7652 = vst [vmem:[#allocation44_spill] sm:$0xff] %v5112_v50  ;;  %7653 = vst [vmem:[#allocation45_spill] sm:$0xff] %v5115_v54  ;;  %v1459_v0 = vadd.s32 %v1457_v57, %v1384_v38  ;;  %v1386_v32 = vsel %vm1194_vm11, 1, %v7555_v56  ;;  %v1393_v4 = vsel %vm945_vm14, 1, %v7555_v56  ;;  %vm947_vm5 = vcmp.gt.f32.partialorder %v5079_v24, %v4252_v60 }
  0xf8   : > { %vm1132_vm7 = vmand %vm1004_vm15, %vm7475_vm4  ;;  %v1422_v12 = vadd.s32 %v1420_v1, %v5009_v8  ;;  %v1460_v57 = vadd.s32 %v1458_v47, %v1386_v32  ;;  %vm1012_vm2 = vcmp.eq.f32.partialorder %v5079_v24, %v4233_v46  ;;  %vm949_vm15 = vcmp.gt.f32.partialorder %v874_v62, %v4252_v60 }
  0xf9   : > { %vm1196_vm1 = vmor %vm940_vm8, %vm1132_vm7  ;;  %vm7451_vm3 = vcmp.lt.s32.totalorder %v5112_v50, %v4517_v43  ;;  %v5148_v11 = vadd.s32 240, %v4024_v2  ;;  %vm951_vm8 = vcmp.gt.f32.partialorder %v879_v26, %v4252_v60  ;;  %vm1010_vm7 = vcmp.eq.f32.partialorder %v864_v34, %v4233_v46 }
  0xfa   : > { %v1388_v28 = vsel %vm1196_vm1, 1, %v7555_v56  ;;  %vm1134_vm14 = vmand %vm1006_vm6, %vm7474_vm9  ;;  %v1424_v8 = vadd.s32 %v1422_v12, %v5036_v55  ;;  %v1427_v3 = vadd.s32 %v1425_v23, %v1393_v4  ;;  %vm946_vm1 = vcmp.gt.f32.partialorder %v864_v34, %v4233_v46 }
  0xfb   : > { %7654 = vst [vmem:[#allocation46_spill] sm:$0xff] %v5148_v11  ;;  %v1461_v37 = vadd.s32 %v1459_v0, %v1388_v28  ;;  %vm1198_vm11 = vmor %vm942_vm12, %vm1134_vm14  ;;  %v1395_v55 = vsel %vm947_vm5, 1, %v7555_v56  ;;  %v1397_v5 = vsel %vm949_vm15, 1, %v7555_v56  ;;  %vm7655_vm12 = vcmp.gt.f32.partialorder %v5017_v44, %v4233_v46 }
  0xfc   : > { %v1390_v13 = vsel %vm1198_vm11, 1, %v7555_v56  ;;  %vm1136_vm6 = vmand %vm1008_vm10, %vm7473_vm13  ;;  %v1426_v38 = vadd.s32 %v1424_v8, %v1391_v63  ;;  %vm7472_vm10 = vcmp.lt.s32.totalorder %v5115_v54, %v4517_v43  ;;  %v5176_v34 = vadd.s32 248, %v4024_v2 }
  0xfd   : > { %v1462_v47 = vadd.s32 %v1460_v57, %v1390_v13  ;;  %vm1200_vm14 = vmor %vm7655_vm12, %vm1136_vm6  ;;  %vm948_vm15 = vcmp.gt.f32.partialorder %v5079_v24, %v4233_v46  ;;  %vm7471_vm11 = vcmp.lt.s32.totalorder %v5148_v11, %v4517_v43  ;;  %v1399_v44 = vsel %vm951_vm8, 1, %v7555_v56 }
  0xfe   : > { %7656 = vst [vmem:[#allocation47_spill] sm:$0xff] %v5176_v34  ;;  %v1392_v1 = vsel %vm1200_vm14, 1, %v7555_v56  ;;  %vm1138_vm5 = vmand %vm1010_vm7, %vm7451_vm3  ;;  %v1428_v0 = vadd.s32 %v1426_v38, %v1395_v55  ;;  %vm1014_vm12 = vcmp.eq.f32.partialorder %v874_v62, %v4233_v46  ;;  %v1429_v23 = vadd.s32 %v1427_v3, %v1397_v5 }
  0xff   : > { %v1463_v63 = vadd.s32 %v1461_v37, %v1392_v1  ;;  %vm1202_vm6 = vmor %vm946_vm1, %vm1138_vm5  ;;  %vm950_vm14 = vcmp.gt.f32.partialorder %v874_v62, %v4233_v46  ;;  %vm7470_vm8 = vcmp.lt.s32.totalorder %v5176_v34, %v4517_v43  ;;  %vm1016_vm1 = vcmp.eq.f32.partialorder %v879_v26, %v4233_v46  ;;  %v2911_v34 = vld [vmem:[%s5346_s25 + $0x38] sm:$0xff] }
 0x100   : > { %v1394_v32 = vsel %vm1202_vm6, 1, %v7555_v56  ;;  %vm1140_vm7 = vmand %vm1012_vm2, %vm7472_vm10  ;;  %v1430_v60 = vadd.s32 %v1428_v0, %v1399_v44  ;;  %vm952_vm6 = vcmp.gt.f32.partialorder %v879_v26, %v4233_v46  ;;  %v3972_v1 = vmov 1966171168  }
 0x101   : > { %v1464_v4 = vadd.s32 %v1462_v47, %v1394_v32  ;;  %vm1204_vm3 = vmor %vm948_vm15, %vm1140_vm7  ;;  %v1483_v44 = vunpack.c.l.s4 %v3972_v1 }
 0x102   : > { %v1396_v12 = vsel %vm1204_vm3, 1, %v7555_v56  ;;  %vm1142_vm5 = vmand %vm1014_vm12, %vm7471_vm11  ;;  %v1431_v57 = vadd.s32 %v1430_v60, %v1429_v23 }
 0x103   : > { %v1465_v24 = vadd.s32 %v1463_v63, %v1396_v12  ;;  %vm1206_vm2 = vmor %vm950_vm14, %vm1142_vm5  ;;  %v1484_v32 = vunpack.c.0.s8 %v1483_v44 }
 0x104   : > { %v1398_v62 = vsel %vm1206_vm2, 1, %v7555_v56  ;;  %vm1144_vm15 = vmand %vm1016_vm1, %vm7470_vm8  ;;  %v1432_v8 = vrot.slane %v1431_v57, 4 }
 0x105   : > { %v1466_v28 = vadd.s32 %v1464_v4, %v1398_v62  ;;  %vm1208_vm7 = vmor %vm952_vm6, %vm1144_vm15 }
 0x106   : > { %v1400_v37 = vsel %vm1208_vm7, 1, %v7555_v56  ;;  %v1433_v3 = vadd.s32 %v1432_v8, %v1431_v57 }
 0x107   : > { %v1467_v13 = vadd.s32 %v1465_v24, %v1400_v37  ;;  %v5213_v24 = vsub.s32 %v1484_v32, %v4024_v2  ;;  %v7658_v37 = vlaneseq }
 0x108   : > { %v1434_v55 = vrot.slane %v1433_v3, 2 }
 0x109   : > { %v1468_v5 = vadd.s32 %v1467_v13, %v1466_v28  ;;  %7657 = vst [vmem:[#allocation48_spill] sm:$0xff] %v5213_v24  ;;  %vm5223_vm14 = vcmp.lt.s32.totalorder %v7658_v37, 256 }
 0x10a   : > { %v1435_v47 = vadd.s32 %v1434_v55, %v1433_v3  ;;  %v7659_v3 = vmov 0 }
 0x10b   : > { %v1469_v46 = vrot.slane %v1468_v5, 4  ;;  %v7660_v3 = vsel %vm5223_vm14, 4294967295, %v7659_v3 }
 0x10c   : > { %v1436_v26 = vrot.slane %v1435_v47, 1  ;;  %7661 = vst [vmem:[#allocation49_spill] sm:$0xff] %v7660_v3 }
 0x10d   : > { %v1470_v38 = vadd.s32 %v1469_v46, %v1468_v5 }
 0x10e   : > { %v1437_v63 = vadd.s32 %v1436_v26, %v1435_v47 }
 0x10f   : > { %v1471_v0 = vrot.slane %v1470_v38, 2 }
 0x110   : > { %vm1475_vm3 = vcmp.lt.s32.totalorder %v1437_v63, 3 }
 0x111   : > { %v1472_v23 = vadd.s32 %v1471_v0, %v1470_v38  ;;  %v1479_v12 = vsel %vm1475_vm3, 1, %v7555_v56 }
 0x113   : > { %v1473_v4 = vrot.slane %v1472_v23, 1 }
 0x115   : > { %v1474_v60 = vadd.s32 %v1473_v4, %v1472_v23 }
 0x117   : > { %vm1476_vm12 = vcmp.lt.s32.totalorder %v1474_v60, 3 }
 0x118   : > { %v1480_v57 = vsel %vm1476_vm12, 1, %v7555_v56 }
 0x119   : > { %v1481_v62 = vcombine.low %v1479_v12, %v1480_v57 }
 0x11b   : > { %v1488_v28 = vrot.slane %v1481_v62, %v5213_v24 }
 0x11d   : > { %v1495_v8 = vrot.slane %v1488_v28, %v5213_v24  ;;  %v2909_v24 = vld [vmem:[%s5346_s25 + $0x28] sm:$0xff] }
 0x11f   : > { %1500 = vst.msk [vmem:[%s374_s20] sm:$0x3] %vm5223_vm14, %v1495_v8 }
 0x124   : > { %s3816_s21 = spop %3815 }
 0x125   : > { %v5229_v13 = vstv %s3816_s21 }
 0x126   : > { %v1505_v55 = vmul.f32 %v5229_v13, %v4050_v9  ;;  %v1504_v5 = vmul.f32 %v5229_v13, %v4080_v25  ;;  %v1507_v47 = vmul.f32 %v5229_v13, %v4059_v14  ;;  %v1506_v46 = vmul.f32 %v5229_v13, %v4052_v10 }
 0x127   : > { %v1509_v26 = vmul.f32 %v5229_v13, %v4070_v22  ;;  %v1508_v44 = vmul.f32 %v5229_v13, %v4065_v19  ;;  %v1511_v9 = vmul.f32 %v5229_v13, %v4099_v41  ;;  %v1510_v14 = vmul.f32 %v5229_v13, %v4087_v30 }
 0x128   : > { %v1537_v38 = vsub.f32 1.0, %v1505_v55  ;;  %v1536_v1 = vsub.f32 1.0, %v1504_v5  ;;  %v1539_v63 = vsub.f32 1.0, %v1507_v47  ;;  %v1538_v25 = vsub.f32 1.0, %v1506_v46  ;;  %v7662_v46 = vld [vmem:[#allocation10_spill] sm:$0xff] }
 0x129   : > { %v1541_v10 = vsub.f32 1.0, %v1509_v26  ;;  %v5249_v22 = vmul.f32 %v5229_v13, %v4119_v59  ;;  %v1540_v0 = vsub.f32 1.0, %v1508_v44  ;;  %v5253_v19 = vmul.f32 %v5229_v13, %v4109_v49 }
 0x12a   : > { %1620 = vperm.xlu0 %3827, %v1537_v38   ;;  %1615 = vperm.xlu1 %3828, %v1536_v1   ;;  %3897 = vlog2.f32 %v1537_v38  ;;  %v1543_v41 = vsub.f32 1.0, %v1511_v9  ;;  %v5257_v23 = vmul.f32 %v5229_v13, %v4139_v36  ;;  %v1542_v30 = vsub.f32 1.0, %v1510_v14  ;;  %v7663_v38 = vld [vmem:[#allocation6_spill] sm:$0xff] }
 0x12b   : > { %3899 = vlog2.f32 %v1536_v1  ;;  %v5261_v59 = vmul.f32 %v5229_v13, %v4129_v18  ;;  %v5265_v32 = vmul.f32 %v5229_v13, %v4083_v27  ;;  %v1545_v49 = vsub.f32 1.0, %v5249_v22 }
 0x12c   : > { %3901 = vlog2.f32 %v1539_v63  ;;  %v5270_v4 = vmul.f32 %v5229_v13, %v4149_v52  ;;  %v5274_v36 = vmul.f32 %v5229_v13, %v4092_v35  ;;  %v1544_v60 = vsub.f32 1.0, %v5253_v19 }
 0x12d   : > { %3903 = vlog2.f32 %v1538_v25  ;;  %v5279_v18 = vmul.f32 %v5229_v13, %v4159_v7  ;;  %v5283_v27 = vmul.f32 %v5229_v13, %v4096_v40  ;;  %v7459_v12 = vsub.f32 1.0, %v5257_v23 }
 0x12e   : > { %1630 = vperm.xlu0 %3827, %v1539_v63   ;;  %1625 = vperm.xlu1 %3828, %v1538_v25   ;;  %3905 = vlog2.f32 %v1541_v10  ;;  %v7457_v52 = vsub.f32 1.0, %v5261_v59  ;;  %v7453_v57 = vsub.f32 1.0, %v5265_v32  ;;  %v5290_v35 = vmul.f32 %v5229_v13, %v4169_v29  ;;  %v7664_v63 = vld [vmem:[#allocation11_spill] sm:$0xff] }
 0x12f   : > { %3907 = vlog2.f32 %v1540_v0  ;;  %v5294_v7 = vmul.f32 %v5229_v13, %v4106_v48  ;;  %v5298_v40 = vmul.f32 %v5229_v13, %v4176_v45  ;;  %v7452_v62 = vsub.f32 1.0, %v5270_v4  ;;  %v7665_v25 = vld [vmem:[#allocation7_spill] sm:$0xff] }
 0x130   : > { %3909 = vlog2.f32 %v1543_v41  ;;  %v7454_v28 = vsub.f32 1.0, %v5274_v36  ;;  %v5304_v8 = vmul.f32 %v5229_v13, %v4116_v58  ;;  %v7455_v29 = vsub.f32 1.0, %v5279_v18 }
 0x131   : > { %3911 = vlog2.f32 %v1542_v30  ;;  %v7456_v37 = vsub.f32 1.0, %v5283_v27  ;;  %v5310_v48 = vmul.f32 %v5229_v13, %v4182_v61  ;;  %v7458_v55 = vsub.f32 1.0, %v5290_v35  ;;  %v2910_v61 = vld [vmem:[%s5346_s25 + $0x30] sm:$0xff] }
 0x132   : > { %1640 = vperm.xlu0 %3827, %v1541_v10   ;;  %1635 = vperm.xlu1 %3828, %v1540_v0   ;;  %3913 = vlog2.f32 %v1545_v49  ;;  %v7461_v5 = vsub.f32 1.0, %v5294_v7  ;;  %v5318_v58 = vmul.f32 %v5229_v13, %v4126_v17  ;;  %v5325_v26 = vmul.f32 %v5229_v13, %v7662_v46  ;;  %v7666_v0 = vld [vmem:[#allocation12_spill] sm:$0xff] }
 0x133   : > { %3915 = vlog2.f32 %v1544_v60  ;;  %v5329_v1 = vmul.f32 %v5229_v13, %v7663_v38  ;;  %v5336_v9 = vmul.f32 %v5229_v13, %v7664_v63  ;;  %v5340_v14 = vmul.f32 %v5229_v13, %v7665_v25  ;;  %v2905_v25 = vld [vmem:[%s5346_s25 + $0x8] sm:$0xff] }
 0x134   : > { %v3898_v45 = vpop.eup %3897  ;;  %3917 = vlog2.f32 %v7459_v12  ;;  %v5353_v19 = vmul.f32 %v5229_v13, %v7666_v0  ;;  %v2908_v12 = vld [vmem:[%s5346_s25 + $0x20] sm:$0xff]  ;;  %v7673_v3 = vsub.f32 1.0, %v5298_v40  ;;  %v7675_v54 = vsub.f32 1.0, %v5304_v8 }
 0x135   : > { %v3900_v47 = vpop.eup %3899  ;;  %3919 = vlog2.f32 %v7457_v52  ;;  %v2843_v17 = vmul.f32 0.6931472, %v3898_v45  ;;  %v2906_v52 = vld [vmem:[%s5346_s25 + $0x10] sm:$0xff]  ;;  %v7672_v45 = vsub.f32 1.0, %v5261_v59 }
 0x136   : > { %1650 = vperm.xlu0 %3827, %v1543_v41   ;;  %1645 = vperm.xlu1 %3828, %v1542_v30   ;;  %v3902_v44 = vpop.eup %3901  ;;  %3921 = vlog2.f32 %v7453_v57  ;;  %v7667_v41 = vld [vmem:[#allocation8_spill] sm:$0xff]  ;;  %v2841_v0 = vmul.f32 0.6931472, %v3900_v47 }
 0x137   : > { %v3904_v10 = vpop.eup %3903  ;;  %3923 = vlog2.f32 %v7452_v62  ;;  %v5357_v30 = vmul.f32 %v5229_v13, %v7667_v41  ;;  %v7668_v41 = vld [vmem:[#allocation13_spill] sm:$0xff]  ;;  %v5404_v47 = vadd.f32 %v2905_v25, %v2843_v17 }
 0x138   : > { %v3906_v46 = vpop.eup %3905  ;;  %3925 = vlog2.f32 %v7454_v28  ;;  %v5369_v57 = vmul.f32 %v5229_v13, %v7668_v41  ;;  %v7669_v28 = vld [vmem:[#allocation9_spill] sm:$0xff]  ;;  %v2904_v41 = vld [vmem:[%s5346_s25] sm:$0xff] }
 0x139   : > { %v3908_v62 = vpop.eup %3907  ;;  %3927 = vlog2.f32 %v7455_v29  ;;  %v5373_v38 = vmul.f32 %v5229_v13, %v7669_v28 }
 0x13a   : > { %1660 = vperm.xlu0 %3827, %v1545_v49   ;;  %1655 = vperm.xlu1 %3828, %v1544_v60   ;;  %v3910_v22 = vpop.eup %3909  ;;  %3929 = vlog2.f32 %v7456_v37  ;;  %v7670_v60 = vld [vmem:[#allocation14_spill] sm:$0xff]  ;;  %v7671_v37 = vsub.f32 1.0, %v5257_v23  ;;  %v2847_v23 = vmul.f32 0.6931472, %v3902_v44  ;;  %v2849_v59 = vmul.f32 0.6931472, %v3908_v62 }
 0x13b   : > { %v5380_v29 = vmul.f32 %v5229_v13, %v7670_v60  ;;  %v3912_v63 = vpop.eup %3911  ;;  %3931 = vlog2.f32 %v7458_v55  ;;  %v2907_v55 = vld [vmem:[%s5346_s25 + $0x18] sm:$0xff]  ;;  %v2845_v60 = vmul.f32 0.6931472, %v3904_v10  ;;  %v2855_v25 = vmul.f32 0.6931472, %v3910_v22 }
 0x13c   : > { %v3914_v49 = vpop.eup %3913  ;;  %3933 = vlog2.f32 %v7461_v5  ;;  %v5402_v5 = vadd.f32 %v2904_v41, %v2841_v0  ;;  %v2853_v10 = vmul.f32 0.6931472, %v3912_v63  ;;  %v7677_v41 = vsub.f32 1.0, %v5318_v58 }
 0x13d   : > { %v3916_v28 = vpop.eup %3915  ;;  %3935 = vlog2.f32 %v7673_v3  ;;  %v7676_v3 = vsub.f32 1.0, %v5310_v48  ;;  %v5413_v17 = vadd.f32 %v2906_v52, %v2845_v60  ;;  %v5419_v44 = vadd.f32 %v2908_v12, %v2849_v59  ;;  %v2917_v59 = vld [vmem:[%s5346_s25 + $0x68] sm:$0xff] }
 0x13e   : > { %1670 = vperm.xlu0 %3827, %v7671_v37   ;;  %1665 = vperm.xlu1 %3828, %v7672_v45   ;;  %7674 = vst [vmem:[#allocation10_spill] sm:$0xff] %v5402_v5  ;;  %v3918_v11 = vpop.eup %3917  ;;  %3937 = vlog2.f32 %v7675_v54  ;;  %v2851_v37 = vmul.f32 0.6931472, %v3906_v46  ;;  %v5417_v54 = vadd.f32 %v2907_v55, %v2847_v23  ;;  %v2912_v46 = vld [vmem:[%s5346_s25 + $0x40] sm:$0xff]  ;;  %v2913_v5 = vld [vmem:[%s5346_s25 + $0x48] sm:$0xff]  ;;  %v7679_v63 = vsub.f32 1.0, %v5265_v32 }
 0x13f   : > { %v3920_v45 = vpop.eup %3919  ;;  %3939 = vlog2.f32 %v7676_v3  ;;  %v2914_v3 = vld [vmem:[%s5346_s25 + $0x50] sm:$0xff]  ;;  %v7680_v22 = vsub.f32 1.0, %v5270_v4  ;;  %v7681_v60 = vsub.f32 1.0, %v5325_v26  ;;  %v5434_v55 = vadd.f32 %v2911_v34, %v2855_v25  ;;  %v2916_v23 = vld [vmem:[%s5346_s25 + $0x60] sm:$0xff] }
 0x140   : > { %v3922_v0 = vpop.eup %3921  ;;  %3941 = vlog2.f32 %v7677_v41  ;;  %v5421_v62 = vadd.f32 %v2909_v24, %v2851_v37  ;;  %v5432_v41 = vadd.f32 %v2910_v61, %v2853_v10  ;;  %v2857_v12 = vmul.f32 0.6931472, %v3916_v28  ;;  %v2915_v24 = vld [vmem:[%s5346_s25 + $0x58] sm:$0xff] }
 0x141   : > { %v3924_v52 = vpop.eup %3923  ;;  %3943 = vlog2.f32 %v7681_v60  ;;  %7682 = vst [vmem:[#allocation11_spill] sm:$0xff] %v5434_v55  ;;  %v2859_v32 = vmul.f32 0.6931472, %v3914_v49  ;;  %v2861_v4 = vmul.f32 0.6931472, %v3920_v45  ;;  %v7684_v60 = vsub.f32 1.0, %v5336_v9 }
 0x142   : > { %7678 = vst [vmem:[#allocation6_spill] sm:$0xff] %v5421_v62  ;;  %1680 = vperm.xlu0 %3827, %v7679_v63   ;;  %1675 = vperm.xlu1 %3828, %v7680_v22   ;;  %v3926_v37 = vpop.eup %3925  ;;  %v7683_v62 = vsub.f32 1.0, %v5329_v1  ;;  %v2863_v63 = vmul.f32 0.6931472, %v3918_v11  ;;  %v5443_v61 = vadd.f32 %v2912_v46, %v2857_v12  ;;  %v2865_v34 = vmul.f32 0.6931472, %v3924_v52 }
 0x143   : > { %v3928_v22 = vpop.eup %3927  ;;  %v2867_v28 = vmul.f32 0.6931472, %v3922_v0  ;;  %v7686_v25 = vsub.f32 1.0, %v5340_v14  ;;  %v5447_v55 = vadd.f32 %v2913_v5, %v2859_v32  ;;  %v5449_v49 = vadd.f32 %v2914_v3, %v2861_v4  ;;  %v2918_v45 = vld [vmem:[%s5346_s25 + $0x70] sm:$0xff]  ;;  %v2920_v32 = vld [vmem:[%s5346_s25 + $0x80] sm:$0xff]  ;;  %v2923_v4 = vld [vmem:[%s5346_s25 + $0x98] sm:$0xff] }
 0x144   : > { %3945 = vlog2.f32 %v7683_v62  ;;  %7685 = vst [vmem:[#allocation7_spill] sm:$0xff] %v5443_v61  ;;  %v3930_v10 = vpop.eup %3929  ;;  %v5451_v11 = vadd.f32 %v2915_v24, %v2863_v63  ;;  %v2919_v62 = vld [vmem:[%s5346_s25 + $0x78] sm:$0xff]  ;;  %v7690_v46 = vsub.f32 1.0, %v5274_v36  ;;  %v7691_v0 = vsub.f32 1.0, %v5279_v18  ;;  %v2921_v24 = vld [vmem:[%s5346_s25 + $0x88] sm:$0xff] }
 0x145   : > { %3947 = vlog2.f32 %v7684_v60  ;;  %7687 = vst [vmem:[#allocation12_spill] sm:$0xff] %v5447_v55  ;;  %7688 = vst [vmem:[#allocation8_spill] sm:$0xff] %v5449_v49  ;;  %v3932_v60 = vpop.eup %3931  ;;  %v7692_v52 = vsub.f32 1.0, %v5353_v19  ;;  %v5461_v12 = vadd.f32 %v2916_v23, %v2865_v34  ;;  %v5463_v5 = vadd.f32 %v2917_v59, %v2867_v28 }
 0x146   : > { %3949 = vlog2.f32 %v7686_v25  ;;  %7689 = vst [vmem:[#allocation13_spill] sm:$0xff] %v5451_v11  ;;  %1690 = vperm.xlu0 %3827, %v7690_v46   ;;  %1685 = vperm.xlu1 %3828, %v7691_v0   ;;  %v2869_v3 = vmul.f32 0.6931472, %v3928_v22  ;;  %v3934_v63 = vpop.eup %3933  ;;  %v7695_v36 = vsub.f32 1.0, %v5357_v30  ;;  %v2871_v25 = vmul.f32 0.6931472, %v3926_v37 }
 0x147   : > { %3951 = vlog2.f32 %v7692_v52  ;;  %7693 = vst [vmem:[#allocation9_spill] sm:$0xff] %v5461_v12  ;;  %7694 = vst [vmem:[#allocation14_spill] sm:$0xff] %v5463_v5  ;;  %v2873_v18 = vmul.f32 0.6931472, %v3932_v60  ;;  %v2875_v46 = vmul.f32 0.6931472, %v3930_v10  ;;  %v3936_v0 = vpop.eup %3935 }
 0x148   : > { %3953 = vlog2.f32 %v7695_v36  ;;  %v7696_v52 = vsub.f32 1.0, %v5369_v57  ;;  %v5472_v23 = vadd.f32 %v2918_v45, %v2869_v3  ;;  %v2879_v59 = vmul.f32 0.6931472, %v3934_v63  ;;  %v3938_v22 = vpop.eup %3937  ;;  %v2922_v10 = vld [vmem:[%s5346_s25 + $0x90] sm:$0xff]  ;;  %v2925_v60 = vld [vmem:[%s5346_s25 + $0xa8] sm:$0xff] }
 0x149   : > { %v7698_v34 = vsub.f32 1.0, %v5373_v38  ;;  %v5476_v28 = vadd.f32 %v2919_v62, %v2871_v25  ;;  %v5478_v5 = vadd.f32 %v2920_v32, %v2873_v18  ;;  %v5480_v37 = vadd.f32 %v2921_v24, %v2875_v46  ;;  %v3940_v36 = vpop.eup %3939  ;;  %v2924_v32 = vld [vmem:[%s5346_s25 + $0xa0] sm:$0xff]  ;;  %v2927_v46 = vld [vmem:[%s5346_s25 + $0xb8] sm:$0xff] }
 0x14a   : > { %3955 = vlog2.f32 %v7696_v52  ;;  %7697 = vst [vmem:[#allocation50_spill] sm:$0xff] %v5472_v23  ;;  %v7702_v52 = vsub.f32 1.0, %v5283_v27  ;;  %v7703_v45 = vsub.f32 1.0, %v5290_v35  ;;  %v7704_v3 = vsub.f32 1.0, %v5380_v29  ;;  %v3942_v25 = vpop.eup %3941  ;;  %v2926_v35 = vld [vmem:[%s5346_s25 + $0xb0] sm:$0xff] }
 0x14b   : > { %3957 = vlog2.f32 %v7698_v34  ;;  %7699 = vst [vmem:[#allocation51_spill] sm:$0xff] %v5476_v28  ;;  %7700 = vst [vmem:[#allocation52_spill] sm:$0xff] %v5478_v5  ;;  %v2877_v62 = vmul.f32 0.6931472, %v3936_v0  ;;  %v5490_v63 = vadd.f32 %v2923_v4, %v2879_v59  ;;  %v2883_v24 = vmul.f32 0.6931472, %v3938_v22  ;;  %v3944_v34 = vpop.eup %3943 }
 0x14c   : > { %7701 = vst [vmem:[#allocation53_spill] sm:$0xff] %v5480_v37  ;;  %1700 = vperm.xlu0 %3827, %v7702_v52   ;;  %1695 = vperm.xlu1 %3828, %v7703_v45   ;;  %3959 = vlog2.f32 %v7704_v3  ;;  %v2881_v18 = vmul.f32 0.6931472, %v3940_v36  ;;  %v2887_v52 = vmul.f32 0.6931472, %v3942_v25  ;;  %v2929_v0 = vld [vmem:[%s5346_s25 + $0xc8] sm:$0xff] }
 0x14d   : > { %7705 = vst [vmem:[#allocation54_spill] sm:$0xff] %v5490_v63  ;;  %v5494_v37 = vadd.f32 %v2922_v10, %v2877_v62  ;;  %v5496_v27 = vadd.f32 %v2925_v60, %v2883_v24  ;;  %v2885_v4 = vmul.f32 0.6931472, %v3944_v34  ;;  %v7709_v22 = vsub.f32 1.0, %v5294_v7  ;;  %v2928_v62 = vld [vmem:[%s5346_s25 + $0xc0] sm:$0xff] }
 0x14e   : > { %v3946_v45 = vpop.eup %3945  ;;  %v5499_v3 = vadd.f32 %v2924_v32, %v2881_v18  ;;  %v7710_v36 = vsub.f32 1.0, %v5298_v40  ;;  %v5506_v10 = vadd.f32 %v2927_v46, %v2887_v52  ;;  %v2931_v18 = vld [vmem:[%s5346_s25 + $0xd8] sm:$0xff]  ;;  %v2933_v52 = vld [vmem:[%s5346_s25 + $0xe8] sm:$0xff] }
 0x14f   : > { %7706 = vst [vmem:[#allocation55_spill] sm:$0xff] %v5494_v37  ;;  %7707 = vst [vmem:[#allocation56_spill] sm:$0xff] %v5496_v27  ;;  %v3948_v59 = vpop.eup %3947  ;;  %v2891_v60 = vmul.f32 0.6931472, %v3946_v45  ;;  %v5509_v25 = vadd.f32 %v2926_v35, %v2885_v4  ;;  %v7716_v35 = vsub.f32 1.0, %v5310_v48  ;;  %v7721_v48 = vsub.f32 1.0, %v5318_v58 }
 0x150   : > { %7708 = vst [vmem:[#allocation57_spill] sm:$0xff] %v5499_v3  ;;  %1710 = vperm.xlu0 %3827, %v7709_v22   ;;  %1705 = vperm.xlu1 %3828, %v7710_v36   ;;  %7711 = vst [vmem:[#allocation58_spill] sm:$0xff] %v5506_v10  ;;  %v3950_v24 = vpop.eup %3949  ;;  %v2889_v32 = vmul.f32 0.6931472, %v3948_v59  ;;  %v2930_v22 = vld [vmem:[%s5346_s25 + $0xd0] sm:$0xff]  ;;  %v7715_v36 = vsub.f32 1.0, %v5304_v8 }
 0x151   : > { %7712 = vst [vmem:[#allocation59_spill] sm:$0xff] %v5509_v25  ;;  %v3952_v34 = vpop.eup %3951  ;;  %v5512_v27 = vadd.f32 %v2929_v0, %v2891_v60  ;;  %v2895_v7 = vmul.f32 0.6931472, %v3950_v24  ;;  %v2932_v59 = vld [vmem:[%s5346_s25 + $0xe0] sm:$0xff]  ;;  %v2934_v10 = vld [vmem:[%s5346_s25 + $0xf0] sm:$0xff]  ;;  %v7729_v58 = vsub.f32 1.0, %v5357_v30 }
 0x152   : > { %v3954_v3 = vpop.eup %3953  ;;  %v5515_v40 = vadd.f32 %v2928_v62, %v2889_v32  ;;  %v2893_v46 = vmul.f32 0.6931472, %v3952_v34  ;;  %v2935_v62 = vld [vmem:[%s5346_s25 + $0xf8] sm:$0xff] }
 0x153   : > { %7713 = vst [vmem:[#allocation60_spill] sm:$0xff] %v5512_v27  ;;  %v5522_v4 = vadd.f32 %v2931_v18, %v2895_v7  ;;  %v2899_v0 = vmul.f32 0.6931472, %v3954_v3  ;;  %v7722_v18 = vsub.f32 1.0, %v5325_v26  ;;  %v7730_v26 = vsub.f32 1.0, %v5369_v57 }
 0x154   : > { %7714 = vst [vmem:[#allocation61_spill] sm:$0xff] %v5515_v40  ;;  %v3956_v45 = vpop.eup %3955  ;;  %1720 = vperm.xlu0 %3827, %v7715_v36   ;;  %1715 = vperm.xlu1 %3828, %v7716_v35   ;;  %v5525_v24 = vadd.f32 %v2930_v22, %v2893_v46  ;;  %v7725_v22 = vsub.f32 1.0, %v5329_v1  ;;  %v7726_v46 = vsub.f32 1.0, %v5336_v9  ;;  %v7732_v1 = vsub.f32 1.0, %v5380_v29  ;;  %v7733_v9 = vld [vmem:[#allocation5_spill] sm:$0xff]  ;;  %v7734_v36 = vld [vmem:[#allocation3_spill] sm:$0xff] }
 0x155   : > { %7717 = vst [vmem:[#allocation62_spill] sm:$0xff] %v5522_v4  ;;  %v3958_v60 = vpop.eup %3957  ;;  %v2897_v27 = vmul.f32 0.6931472, %v3956_v45  ;;  %v5528_v40 = vadd.f32 %v2933_v52, %v2899_v0  ;;  %v7728_v52 = vsub.f32 1.0, %v5353_v19  ;;  %v1502_v45 = vmul.f32 %v5229_v13, %v7733_v9  ;;  %v7735_v35 = vld [vmem:[#allocation4_spill] sm:$0xff]  ;;  %v7758_v4 = vld [vmem:[#allocation17_spill] sm:$0xff] }
 0x156   : > { %7718 = vst [vmem:[#allocation63_spill] sm:$0xff] %v5525_v24  ;;  %v3960_v32 = vpop.eup %3959  ;;  %v2903_v34 = vmul.f32 0.6931472, %v3958_v60  ;;  %v7736_v13 = vld [vmem:[#allocation16_spill] sm:$0xff] }
 0x157   : > { %7719 = vst [vmem:[#allocation64_spill] sm:$0xff] %v5528_v40  ;;  %v5531_v25 = vadd.f32 %v2932_v59, %v2897_v27  ;;  %v2901_v8 = vmul.f32 0.6931472, %v3960_v32  ;;  %v7727_v27 = vsub.f32 1.0, %v5340_v14  ;;  %v5559_v14 = vsub.f32 1.0, %v1502_v45 }
 0x158   : > { %1730 = vperm.xlu0 %3827, %v7721_v48   ;;  %1725 = vperm.xlu1 %3828, %v7722_v18   ;;  %v5537_v3 = vadd.f32 %v2935_v62, %v2903_v34  ;;  %vm7737_vm15 = vcmp.lt.s32.totalorder %v4024_v2, %v7736_v13  ;;  %v7738_v34 = vld [vmem:[#allocation24_spill] sm:$0xff] }
 0x159   : > { %7720 = vst [vmem:[#allocation65_spill] sm:$0xff] %v5531_v25  ;;  %v5539_v7 = vadd.f32 %v2934_v10, %v2901_v8  ;;  %v7731_v10 = vsub.f32 1.0, %v5373_v38  ;;  %v1572_v19 = vrot.slane %v5559_v14, %v7734_v36  ;;  %v1576_v30 = vrot.slane %v5559_v14, %v7735_v35 }
 0x15a   : > { %7723 = vst [vmem:[#allocation66_spill] sm:$0xff] %v5537_v3  ;;  %vm7739_vm9 = vcmp.lt.s32.totalorder %v7738_v34, %v7736_v13  ;;  %3961 = vlog2.f32 %v5559_v14 }
 0x15b   : > { %7724 = vst [vmem:[#allocation67_spill] sm:$0xff] %v5539_v7  ;;  %v5566_v57 = vrot.slane %v1572_v19, %v7734_v36  ;;  %v5569_v38 = vrot.slane %v1576_v30, %v7734_v36  ;;  %v7756_v7 = vld [vmem:[#allocation25_spill] sm:$0xff] }
 0x15c   : > { %1740 = vperm.xlu0 %3827, %v7725_v22   ;;  %1735 = vperm.xlu1 %3828, %v7726_v46  }
 0x160   : > { %1750 = vperm.xlu0 %3827, %v7727_v27   ;;  %1745 = vperm.xlu1 %3828, %v7728_v52  }
 0x164   : > { %1760 = vperm.xlu0 %3827, %v7729_v58   ;;  %1755 = vperm.xlu1 %3828, %v7730_v26   ;;  %v7740_v58 = vld [vmem:[#allocation18_spill] sm:$0xff] }
 0x168   : > { %1770 = vperm.xlu0 %3827, %v7731_v10   ;;  %1765 = vperm.xlu1 %3828, %v7732_v1  }
 0x1a9   : > { %v1616_v0 = vpop.permute.xlu1 %1615  ;;  %v1621_v29 = vpop.permute.xlu0 %1620 }
 0x1aa   : > { %vm1781_vm1 = vcmp.gt.f32.partialorder %v1616_v0, %v5566_v57  ;;  %vm1782_vm5 = vcmp.gt.f32.partialorder %v1616_v0, %v5569_v38  ;;  %vm1845_vm6 = vcmp.eq.f32.partialorder %v1616_v0, %v5566_v57  ;;  %vm1846_vm2 = vcmp.eq.f32.partialorder %v1616_v0, %v5569_v38 }
 0x1ab   : > { %vm1909_vm7 = vmand %vm1845_vm6, %vm7737_vm15  ;;  %vm1847_vm3 = vcmp.eq.f32.partialorder %v1621_v29, %v5566_v57  ;;  %vm1783_vm8 = vcmp.gt.f32.partialorder %v1621_v29, %v5566_v57  ;;  %vm1784_vm10 = vcmp.gt.f32.partialorder %v1621_v29, %v5569_v38  ;;  %vm1848_vm13 = vcmp.eq.f32.partialorder %v1621_v29, %v5569_v38  ;;  %v7742_v29 = vld [vmem:[#allocation26_spill] sm:$0xff] }
 0x1ac   : > { %vm1973_vm12 = vmor %vm1781_vm1, %vm1909_vm7 }
 0x1ad   : > { %v1626_v59 = vpop.permute.xlu1 %1625  ;;  %v1631_v60 = vpop.permute.xlu0 %1630  ;;  %vm1974_vm11 = vmor %vm1782_vm5, %vm1846_vm2  ;;  %v2169_v62 = vsel %vm1973_vm12, 1, %v7555_v56 }
 0x1ae   : > { %v2170_v32 = vsel %vm1974_vm11, 1, %v7555_v56  ;;  %vm1911_vm6 = vmand %vm1847_vm3, %vm7739_vm9  ;;  %vm1849_vm15 = vcmp.eq.f32.partialorder %v1626_v59, %v5566_v57  ;;  %vm1785_vm7 = vcmp.gt.f32.partialorder %v1626_v59, %v5566_v57  ;;  %vm1786_vm5 = vcmp.gt.f32.partialorder %v1626_v59, %v5569_v38 }
 0x1af   : > { %v2307_v8 = vadd.s32 %v2170_v32, %v2169_v62  ;;  %vm1975_vm1 = vmor %vm1783_vm8, %vm1911_vm6  ;;  %vm1850_vm12 = vcmp.eq.f32.partialorder %v1626_v59, %v5569_v38  ;;  %vm1787_vm4 = vcmp.gt.f32.partialorder %v1631_v60, %v5566_v57  ;;  %vm1788_vm11 = vcmp.gt.f32.partialorder %v1631_v60, %v5569_v38 }
 0x1b0   : > { %vm1976_vm2 = vmor %vm1784_vm10, %vm1848_vm13  ;;  %v2171_v48 = vsel %vm1975_vm1, 1, %v7555_v56  ;;  %vm7741_vm9 = vcmp.lt.s32.totalorder %v7740_v58, %v7736_v13  ;;  %vm1851_vm10 = vcmp.eq.f32.partialorder %v1631_v60, %v5566_v57  ;;  %vm1852_vm3 = vcmp.eq.f32.partialorder %v1631_v60, %v5569_v38 }
 0x1b1   : > { %v1636_v18 = vpop.permute.xlu1 %1635  ;;  %v5594_v22 = vpop.permute.xlu0 %1640  ;;  %v2309_v46 = vshrl.u32 %v2307_v8, 16  ;;  %v2308_v27 = vand.u32 65535, %v2307_v8  ;;  %v2172_v52 = vsel %vm1976_vm2, 1, %v7555_v56  ;;  %vm1913_vm13 = vmand %vm1849_vm15, %vm7741_vm9 }
 0x1b2   : > { %v2320_v26 = vadd.s32 %v2172_v52, %v2171_v48  ;;  %vm1977_vm8 = vmor %vm1785_vm7, %vm1913_vm13  ;;  %vm1789_vm6 = vcmp.gt.f32.partialorder %v1636_v18, %v5566_v57  ;;  %vm1790_vm1 = vcmp.gt.f32.partialorder %v1636_v18, %v5569_v38  ;;  %vm1853_vm15 = vcmp.eq.f32.partialorder %v1636_v18, %v5566_v57 }
 0x1b3   : > { %v2311_v10 = vcvt.s32.f32 %v2309_v46  ;;  %v2310_v1 = vcvt.s32.f32 %v2308_v27  ;;  %vm1978_vm2 = vmor %vm1786_vm5, %vm1850_vm12  ;;  %v2173_v9 = vsel %vm1977_vm8, 1, %v7555_v56  ;;  %vm7743_vm7 = vcmp.lt.s32.totalorder %v7742_v29, %v7736_v13  ;;  %v7744_v29 = vld [vmem:[#allocation19_spill] sm:$0xff] }
 0x1b4   : > { %v2322_v45 = vshrl.u32 %v2320_v26, 16  ;;  %v2321_v19 = vand.u32 65535, %v2320_v26  ;;  %v2174_v30 = vsel %vm1978_vm2, 1, %v7555_v56  ;;  %v2233_v0 = vadd.s32 %v2173_v9, %v2169_v62  ;;  %vm1915_vm9 = vmand %vm1851_vm10, %vm7743_vm7 }
 0x1b5   : > { %2314 = vadd.xlane.f32.xlu0 %v2311_v10  ;;  %2312 = vadd.xlane.f32.xlu1 %v2310_v1  ;;  %v1646_v8 = vpop.permute.xlu1 %1645  ;;  %v5620_v59 = vpop.permute.xlu0 %1650  ;;  %v2270_v46 = vadd.s32 %v2174_v30, %v2170_v32  ;;  %v2333_v27 = vadd.s32 %v2174_v30, %v2173_v9  ;;  %vm1979_vm5 = vmor %vm1787_vm4, %vm1915_vm9  ;;  %vm1854_vm12 = vcmp.eq.f32.partialorder %v1636_v18, %v5569_v38 }
 0x1b6   : > { %v2324_v26 = vcvt.s32.f32 %v2322_v45  ;;  %v2323_v62 = vcvt.s32.f32 %v2321_v19  ;;  %vm1980_vm13 = vmor %vm1788_vm11, %vm1852_vm3  ;;  %v2175_v10 = vsel %vm1979_vm5, 1, %v7555_v56  ;;  %vm1791_vm10 = vcmp.gt.f32.partialorder %v5594_v22, %v5566_v57 }
 0x1b7   : > { %v2335_v1 = vshrl.u32 %v2333_v27, 16  ;;  %v2334_v32 = vand.u32 65535, %v2333_v27  ;;  %v2176_v9 = vsel %vm1980_vm13, 1, %v7555_v56  ;;  %v2234_v30 = vadd.s32 %v2175_v10, %v2171_v48 }
 0x1b8   : > { %vm7745_vm4 = vcmp.lt.s32.totalorder %v7744_v29, %v7736_v13  ;;  %v5638_v45 = vadd.s32 %v2176_v9, %v2172_v52  ;;  %v2346_v60 = vadd.s32 %v2176_v9, %v2175_v10  ;;  %vm1792_vm3 = vcmp.gt.f32.partialorder %v5594_v22, %v5569_v38  ;;  %v7746_v9 = vld [vmem:[#allocation29_spill] sm:$0xff] }
 0x1b9   : > { %vm1917_vm8 = vmand %vm1853_vm15, %vm7745_vm4  ;;  %vm1855_vm2 = vcmp.eq.f32.partialorder %v5594_v22, %v5566_v57  ;;  %2327 = vadd.xlane.f32.xlu1 %v2324_v26  ;;  %2325 = vadd.xlane.f32.xlu0 %v2323_v62  ;;  %v5646_v48 = vpop.permute.xlu1 %1655  ;;  %v5648_v19 = vpop.permute.xlu0 %1660  ;;  %v2337_v27 = vcvt.s32.f32 %v2335_v1  ;;  %v2336_v29 = vcvt.s32.f32 %v2334_v32  ;;  %vm7747_vm7 = vcmp.lt.s32.totalorder %v7746_v9, %v7736_v13 }
 0x1ba   : > { %vm1981_vm11 = vmor %vm1789_vm6, %vm1917_vm8  ;;  %vm1856_vm6 = vcmp.eq.f32.partialorder %v5594_v22, %v5569_v38  ;;  %v2348_v10 = vshrl.u32 %v2346_v60, 16  ;;  %vm1793_vm5 = vcmp.gt.f32.partialorder %v1646_v8, %v5566_v57  ;;  %v2347_v1 = vand.u32 65535, %v2346_v60  ;;  %v7748_v22 = vld [vmem:[#allocation20_spill] sm:$0xff] }
 0x1bb   : > { %vm1982_vm15 = vmor %vm1790_vm1, %vm1854_vm12  ;;  %v2177_v52 = vsel %vm1981_vm11, 1, %v7555_v56  ;;  %vm1857_vm12 = vcmp.eq.f32.partialorder %v1646_v8, %v5566_v57  ;;  %vm1794_vm4 = vcmp.gt.f32.partialorder %v1646_v8, %v5569_v38  ;;  %vm1858_vm8 = vcmp.eq.f32.partialorder %v1646_v8, %v5569_v38 }
 0x1bc   : > { %v2178_v26 = vsel %vm1982_vm15, 1, %v7555_v56  ;;  %v5658_v62 = vadd.s32 %v2233_v0, %v2177_v52  ;;  %vm1919_vm9 = vmand %vm1855_vm2, %vm7747_vm7  ;;  %vm1795_vm2 = vcmp.gt.f32.partialorder %v5620_v59, %v5566_v57  ;;  %vm1859_vm15 = vcmp.eq.f32.partialorder %v5620_v59, %v5566_v57 }
 0x1bd   : > { %v5664_v32 = vadd.s32 %v2270_v46, %v2178_v26  ;;  %v2359_v18 = vadd.s32 %v2178_v26, %v2177_v52  ;;  %vm1983_vm1 = vmor %vm1791_vm10, %vm1919_vm9  ;;  %2340 = vadd.xlane.f32.xlu1 %v2337_v27  ;;  %2338 = vadd.xlane.f32.xlu0 %v2336_v29  ;;  %v5676_v46 = vpop.permute.xlu1 %1665  ;;  %v5678_v60 = vpop.permute.xlu0 %1670  ;;  %v2350_v52 = vcvt.s32.f32 %v2348_v10  ;;  %vm7749_vm10 = vcmp.lt.s32.totalorder %v7748_v22, %v7736_v13 }
 0x1be   : > { %vm1984_vm13 = vmor %vm1792_vm3, %vm1856_vm6  ;;  %v2179_v0 = vsel %vm1983_vm1, 1, %v7555_v56  ;;  %v2349_v29 = vcvt.s32.f32 %v2347_v1  ;;  %vm1796_vm7 = vcmp.gt.f32.partialorder %v5620_v59, %v5569_v38  ;;  %vm1860_vm9 = vcmp.eq.f32.partialorder %v5620_v59, %v5569_v38 }
 0x1bf   : > { %v2361_v26 = vshrl.u32 %v2359_v18, 16  ;;  %v5681_v9 = vsel %vm1984_vm13, 1, %v7555_v56  ;;  %v5683_v58 = vadd.s32 %v2234_v30, %v2179_v0  ;;  %vm1921_vm11 = vmand %vm1857_vm12, %vm7749_vm10  ;;  %v2360_v2 = vand.u32 65535, %v2359_v18  ;;  %v7750_v18 = vld [vmem:[#allocation30_spill] sm:$0xff] }
 0x1c0   : > { %v2372_v34 = vadd.s32 %v5681_v9, %v2179_v0  ;;  %vm1985_vm3 = vmor %vm1793_vm5, %vm1921_vm11  ;;  %vm7751_vm5 = vcmp.lt.s32.totalorder %v7750_v18, %v7736_v13 }
 0x1c1   : > { %vm1986_vm6 = vmor %vm1794_vm4, %vm1858_vm8  ;;  %v5700_v30 = vsel %vm1985_vm3, 1, %v7555_v56  ;;  %2353 = vadd.xlane.f32.xlu1 %v2350_v52  ;;  %2351 = vadd.xlane.f32.xlu0 %v2349_v29  ;;  %v5712_v8 = vpop.permute.xlu1 %1675  ;;  %v1681_v1 = vpop.permute.xlu0 %1680  ;;  %v2363_v3 = vcvt.s32.f32 %v2361_v26  ;;  %v2362_v25 = vcvt.s32.f32 %v2360_v2 }
 0x1c2   : > { %v2374_v27 = vshrl.u32 %v2372_v34, 16  ;;  %v5707_v10 = vsel %vm1986_vm6, 1, %v7555_v56  ;;  %vm1923_vm1 = vmand %vm1859_vm15, %vm7751_vm5  ;;  %v2373_v0 = vand.u32 65535, %v2372_v34  ;;  %vm1807_vm4 = vcmp.gt.f32.partialorder %v1681_v1, %v5566_v57  ;;  %v7754_v34 = vld [vmem:[#allocation15_spill] sm:$0xff] }
 0x1c3   : > { %v2385_v22 = vadd.s32 %v5707_v10, %v5700_v30  ;;  %vm5719_vm12 = vmor %vm1795_vm2, %vm1923_vm1  ;;  %vm1808_vm8 = vcmp.gt.f32.partialorder %v1681_v1, %v5569_v38  ;;  %vm1871_vm10 = vcmp.eq.f32.partialorder %v1681_v1, %v5566_v57  ;;  %vm1872_vm11 = vcmp.eq.f32.partialorder %v1681_v1, %v5569_v38 }
 0x1c4   : > { %vm1988_vm13 = vmor %vm1796_vm7, %vm1860_vm9  ;;  %vm7755_vm3 = vcmp.lt.s32.totalorder %v7754_v34, %v7736_v13  ;;  %v2376_v59 = vcvt.s32.f32 %v2374_v27  ;;  %v2375_v2 = vcvt.s32.f32 %v2373_v0  ;;  %v5733_v18 = vsel %vm5719_vm12, 1, %v7555_v56 }
 0x1c5   : > { %vm1935_vm15 = vmand %vm1871_vm10, %vm7755_vm3  ;;  %2366 = vadd.xlane.f32.xlu1 %v2363_v3  ;;  %2364 = vadd.xlane.f32.xlu0 %v2362_v25  ;;  %v1686_v52 = vpop.permute.xlu1 %1685  ;;  %v1691_v26 = vpop.permute.xlu0 %1690  ;;  %v2387_v29 = vshrl.u32 %v2385_v22, 16  ;;  %v5736_v40 = vsel %vm1988_vm13, 1, %v7555_v56  ;;  %vm7757_vm12 = vcmp.lt.s32.totalorder %v7756_v7, %v7736_v13  ;;  %v2386_v27 = vand.u32 65535, %v2385_v22 }
 0x1c6   : > { %vm1999_vm2 = vmor %vm1807_vm4, %vm1935_vm15  ;;  %vm1809_vm7 = vcmp.gt.f32.partialorder %v1686_v52, %v5566_v57  ;;  %vm1810_vm9 = vcmp.gt.f32.partialorder %v1686_v52, %v5569_v38  ;;  %vm1873_vm5 = vcmp.eq.f32.partialorder %v1686_v52, %v5566_v57  ;;  %vm1874_vm1 = vcmp.eq.f32.partialorder %v1686_v52, %v5569_v38 }
 0x1c7   : > { %vm2000_vm6 = vmor %vm1808_vm8, %vm1872_vm11  ;;  %v5739_v1 = vsel %vm1999_vm2, 1, %v7555_v56  ;;  %vm1811_vm8 = vcmp.gt.f32.partialorder %v1691_v26, %v5566_v57  ;;  %vm1875_vm10 = vcmp.eq.f32.partialorder %v1691_v26, %v5566_v57  ;;  %vm1861_vm11 = vcmp.eq.f32.partialorder %v5646_v48, %v5566_v57 }
 0x1c8   : > { %v5745_v25 = vsel %vm2000_vm6, 1, %v7555_v56  ;;  %v2237_v3 = vadd.s32 %v5658_v62, %v5739_v1  ;;  %vm1937_vm13 = vmand %vm1873_vm5, %vm7757_vm12  ;;  %vm1812_vm15 = vcmp.gt.f32.partialorder %v1691_v26, %v5569_v38  ;;  %vm1876_vm2 = vcmp.eq.f32.partialorder %v1691_v26, %v5569_v38 }
 0x1c9   : > { %v2273_v0 = vadd.s32 %v5638_v45, %v5745_v25  ;;  %vm2001_vm4 = vmor %vm1809_vm7, %vm1937_vm13  ;;  %2379 = vadd.xlane.f32.xlu1 %v2376_v59  ;;  %2377 = vadd.xlane.f32.xlu0 %v2375_v2  ;;  %v2398_v52 = vadd.s32 %v5736_v40, %v5733_v18  ;;  %vm7759_vm6 = vcmp.lt.s32.totalorder %v7758_v4, %v7736_v13  ;;  %v2389_v63 = vcvt.s32.f32 %v2387_v29 }
 0x1ca   : > { %vm2002_vm3 = vmor %vm1810_vm9, %vm1874_vm1  ;;  %v5760_v62 = vsel %vm2001_vm4, 1, %v7555_v56 }
 0x1cb   : > { %v1696_v22 = vpop.permute.xlu1 %1695  ;;  %v1701_v45 = vpop.permute.xlu0 %1700  ;;  %v2274_v7 = vadd.s32 %v2273_v0, %v5664_v32  ;;  %v2239_v34 = vadd.s32 %v2237_v3, %v5760_v62  ;;  %v5769_v24 = vsel %vm2002_vm3, 1, %v7555_v56  ;;  %vm1939_vm7 = vmand %vm1875_vm10, %vm7759_vm6  ;;  %v2388_v32 = vcvt.s32.f32 %v2386_v27  ;;  %v7760_v27 = vld [vmem:[#allocation28_spill] sm:$0xff] }
 0x1cc   : > { %vm2003_vm9 = vmor %vm1811_vm8, %vm1939_vm7  ;;  %vm1813_vm5 = vcmp.gt.f32.partialorder %v1696_v22, %v5566_v57  ;;  %vm1814_vm1 = vcmp.gt.f32.partialorder %v1696_v22, %v5569_v38  ;;  %vm1878_vm12 = vcmp.eq.f32.partialorder %v1696_v22, %v5569_v38  ;;  %vm1815_vm4 = vcmp.gt.f32.partialorder %v1701_v45, %v5566_v57 }
 0x1cd   : > { %v2275_v59 = vadd.s32 %v2274_v7, %v5769_v24  ;;  %vm2004_vm13 = vmor %vm1812_vm15, %vm1876_vm2  ;;  %v5785_v2 = vsel %vm2003_vm9, 1, %v7555_v56  ;;  %vm1880_vm8 = vcmp.eq.f32.partialorder %v1701_v45, %v5569_v38  ;;  %vm7761_vm10 = vcmp.lt.s32.totalorder %v7760_v27, %v4517_v43  ;;  %2392 = vadd.xlane.f32.xlu1 %v2389_v63  ;;  %2390 = vadd.xlane.f32.xlu0 %v2388_v32  ;;  %v7762_v27 = vld [vmem:[#allocation22_spill] sm:$0xff] }
 0x1ce   : > { %v2241_v29 = vadd.s32 %v2239_v34, %v5785_v2  ;;  %v5791_v3 = vsel %vm2004_vm13, 1, %v7555_v56  ;;  %vm1942_vm3 = vmand %vm1878_vm12, %vm7761_vm10  ;;  %vm1816_vm6 = vcmp.gt.f32.partialorder %v1701_v45, %v5569_v38  ;;  %v2400_v0 = vshrl.u32 %v2398_v52, 16 }
 0x1cf   : > { %v1706_v26 = vpop.permute.xlu1 %1705  ;;  %v1711_v7 = vpop.permute.xlu0 %1710  ;;  %v2276_v4 = vadd.s32 %v2275_v59, %v5791_v3  ;;  %vm2006_vm15 = vmor %vm1814_vm1, %vm1942_vm3  ;;  %v5803_v34 = vsel %vm1813_vm5, 1, %v7555_v56  ;;  %vm7763_vm7 = vcmp.lt.s32.totalorder %v7762_v27, %v7736_v13  ;;  %vm7766_vm5 = vcmp.lt.s32.totalorder %v4709_v21, %v4517_v43 }
 0x1d0   : > { %vm1882_vm2 = vcmp.eq.f32.partialorder %v1706_v26, %v5569_v38  ;;  %vm5812_vm9 = vmand %vm1861_vm11, %vm7763_vm7  ;;  %v2244_v32 = vadd.s32 %v2241_v29, %v5803_v34  ;;  %v5818_v59 = vsel %vm2006_vm15, 1, %v7555_v56  ;;  %vm1818_vm12 = vcmp.gt.f32.partialorder %v1706_v26, %v5569_v38 }
 0x1d1   : > { %vm1944_vm1 = vmand %vm1880_vm8, %vm7766_vm5  ;;  %vm1797_vm13 = vcmp.gt.f32.partialorder %v5646_v48, %v5566_v57  ;;  %v2277_v22 = vadd.s32 %v2276_v4, %v5681_v9  ;;  %v5838_v21 = vsel %vm1815_vm4, 1, %v7555_v56  ;;  %vm1817_vm8 = vcmp.gt.f32.partialorder %v1706_v26, %v5566_v57 }
 0x1d2   : > { %vm5831_vm11 = vmor %vm1816_vm6, %vm1944_vm1  ;;  %vm1884_vm10 = vcmp.eq.f32.partialorder %v1711_v7, %v5569_v38  ;;  %v2246_v27 = vadd.s32 %v2244_v32, %v5838_v21  ;;  %vm7769_vm3 = vcmp.lt.s32.totalorder %v4770_v53, %v4517_v43  ;;  %vm1820_vm6 = vcmp.gt.f32.partialorder %v1711_v7, %v5569_v38 }
 0x1d3   : > { %vm1946_vm15 = vmand %vm1882_vm2, %vm7769_vm3  ;;  %v2402_v4 = vcvt.s32.f32 %v2400_v0  ;;  %v5849_v9 = vadd.s32 %v5683_v58, %v5733_v18  ;;  %v1716_v45 = vpop.permute.xlu1 %1715  ;;  %v1721_v37 = vpop.permute.xlu0 %1720  ;;  %v2278_v5 = vadd.s32 %v2277_v22, %v5818_v59  ;;  %vm1819_vm7 = vcmp.gt.f32.partialorder %v1711_v7, %v5566_v57 }
 0x1d4   : > { %vm5854_vm4 = vmor %vm1818_vm12, %vm1946_vm15  ;;  %v2399_v32 = vand.u32 65535, %v2398_v52  ;;  %v5864_v58 = vsel %vm5831_vm11, 1, %v7555_v56  ;;  %v2248_v18 = vadd.s32 %v2246_v27, %v5700_v30  ;;  %vm7772_vm5 = vcmp.lt.s32.totalorder %v4773_v20, %v4517_v43 }
 0x1d5   : > { %vm1948_vm1 = vmand %vm1884_vm10, %vm7772_vm5  ;;  %2405 = vadd.xlane.f32.xlu1 %v2402_v4  ;;  %vm1822_vm12 = vcmp.gt.f32.partialorder %v1716_v45, %v5569_v38  ;;  %vm1886_vm3 = vcmp.eq.f32.partialorder %v1716_v45, %v5569_v38  ;;  %v2279_v52 = vadd.s32 %v2278_v5, %v5864_v58  ;;  %v5878_v0 = vsel %vm1817_vm8, 1, %v7555_v56 }
 0x1d6   : > { %vm5882_vm11 = vmor %vm1820_vm6, %vm1948_vm1  ;;  %v2401_v27 = vcvt.s32.f32 %v2399_v32  ;;  %vm1821_vm10 = vcmp.gt.f32.partialorder %v1716_v45, %v5566_v57  ;;  %v2250_v22 = vadd.s32 %v2248_v18, %v5878_v0  ;;  %vm7775_vm15 = vcmp.lt.s32.totalorder %v4807_v39, %v4517_v43 }
 0x1d7   : > { %vm1950_vm5 = vmand %vm1886_vm3, %vm7775_vm15  ;;  %vm1824_vm0 = vcmp.gt.f32.partialorder %v1721_v37, %v5569_v38  ;;  %vm1888_vm8 = vcmp.eq.f32.partialorder %v1721_v37, %v5569_v38  ;;  %vm1862_vm2 = vcmp.eq.f32.partialorder %v5646_v48, %v5569_v38  ;;  %v1726_v5 = vpop.permute.xlu1 %1725  ;;  %v1731_v26 = vpop.permute.xlu0 %1730  ;;  %v2281_v29 = vadd.s32 %v2279_v52, %v5707_v10 }
 0x1d8   : > { %v5899_v4 = vsel %vm1819_vm7, 1, %v7555_v56  ;;  %2403 = vadd.xlane.f32.xlu0 %v2401_v27  ;;  %vm2014_vm6 = vmor %vm1822_vm12, %vm1950_vm5  ;;  %vm1823_vm1 = vcmp.gt.f32.partialorder %v1721_v37, %v5566_v57  ;;  %vm1799_vm3 = vcmp.gt.f32.partialorder %v5648_v19, %v5566_v57  ;;  %v5909_v32 = vsel %vm5854_vm4, 1, %v7555_v56 }
 0x1d9   : > { %v2243_v10 = vadd.s32 %v2250_v22, %v5899_v4  ;;  %v5915_v7 = vsel %vm1821_vm10, 1, %v7555_v56  ;;  %vm7776_vm7 = vcmp.lt.s32.totalorder %v4849_v31, %v4517_v43  ;;  %vm1825_vm15 = vcmp.gt.f32.partialorder %v1726_v5, %v5566_v57 }
 0x1da   : > { %vm1952_vm12 = vmand %vm1888_vm8, %vm7776_vm7  ;;  %v2283_v18 = vadd.s32 %v2281_v29, %v5909_v32  ;;  %v5925_v28 = vsel %vm5882_vm11, 1, %v7555_v56  ;;  %vm1890_vm10 = vcmp.eq.f32.partialorder %v1726_v5, %v5569_v38  ;;  %vm1827_vm5 = vcmp.gt.f32.partialorder %v1731_v26, %v5566_v57 }
 0x1db   : > { %vm5929_vm4 = vmor %vm1824_vm0, %vm1952_vm12  ;;  %v2245_v45 = vadd.s32 %v2243_v10, %v5915_v7  ;;  %v5937_v27 = vsel %vm2014_vm6, 1, %v7555_v56  ;;  %v5940_v22 = vsel %vm1823_vm1, 1, %v7555_v56  ;;  %vm1826_vm11 = vcmp.gt.f32.partialorder %v1726_v5, %v5569_v38  ;;  %v1736_v37 = vpop.permute.xlu1 %1735  ;;  %v1741_v5 = vpop.permute.xlu0 %1740 }
 0x1dc   : > { %vm1989_vm0 = vmor %vm1797_vm13, %vm5812_vm9  ;;  %v2285_v30 = vadd.s32 %v2283_v18, %v5925_v28  ;;  %vm7779_vm8 = vcmp.gt.f32.partialorder %v5646_v48, %v5569_v38  ;;  %v5957_v63 = vsel %vm1825_vm15, 1, %v7555_v56  ;;  %vm1892_vm1 = vcmp.eq.f32.partialorder %v1731_v26, %v5569_v38 }
 0x1dd   : > { %vm1990_vm6 = vmor %vm7779_vm8, %vm1862_vm2  ;;  %v2185_v29 = vsel %vm1989_vm0, 1, %v7555_v56  ;;  %v2247_v10 = vadd.s32 %v2245_v45, %v5940_v22  ;;  %vm7780_vm9 = vcmp.lt.s32.totalorder %v4883_v15, %v4517_v43  ;;  %vm1828_vm7 = vcmp.gt.f32.partialorder %v1731_v26, %v5569_v38 }
 0x1de   : > { %v2186_v31 = vsel %vm1990_vm6, 1, %v7555_v56  ;;  %vm1954_vm13 = vmand %vm1890_vm10, %vm7780_vm9  ;;  %v5971_v48 = vsel %vm1827_vm5, 1, %v7555_v56  ;;  %v2287_v18 = vadd.s32 %v2285_v30, %v5736_v40  ;;  %vm1863_vm12 = vcmp.eq.f32.partialorder %v5648_v19, %v5566_v57 }
 0x1df   : > { %v2411_v39 = vadd.s32 %v2186_v31, %v2185_v29  ;;  %vm5974_vm2 = vmor %vm1826_vm11, %vm1954_vm13  ;;  %vm1829_vm15 = vcmp.gt.f32.partialorder %v1736_v37, %v5566_v57  ;;  %v5984_v15 = vsel %vm5929_vm4, 1, %v7555_v56  ;;  %v2249_v20 = vadd.s32 %v2247_v10, %v2185_v29  ;;  %v7786_v10 = vld [vmem:[#allocation31_spill] sm:$0xff]  ;;  %v1746_v45 = vpop.permute.xlu1 %1745 }
 0x1e0   : > { %vm7783_vm10 = vcmp.lt.s32.totalorder %v4904_v16, %v4517_v43  ;;  %vm1800_vm0 = vcmp.gt.f32.partialorder %v5648_v19, %v5569_v38  ;;  %vm1864_vm11 = vcmp.eq.f32.partialorder %v5648_v19, %v5569_v38  ;;  %v2289_v40 = vadd.s32 %v2287_v18, %v5937_v27 }
 0x1e1   : > { %vm1956_vm5 = vmand %vm1892_vm1, %vm7783_vm10  ;;  %v2413_v30 = vshrl.u32 %v2411_v39, 16  ;;  %v2412_v53 = vand.u32 65535, %v2411_v39  ;;  %vm1830_vm4 = vcmp.gt.f32.partialorder %v1736_v37, %v5569_v38  ;;  %v2251_v29 = vadd.s32 %v2249_v20, %v5957_v63 }
 0x1e2   : > { %vm5996_vm8 = vmor %vm1828_vm7, %vm1956_vm5  ;;  %vm7787_vm6 = vcmp.lt.s32.totalorder %v7786_v10, %v7736_v13  ;;  %vm1894_vm9 = vcmp.eq.f32.partialorder %v1736_v37, %v5569_v38  ;;  %v6007_v18 = vsel %vm1829_vm15, 1, %v7555_v56  ;;  %vm1831_vm13 = vcmp.gt.f32.partialorder %v1741_v5, %v5566_v57 }
 0x1e3   : > { %vm1927_vm1 = vmand %vm1863_vm12, %vm7787_vm6  ;;  %v2280_v39 = vadd.s32 %v2289_v40, %v5984_v15  ;;  %v2415_v26 = vcvt.s32.f32 %v2413_v30  ;;  %v2414_v16 = vcvt.s32.f32 %v2412_v53  ;;  %v6014_v23 = vsel %vm5974_vm2, 1, %v7555_v56 }
 0x1e4   : > { %vm1991_vm7 = vmor %vm1799_vm3, %vm1927_vm1  ;;  %v2253_v20 = vadd.s32 %v2251_v29, %v5971_v48  ;;  %vm1832_vm15 = vcmp.gt.f32.partialorder %v1741_v5, %v5569_v38  ;;  %vm1896_vm2 = vcmp.eq.f32.partialorder %v1741_v5, %v5569_v38  ;;  %vm7788_vm3 = vcmp.lt.s32.totalorder %v4946_v51, %v4517_v43  ;;  %v7794_v51 = vld [vmem:[#allocation23_spill] sm:$0xff] }
 0x1e5   : > { %vm1992_vm12 = vmor %vm1800_vm0, %vm1864_vm11  ;;  %v2187_v53 = vsel %vm1991_vm7, 1, %v7555_v56  ;;  %v2282_v40 = vadd.s32 %v2280_v39, %v2186_v31  ;;  %2418 = vadd.xlane.f32.xlu1 %v2415_v26  ;;  %2416 = vadd.xlane.f32.xlu0 %v2414_v16  ;;  %v6041_v19 = vsel %vm1831_vm13, 1, %v7555_v56  ;;  %v6046_v31 = vsel %vm5996_vm8, 1, %v7555_v56 }
 0x1e6   : > { %v2188_v30 = vsel %vm1992_vm12, 1, %v7555_v56  ;;  %v6031_v29 = vadd.s32 %v5849_v9, %v2187_v53  ;;  %vm1958_vm10 = vmand %vm1894_vm9, %vm7788_vm3  ;;  %v2255_v39 = vadd.s32 %v2253_v20, %v6007_v18  ;;  %vm1865_vm0 = vcmp.eq.f32.partialorder %v5676_v46, %v5566_v57 }
 0x1e7   : > { %v2424_v16 = vadd.s32 %v2188_v30, %v2187_v53  ;;  %vm6050_vm5 = vmor %vm1830_vm4, %vm1958_vm10  ;;  %v2284_v26 = vadd.s32 %v2282_v40, %v6014_v23  ;;  %vm7791_vm11 = vcmp.lt.s32.totalorder %v4964_v6, %v4517_v43  ;;  %vm1801_vm6 = vcmp.gt.f32.partialorder %v5676_v46, %v5566_v57  ;;  %v1751_v40 = vpop.permute.xlu0 %1750 }
 0x1e8   : > { %vm1960_vm8 = vmand %vm1896_vm2, %vm7791_vm11  ;;  %vm1802_vm4 = vcmp.gt.f32.partialorder %v5676_v46, %v5569_v38  ;;  %vm1833_vm1 = vcmp.gt.f32.partialorder %v1746_v45, %v5566_v57  ;;  %v2257_v53 = vadd.s32 %v2255_v39, %v6041_v19  ;;  %vm1866_vm13 = vcmp.eq.f32.partialorder %v5676_v46, %v5569_v38 }
 0x1e9   : > { %v2426_v37 = vshrl.u32 %v2424_v16, 16  ;;  %v2425_v52 = vand.u32 65535, %v2424_v16  ;;  %vm6070_vm9 = vmor %vm1832_vm15, %vm1960_vm8  ;;  %v2286_v6 = vadd.s32 %v2284_v26, %v6046_v31  ;;  %vm7795_vm7 = vcmp.lt.s32.totalorder %v7794_v51, %v7736_v13  ;;  %v7802_v51 = vld [vmem:[#allocation32_spill] sm:$0xff] }
 0x1ea   : > { %vm1929_vm12 = vmand %vm1865_vm0, %vm7795_vm7  ;;  %vm1898_vm2 = vcmp.eq.f32.partialorder %v1746_v45, %v5569_v38  ;;  %vm1834_vm3 = vcmp.gt.f32.partialorder %v1746_v45, %v5569_v38  ;;  %v6088_v39 = vsel %vm1833_vm1, 1, %v7555_v56  ;;  %vm1835_vm0 = vcmp.gt.f32.partialorder %v1751_v40, %v5566_v57 }
 0x1eb   : > { %v2428_v5 = vcvt.s32.f32 %v2426_v37  ;;  %v2427_v16 = vcvt.s32.f32 %v2425_v52  ;;  %vm1993_vm15 = vmor %vm1801_vm6, %vm1929_vm12  ;;  %v2288_v14 = vadd.s32 %v2286_v6, %v2188_v30  ;;  %vm1900_vm11 = vcmp.eq.f32.partialorder %v1751_v40, %v5569_v38 }
 0x1ec   : > { %vm1994_vm10 = vmor %vm1802_vm4, %vm1866_vm13  ;;  %v2189_v26 = vsel %vm1993_vm15, 1, %v7555_v56  ;;  %v6099_v37 = vsel %vm6050_vm5, 1, %v7555_v56  ;;  %vm7796_vm8 = vcmp.lt.s32.totalorder %v5055_v33, %v4517_v43  ;;  %vm1836_vm4 = vcmp.gt.f32.partialorder %v1751_v40, %v5569_v38 }
 0x1ed   : > { %2431 = vadd.xlane.f32.xlu1 %v2428_v5  ;;  %2429 = vadd.xlane.f32.xlu0 %v2427_v16  ;;  %v2259_v52 = vadd.s32 %v2257_v53, %v2189_v26  ;;  %v2190_v6 = vsel %vm1994_vm10, 1, %v7555_v56  ;;  %vm1962_vm6 = vmand %vm1898_vm2, %vm7796_vm8  ;;  %v2290_v46 = vadd.s32 %v2288_v14, %v6099_v37  ;;  %v6112_v30 = vsel %vm6070_vm9, 1, %v7555_v56  ;;  %v1756_v5 = vpop.permute.xlu1 %1755 }
 0x1ee   : > { %v2437_v9 = vadd.s32 %v2190_v6, %v2189_v26  ;;  %vm6116_vm5 = vmor %vm1834_vm3, %vm1962_vm6  ;;  %vm1867_vm1 = vcmp.eq.f32.partialorder %v5678_v60, %v5566_v57  ;;  %vm7799_vm13 = vcmp.lt.s32.totalorder %v5063_v42, %v4517_v43  ;;  %v6131_v45 = vsel %vm1835_vm0, 1, %v7555_v56  ;;  %v1761_v42 = vpop.permute.xlu0 %1760 }
 0x1ef   : > { %v2261_v16 = vadd.s32 %v2259_v52, %v6088_v39  ;;  %vm1964_vm9 = vmand %vm1900_vm11, %vm7799_vm13  ;;  %vm1803_vm7 = vcmp.gt.f32.partialorder %v5678_v60, %v5566_v57  ;;  %vm1804_vm12 = vcmp.gt.f32.partialorder %v5678_v60, %v5569_v38  ;;  %v2292_v20 = vadd.s32 %v2290_v46, %v6112_v30  ;;  %v7807_v52 = vld [vmem:[#allocation45_spill] sm:$0xff] }
 0x1f0   : > { %v2439_v14 = vshrl.u32 %v2437_v9, 16  ;;  %v2438_v26 = vand.u32 65535, %v2437_v9  ;;  %vm6140_vm2 = vmor %vm1836_vm4, %vm1964_vm9  ;;  %vm1868_vm15 = vcmp.eq.f32.partialorder %v5678_v60, %v5569_v38  ;;  %vm1805_vm3 = vcmp.gt.f32.partialorder %v5712_v8, %v5566_v57 }
 0x1f1   : > { %v2252_v33 = vadd.s32 %v2261_v16, %v6131_v45  ;;  %vm7803_vm10 = vcmp.lt.s32.totalorder %v7802_v51, %v7736_v13  ;;  %vm1837_vm11 = vcmp.gt.f32.partialorder %v1756_v5, %v5566_v57  ;;  %vm1902_vm8 = vcmp.eq.f32.partialorder %v1756_v5, %v5569_v38  ;;  %v1766_v60 = vpop.permute.xlu1 %1765 }
 0x1f2   : > { %vm1931_vm0 = vmand %vm1867_vm1, %vm7803_vm10  ;;  %v2294_v40 = vadd.s32 %v2292_v20, %v2190_v6  ;;  %v2441_v46 = vcvt.s32.f32 %v2439_v14  ;;  %v2440_v9 = vcvt.s32.f32 %v2438_v26  ;;  %vm1838_vm4 = vcmp.gt.f32.partialorder %v1756_v5, %v5569_v38  ;;  %v6172_v6 = vpop.eup %3961 }
 0x1f3   : > { %vm1995_vm6 = vmor %vm1803_vm7, %vm1931_vm0  ;;  %v6164_v16 = vsel %vm6116_vm5, 1, %v7555_v56  ;;  %vm1839_vm13 = vcmp.gt.f32.partialorder %v1761_v42, %v5566_v57  ;;  %vm1904_vm9 = vcmp.eq.f32.partialorder %v1761_v42, %v5569_v38  ;;  %vm7804_vm5 = vcmp.lt.s32.totalorder %v5112_v50, %v4517_v43 }
 0x1f4   : > { %vm1996_vm1 = vmor %vm1804_vm12, %vm1868_vm15  ;;  %v2191_v51 = vsel %vm1995_vm6, 1, %v7555_v56  ;;  %2444 = vadd.xlane.f32.xlu1 %v2441_v46  ;;  %2442 = vadd.xlane.f32.xlu0 %v2440_v9  ;;  %v2296_v20 = vadd.s32 %v2294_v40, %v6164_v16  ;;  %vm1840_vm12 = vcmp.gt.f32.partialorder %v1761_v42, %v5569_v38  ;;  %vm1806_vm15 = vcmp.gt.f32.partialorder %v5712_v8, %v5569_v38 }
 0x1f5   : > { %v2192_v53 = vsel %vm1996_vm1, 1, %v7555_v56  ;;  %v2242_v14 = vadd.s32 %v6031_v29, %v2191_v51  ;;  %vm1966_vm7 = vmand %vm1902_vm8, %vm7804_vm5  ;;  %vm1869_vm10 = vcmp.eq.f32.partialorder %v5712_v8, %v5566_v57  ;;  %v6190_v26 = vsel %vm6140_vm2, 1, %v7555_v56 }
 0x1f6   : > { %v2450_v29 = vadd.s32 %v2192_v53, %v2191_v51  ;;  %vm6194_vm0 = vmor %vm1838_vm4, %vm1966_vm7  ;;  %vm1870_vm8 = vcmp.eq.f32.partialorder %v5712_v8, %v5569_v38  ;;  %v2298_v46 = vadd.s32 %v2296_v20, %v6190_v26  ;;  %v6204_v50 = vsel %vm1837_vm11, 1, %v7555_v56  ;;  %v1771_v51 = vpop.permute.xlu0 %1770 }
 0x1f7   : > { %v2254_v9 = vadd.s32 %v2252_v33, %v2242_v14  ;;  %vm7808_vm2 = vcmp.lt.s32.totalorder %v7807_v52, %v4517_v43  ;;  %v6220_v33 = vsel %vm1839_vm13, 1, %v7555_v56  ;;  %vm1841_vm11 = vcmp.gt.f32.partialorder %v1766_v60, %v5566_v57  ;;  %v7811_v14 = vld [vmem:[#allocation21_spill] sm:$0xff] }
 0x1f8   : > { %vm1968_vm6 = vmand %vm1904_vm9, %vm7808_vm2  ;;  %v2452_v10 = vshrl.u32 %v2450_v29, 16  ;;  %v2451_v12 = vand.u32 65535, %v2450_v29  ;;  %v2291_v5 = vadd.s32 %v2298_v46, %v2192_v53  ;;  %vm7812_vm1 = vcmp.lt.s32.totalorder %v7811_v14, %v7736_v13 }
 0x1f9   : > { %vm6213_vm4 = vmor %vm1840_vm12, %vm1968_vm6  ;;  %v2256_v20 = vadd.s32 %v2254_v9, %v6204_v50  ;;  %vm1842_vm5 = vcmp.gt.f32.partialorder %v1766_v60, %v5569_v38  ;;  %vm1906_vm7 = vcmp.eq.f32.partialorder %v1766_v60, %v5569_v38  ;;  %v6235_v52 = vsel %vm6194_vm0, 1, %v7555_v56  ;;  %v7813_v9 = vld [vmem:[#allocation46_spill] sm:$0xff] }
 0x1fa   : > { %vm1933_vm9 = vmand %vm1869_vm10, %vm7812_vm1  ;;  %v2454_v29 = vcvt.s32.f32 %v2452_v10  ;;  %v2453_v42 = vcvt.s32.f32 %v2451_v12  ;;  %vm1843_vm12 = vcmp.gt.f32.partialorder %v1771_v51, %v5566_v57  ;;  %v2293_v53 = vadd.s32 %v2291_v5, %v6235_v52 }
 0x1fb   : > { %vm1997_vm13 = vmor %vm1805_vm3, %vm1933_vm9  ;;  %v2258_v46 = vadd.s32 %v2256_v20, %v6220_v33  ;;  %vm1908_vm0 = vcmp.eq.f32.partialorder %v1771_v51, %v5569_v38  ;;  %v6254_v10 = vsel %vm6213_vm4, 1, %v7555_v56  ;;  %vm7814_vm3 = vcmp.lt.s32.totalorder %v7813_v9, %v4517_v43 }
 0x1fc   : > { %vm1998_vm10 = vmor %vm1806_vm15, %vm1870_vm8  ;;  %v2193_v12 = vsel %vm1997_vm13, 1, %v7555_v56  ;;  %2457 = vadd.xlane.f32.xlu1 %v2454_v29  ;;  %2455 = vadd.xlane.f32.xlu0 %v2453_v42  ;;  %vm1844_vm15 = vcmp.gt.f32.partialorder %v1771_v51, %v5569_v38  ;;  %v2476_v8 = vadd.s32 %v5745_v25, %v5739_v1  ;;  %v2295_v5 = vadd.s32 %v2293_v53, %v6254_v10  ;;  %v7815_v42 = vld [vmem:[#allocation47_spill] sm:$0xff] }
 0x1fd   : > { %v2194_v40 = vsel %vm1998_vm10, 1, %v7555_v56  ;;  %vm1970_vm2 = vmand %vm1906_vm7, %vm7814_vm3  ;;  %v2260_v20 = vadd.s32 %v2258_v46, %v2193_v12  ;;  %v6271_v11 = vsel %vm1841_vm11, 1, %v7555_v56  ;;  %vm7816_vm6 = vcmp.lt.s32.totalorder %v7815_v42, %v4517_v43 }
 0x1fe   : > { %v2463_v29 = vadd.s32 %v2194_v40, %v2193_v12  ;;  %vm2034_vm8 = vmor %vm1842_vm5, %vm1970_vm2  ;;  %v6279_v1 = vsel %vm1843_vm12, 1, %v7555_v56  ;;  %v2297_v25 = vadd.s32 %v2295_v5, %v2194_v40  ;;  %v2478_v12 = vshrl.u32 %v2476_v8, 16 }
 0x1ff   : > { %vm1972_vm4 = vmand %vm1908_vm0, %vm7816_vm6  ;;  %v2262_v38 = vadd.s32 %v2260_v20, %v6271_v11  ;;  %v6283_v60 = vsel %vm2034_vm8, 1, %v7555_v56  ;;  %v2477_v9 = vand.u32 65535, %v2476_v8  ;;  %v2489_v42 = vadd.s32 %v5769_v24, %v5760_v62 }
 0x200   : > { %v2465_v53 = vshrl.u32 %v2463_v29, 16  ;;  %v2464_v46 = vand.u32 65535, %v2463_v29  ;;  %vm2036_vm1 = vmor %vm1844_vm15, %vm1972_vm4  ;;  %v2299_v57 = vadd.s32 %v2297_v25, %v6283_v60  ;;  %v2480_v8 = vcvt.s32.f32 %v2478_v12 }
 0x201   : > { %v2263_v51 = vadd.s32 %v2262_v38, %v6279_v1  ;;  %v6290_v40 = vsel %vm2036_vm1, 1, %v7555_v56  ;;  %v2491_v24 = vshrl.u32 %v2489_v42, 16  ;;  %v2502_v62 = vadd.s32 %v5791_v3, %v5785_v2 }
 0x202   : > { %v2467_v43 = vcvt.s32.f32 %v2465_v53  ;;  %v2466_v14 = vcvt.s32.f32 %v2464_v46  ;;  %v2300_v5 = vadd.s32 %v2299_v57, %v6290_v40  ;;  %v2479_v53 = vcvt.s32.f32 %v2477_v9 }
 0x203   : > { %v2264_v20 = vrot.slane %v2263_v51, 4  ;;  %v2490_v46 = vand.u32 65535, %v2489_v42  ;;  %v2824_v38 = vmul.f32 0.6931472, %v6172_v6  ;;  %v2493_v57 = vcvt.s32.f32 %v2491_v24 }
 0x204   : > { %2470 = vadd.xlane.f32.xlu1 %v2467_v43  ;;  %2468 = vadd.xlane.f32.xlu0 %v2466_v14  ;;  %v2301_v25 = vrot.slane %v2300_v5, 4  ;;  %v2825_v43 = vld [vmem:[%s365_s29] sm:$0x3]  ;;  %v2504_v13 = vshrl.u32 %v2502_v62, 16  ;;  %v2515_v12 = vadd.s32 %v5818_v59, %v5803_v34  ;;  %v2503_v2 = vand.u32 65535, %v2502_v62 }
 0x205   : > { %v2265_v29 = vadd.s32 %v2264_v20, %v2263_v51  ;;  %v2492_v61 = vcvt.s32.f32 %v2490_v46  ;;  %v2826_v3 = vadd.f32 %v2825_v43, %v2824_v38  ;;  %v2567_v43 = vadd.s32 %v5937_v27, %v5915_v7 }
 0x206   : > { %v2302_v56 = vadd.s32 %v2301_v25, %v2300_v5  ;;  %v2506_v6 = vcvt.s32.f32 %v2504_v13  ;;  %v2517_v42 = vshrl.u32 %v2515_v12, 16  ;;  %v2516_v20 = vand.u32 65535, %v2515_v12 }
 0x207   : > { %v2266_v14 = vrot.slane %v2265_v29, 2  ;;  %v2505_v24 = vcvt.s32.f32 %v2503_v2  ;;  %v2528_v25 = vadd.s32 %v5864_v58, %v5838_v21  ;;  %v2831_v34 = vrot.slane %v2826_v3, %v7734_v36 }
 0x208   : > { %2483 = vadd.xlane.f32.xlu1 %v2480_v8  ;;  %2481 = vadd.xlane.f32.xlu0 %v2479_v53  ;;  %v2303_v55 = vrot.slane %v2302_v56, 2  ;;  %v2541_v58 = vadd.s32 %v5909_v32, %v5878_v0  ;;  %v2580_v12 = vadd.s32 %v5984_v15, %v5940_v22  ;;  %v2593_v7 = vadd.s32 %v6014_v23, %v5957_v63 }
 0x209   : > { %v2267_v49 = vadd.s32 %v2266_v14, %v2265_v29  ;;  %v2530_v13 = vshrl.u32 %v2528_v25, 16  ;;  %v2529_v21 = vand.u32 65535, %v2528_v25  ;;  %v2606_v27 = vadd.s32 %v6046_v31, %v5971_v48 }
 0x20a   : > { %v2304_v9 = vadd.s32 %v2303_v55, %v2302_v56  ;;  %v2835_v56 = vrot.slane %v2826_v3, %v7735_v35  ;;  %v2554_v35 = vadd.s32 %v5925_v28, %v5899_v4  ;;  %v2543_v46 = vshrl.u32 %v2541_v58, 16 }
 0x20b   : > { %v2268_v51 = vrot.slane %v2267_v49, 1  ;;  %v2532_v29 = vcvt.s32.f32 %v2530_v13  ;;  %v2531_v53 = vcvt.s32.f32 %v2529_v21  ;;  %v2542_v38 = vand.u32 65535, %v2541_v58 }
 0x20c   : > { %2496 = vadd.xlane.f32.xlu1 %v2493_v57  ;;  %2494 = vadd.xlane.f32.xlu0 %v2492_v61  ;;  %v2305_v8 = vrot.slane %v2304_v9, 1  ;;  %v2519_v61 = vcvt.s32.f32 %v2517_v42  ;;  %v2545_v14 = vcvt.s32.f32 %v2543_v46  ;;  %v2556_v32 = vshrl.u32 %v2554_v35, 16 }
 0x20d   : > { %v6302_v5 = vadd.s32 %v2268_v51, %v2267_v49  ;;  %v2518_v49 = vcvt.s32.f32 %v2516_v20  ;;  %v2544_v0 = vcvt.s32.f32 %v2542_v38  ;;  %v2555_v57 = vand.u32 65535, %v2554_v35 }
 0x20e   : > { %v6307_v59 = vadd.s32 %v2305_v8, %v2304_v9  ;;  %v2558_v2 = vcvt.s32.f32 %v2556_v32  ;;  %v2569_v28 = vshrl.u32 %v2567_v43, 16  ;;  %v2568_v3 = vand.u32 65535, %v2567_v43 }
 0x20f   : > { %vm7495_vm11 = vcmp.lt.s32.totalorder %v6302_v5, 51  ;;  %v2557_v4 = vcvt.s32.f32 %v2555_v57  ;;  %v2582_v51 = vshrl.u32 %v2580_v12, 16  ;;  %v2581_v42 = vand.u32 65535, %v2580_v12 }
 0x210   : > { %2509 = vadd.xlane.f32.xlu1 %v2506_v6  ;;  %2507 = vadd.xlane.f32.xlu0 %v2505_v24  ;;  %v6313_v55 = vsel %vm7495_vm11, %v2831_v34, -1e+30  ;;  %vm7494_vm9 = vcmp.lt.s32.totalorder %v6307_v59, 51  ;;  %v2571_v9 = vcvt.s32.f32 %v2569_v28  ;;  %v2570_v6 = vcvt.s32.f32 %v2568_v3 }
 0x211   : > { %v6320_v62 = vsel %vm7494_vm9, %v2835_v56, -1e+30  ;;  %v2584_v20 = vcvt.s32.f32 %v2582_v51  ;;  %v2583_v15 = vcvt.s32.f32 %v2581_v42  ;;  %v2595_v22 = vshrl.u32 %v2593_v7, 16 }
 0x212   : > { %v2594_v8 = vand.u32 65535, %v2593_v7  ;;  %v2608_v24 = vshrl.u32 %v2606_v27, 16  ;;  %v2607_v25 = vand.u32 65535, %v2606_v27  ;;  %v2632_v23 = vadd.s32 %v6112_v30, %v6041_v19 }
 0x213   : > { %v2597_v34 = vcvt.s32.f32 %v2595_v22  ;;  %v2671_v38 = vadd.s32 %v6235_v52, %v6204_v50  ;;  %v2697_v57 = vadd.s32 %v6283_v60, %v6271_v11  ;;  %v2710_v50 = vadd.s32 %v6290_v40, %v6279_v1 }
 0x214   : > { %2522 = vadd.xlane.f32.xlu1 %v2519_v61  ;;  %2520 = vadd.xlane.f32.xlu0 %v2518_v49  ;;  %v2596_v56 = vcvt.s32.f32 %v2594_v8  ;;  %v2619_v61 = vadd.s32 %v6099_v37, %v6007_v18  ;;  %v2610_v63 = vcvt.s32.f32 %v2608_v24  ;;  %v2609_v48 = vcvt.s32.f32 %v2607_v25 }
 0x215   : > { %v2634_v49 = vshrl.u32 %v2632_v23, 16  ;;  %v2633_v21 = vand.u32 65535, %v2632_v23  ;;  %v2658_v18 = vadd.s32 %v6190_v26, %v6131_v45  ;;  %v2673_v26 = vshrl.u32 %v2671_v38, 16 }
 0x216   : > { %v2621_v31 = vshrl.u32 %v2619_v61, 16  ;;  %v2620_v13 = vand.u32 65535, %v2619_v61  ;;  %v2699_v28 = vshrl.u32 %v2697_v57, 16  ;;  %v2712_v3 = vshrl.u32 %v2710_v50, 16 }
 0x217   : > { %v2636_v35 = vcvt.s32.f32 %v2634_v49  ;;  %v2635_v37 = vcvt.s32.f32 %v2633_v21  ;;  %v2675_v52 = vcvt.s32.f32 %v2673_v26  ;;  %v2698_v11 = vand.u32 65535, %v2697_v57 }
 0x218   : > { %2535 = vadd.xlane.f32.xlu1 %v2532_v29  ;;  %2533 = vadd.xlane.f32.xlu0 %v2531_v53  ;;  %v2623_v58 = vcvt.s32.f32 %v2621_v31  ;;  %v2645_v29 = vadd.s32 %v6164_v16, %v6088_v39  ;;  %v2622_v19 = vcvt.s32.f32 %v2620_v13  ;;  %v2660_v53 = vshrl.u32 %v2658_v18, 16 }
 0x219   : > { %v2684_v39 = vadd.s32 %v6254_v10, %v6220_v33  ;;  %v2714_v42 = vcvt.s32.f32 %v2712_v3  ;;  %v2711_v60 = vand.u32 65535, %v2710_v50  ;;  %v2700_v27 = vcvt.s32.f32 %v2698_v11 }
 0x21a   : > { %v2647_v30 = vshrl.u32 %v2645_v29, 16  ;;  %v2646_v46 = vand.u32 65535, %v2645_v29 }
 0x21b   : > { %v2686_v32 = vshrl.u32 %v2684_v39, 16 }
 0x21c   : > { %2548 = vadd.xlane.f32.xlu1 %v2545_v14  ;;  %2546 = vadd.xlane.f32.xlu0 %v2544_v0  ;;  %v2649_v43 = vcvt.s32.f32 %v2647_v30  ;;  %v2662_v14 = vcvt.s32.f32 %v2660_v53  ;;  %v2659_v0 = vand.u32 65535, %v2658_v18  ;;  %v2648_v45 = vcvt.s32.f32 %v2646_v46 }
 0x21d   : > { %v2688_v12 = vcvt.s32.f32 %v2686_v32 }
 0x21e   : > { %v2661_v16 = vcvt.s32.f32 %v2659_v0 }
 0x220   : > { %2561 = vadd.xlane.f32.xlu1 %v2558_v2  ;;  %2559 = vadd.xlane.f32.xlu0 %v2557_v4  ;;  %v2672_v2 = vand.u32 65535, %v2671_v38  ;;  %v2685_v4 = vand.u32 65535, %v2684_v39 }
 0x222   : > { %v2674_v33 = vcvt.s32.f32 %v2672_v2  ;;  %v2687_v10 = vcvt.s32.f32 %v2685_v4 }
 0x224   : > { %2574 = vadd.xlane.f32.xlu1 %v2571_v9  ;;  %2572 = vadd.xlane.f32.xlu0 %v2570_v6  ;;  %v2701_v6 = vcvt.s32.f32 %v2699_v28 }
 0x228   : > { %2587 = vadd.xlane.f32.xlu1 %v2584_v20  ;;  %2585 = vadd.xlane.f32.xlu0 %v2583_v15  ;;  %v2713_v20 = vcvt.s32.f32 %v2711_v60 }
 0x22c   : > { %2600 = vadd.xlane.f32.xlu1 %v2597_v34  ;;  %2598 = vadd.xlane.f32.xlu0 %v2596_v56 }
 0x230   : > { %2613 = vadd.xlane.f32.xlu0 %v2610_v63  ;;  %2611 = vadd.xlane.f32.xlu1 %v2609_v48 }
 0x234   : > { %2626 = vadd.xlane.f32.xlu0 %v2623_v58  ;;  %2639 = vadd.xlane.f32.xlu1 %v2636_v35 }
 0x238   : > { %2624 = vadd.xlane.f32.xlu0 %v2622_v19  ;;  %2637 = vadd.xlane.f32.xlu1 %v2635_v37 }
 0x23c   : > { %2652 = vadd.xlane.f32.xlu0 %v2649_v43  ;;  %2665 = vadd.xlane.f32.xlu1 %v2662_v14 }
 0x240   : > { %2650 = vadd.xlane.f32.xlu0 %v2648_v45  ;;  %2663 = vadd.xlane.f32.xlu1 %v2661_v16 }
 0x242   : > { %v2313_v51 = vpop.xlane.xlu1 %2312  ;;  %v2315_v9 = vpop.xlane.xlu0 %2314 }
 0x243   : > { %v2317_v22 = vcvt.f32.s32 %v2315_v9  ;;  %v2316_v13 = vcvt.f32.s32 %v2313_v51  ;;  %v7823_v51 = vld [vmem:[#allocation10_spill] sm:$0xff] }
 0x244   : > { %2678 = vadd.xlane.f32.xlu0 %v2675_v52  ;;  %2691 = vadd.xlane.f32.xlu1 %v2688_v12 }
 0x245   : > { %v2318_v23 = vshll.u32 %v2317_v22, 16 }
 0x246   : > { %v2328_v1 = vpop.xlane.xlu1 %2327  ;;  %v2326_v40 = vpop.xlane.xlu0 %2325 }
 0x247   : > { %v2330_v7 = vcvt.f32.s32 %v2328_v1  ;;  %v2329_v25 = vcvt.f32.s32 %v2326_v40  ;;  %v2319_v35 = vadd.s32 %v2318_v23, %v2316_v13 }
 0x248   : > { %2676 = vadd.xlane.f32.xlu0 %v2674_v33  ;;  %2689 = vadd.xlane.f32.xlu1 %v2687_v10 }
 0x249   : > { %v2331_v15 = vshll.u32 %v2330_v7, 16  ;;  %v2723_v14 = vsub.s32 255, %v2319_v35 }
 0x24a   : > { %v2341_v8 = vpop.xlane.xlu1 %2340  ;;  %v2339_v24 = vpop.xlane.xlu0 %2338 }
 0x24b   : > { %v2343_v34 = vcvt.f32.s32 %v2341_v8  ;;  %v2332_v56 = vadd.s32 %v2331_v15, %v2329_v25  ;;  %v2342_v31 = vcvt.f32.s32 %v2339_v24  ;;  %vm6359_vm13 = vcmp.lt.s32.totalorder %v2723_v14, 51  ;;  %v7824_v24 = vld [vmem:[#allocation6_spill] sm:$0xff] }
 0x24c   : > { %2704 = vadd.xlane.f32.xlu0 %v2701_v6  ;;  %2717 = vadd.xlane.f32.xlu1 %v2714_v42  ;;  %v2968_v9 = vsel %vm6359_vm13, %v7823_v51, -1e+30 }
 0x24d   : > { %v2344_v61 = vshll.u32 %v2343_v34, 16  ;;  %v2724_v21 = vsub.s32 255, %v2332_v56 }
 0x24e   : > { %v2354_v63 = vpop.xlane.xlu1 %2353  ;;  %v2352_v48 = vpop.xlane.xlu0 %2351 }
 0x24f   : > { %v2356_v49 = vcvt.f32.s32 %v2354_v63  ;;  %v2345_v58 = vadd.s32 %v2344_v61, %v2342_v31  ;;  %v2355_v30 = vcvt.f32.s32 %v2352_v48  ;;  %vm6348_vm5 = vcmp.lt.s32.totalorder %v2724_v21, 51 }
 0x250   : > { %2702 = vadd.xlane.f32.xlu0 %v2700_v27  ;;  %2715 = vadd.xlane.f32.xlu1 %v2713_v20  ;;  %v2969_v32 = vsel %vm6348_vm5, %v5404_v47, -1e+30 }
 0x251   : > { %v2357_v29 = vshll.u32 %v2356_v49, 16  ;;  %v2725_v46 = vsub.s32 255, %v2345_v58 }
 0x252   : > { %v2367_v18 = vpop.xlane.xlu1 %2366  ;;  %v2365_v19 = vpop.xlane.xlu0 %2364 }
 0x253   : > { %v2369_v37 = vcvt.f32.s32 %v2367_v18  ;;  %v2368_v43 = vcvt.f32.s32 %v2365_v19  ;;  %v2358_v0 = vadd.s32 %v2357_v29, %v2355_v30  ;;  %vm6355_vm7 = vcmp.lt.s32.totalorder %v2725_v46, 51  ;;  %v7826_v18 = vld [vmem:[#allocation7_spill] sm:$0xff] }
 0x254   : > { %v2970_v47 = vsel %vm6355_vm7, %v5413_v17, -1e+30 }
 0x255   : > { %v2370_v38 = vshll.u32 %v2369_v37, 16  ;;  %v2726_v4 = vsub.s32 255, %v2358_v0  ;;  %v7827_v0 = vld [vmem:[#allocation12_spill] sm:$0xff] }
 0x256   : > { %v2380_v39 = vpop.xlane.xlu1 %2379  ;;  %v2378_v45 = vpop.xlane.xlu0 %2377 }
 0x257   : > { %v2371_v16 = vadd.s32 %v2370_v38, %v2368_v43  ;;  %v2382_v26 = vcvt.f32.s32 %v2380_v39  ;;  %v2381_v12 = vcvt.f32.s32 %v2378_v45  ;;  %vm2762_vm10 = vcmp.lt.s32.totalorder %v2726_v4, 51 }
 0x258   : > { %v2971_v7 = vsel %vm2762_vm10, %v5417_v54, -1e+30 }
 0x259   : > { %v2727_v50 = vsub.s32 255, %v2371_v16  ;;  %v2383_v52 = vshll.u32 %v2382_v26, 16 }
 0x25a   : > { %v2393_v33 = vpop.xlane.xlu1 %2392  ;;  %v2391_v10 = vpop.xlane.xlu0 %2390 }
 0x25b   : > { %v2384_v28 = vadd.s32 %v2383_v52, %v2381_v12  ;;  %v2395_v3 = vcvt.f32.s32 %v2393_v33  ;;  %vm2763_vm12 = vcmp.lt.s32.totalorder %v2727_v50, 51  ;;  %v2394_v42 = vcvt.f32.s32 %v2391_v10  ;;  %v7828_v12 = vld [vmem:[#allocation8_spill] sm:$0xff] }
 0x25c   : > { %v2972_v1 = vsel %vm2763_vm12, %v5419_v44, -1e+30  ;;  %v7825_v44 = vld [vmem:[#allocation11_spill] sm:$0xff] }
 0x25d   : > { %v2396_v6 = vshll.u32 %v2395_v3, 16  ;;  %v2728_v11 = vsub.s32 255, %v2384_v28 }
 0x25f   : > { %v2397_v60 = vadd.s32 %v2396_v6, %v2394_v42  ;;  %vm2764_vm0 = vcmp.lt.s32.totalorder %v2728_v11, 51 }
 0x260   : > { %v2973_v25 = vsel %vm2764_vm0, %v7824_v24, -1e+30 }
 0x261   : > { %3007 = vperm.xlu1 %3828, %v2969_v32   ;;  %v2729_v27 = vsub.s32 255, %v2397_v60 }
 0x262   : > { %v2406_v40 = vpop.xlane.xlu1 %2405 }
 0x263   : > { %v2408_v20 = vcvt.f32.s32 %v2406_v40  ;;  %vm2765_vm3 = vcmp.lt.s32.totalorder %v2729_v27, 51 }
 0x264   : > { %v2974_v8 = vsel %vm2765_vm3, %v5432_v41, -1e+30 }
 0x265   : > { %3012 = vperm.xlu1 %3828, %v2970_v47   ;;  %v2409_v17 = vshll.u32 %v2408_v20, 16  ;;  %v2404_v15 = vpop.xlane.xlu0 %2403 }
 0x266   : > { %3002 = vperm.xlu0 %3827, %v2968_v9   ;;  %v2407_v22 = vcvt.f32.s32 %v2404_v15  ;;  %v7829_v9 = vld [vmem:[#allocation13_spill] sm:$0xff] }
 0x268   : > { %v2410_v34 = vadd.s32 %v2409_v17, %v2407_v22 }
 0x269   : > { %3022 = vperm.xlu1 %3828, %v2972_v1  }
 0x26a   : > { %3017 = vperm.xlu0 %3827, %v2971_v7   ;;  %v2730_v56 = vsub.s32 255, %v2410_v34 }
 0x26c   : > { %vm2766_vm2 = vcmp.lt.s32.totalorder %v2730_v56, 51 }
 0x26d   : > { %3032 = vperm.xlu1 %3828, %v2974_v8   ;;  %v2975_v54 = vsel %vm2766_vm2, %v7825_v44, -1e+30  ;;  %v7830_v8 = vld [vmem:[#allocation9_spill] sm:$0xff] }
 0x26e   : > { %3027 = vperm.xlu0 %3827, %v2973_v25  }
 0x272   : > { %3037 = vperm.xlu0 %3827, %v2975_v54   ;;  %v2419_v61 = vpop.xlane.xlu1 %2418  ;;  %v2417_v23 = vpop.xlane.xlu0 %2416 }
 0x273   : > { %v2421_v63 = vcvt.f32.s32 %v2419_v61  ;;  %v2420_v31 = vcvt.f32.s32 %v2417_v23 }
 0x275   : > { %v2422_v48 = vshll.u32 %v2421_v63, 16  ;;  %v7831_v63 = vld [vmem:[#allocation14_spill] sm:$0xff] }
 0x277   : > { %v2423_v49 = vadd.s32 %v2422_v48, %v2420_v31 }
 0x279   : > { %v2731_v13 = vsub.s32 255, %v2423_v49 }
 0x27a   : > { %v2432_v21 = vpop.xlane.xlu1 %2431  ;;  %v2430_v58 = vpop.xlane.xlu0 %2429 }
 0x27b   : > { %v2434_v41 = vcvt.f32.s32 %v2432_v21  ;;  %vm2767_vm15 = vcmp.lt.s32.totalorder %v2731_v13, 51  ;;  %v2433_v29 = vcvt.f32.s32 %v2430_v58 }
 0x27c   : > { %v2976_v19 = vsel %vm2767_vm15, %v7826_v18, -1e+30 }
 0x27d   : > { %v2435_v35 = vshll.u32 %v2434_v41, 16  ;;  %3042 = vperm.xlu1 %3828, %v2976_v19  }
 0x27f   : > { %v2436_v37 = vadd.s32 %v2435_v35, %v2433_v29  ;;  %v7832_v29 = vld [vmem:[#allocation50_spill] sm:$0xff] }
 0x281   : > { %v2732_v30 = vsub.s32 255, %v2436_v37  ;;  %v2445_v53 = vpop.xlane.xlu1 %2444  ;;  %v2443_v46 = vpop.xlane.xlu0 %2442 }
 0x282   : > { %v2447_v38 = vcvt.f32.s32 %v2445_v53  ;;  %v2446_v14 = vcvt.f32.s32 %v2443_v46 }
 0x283   : > { %vm2768_vm8 = vcmp.lt.s32.totalorder %v2732_v30, 51 }
 0x284   : > { %v2448_v43 = vshll.u32 %v2447_v38, 16  ;;  %v2977_v39 = vsel %vm2768_vm8, %v7827_v0, -1e+30 }
 0x285   : > { %3047 = vperm.xlu0 %3827, %v2977_v39  }
 0x286   : > { %v2449_v45 = vadd.s32 %v2448_v43, %v2446_v14  ;;  %v7833_v14 = vld [vmem:[#allocation51_spill] sm:$0xff] }
 0x288   : > { %v2733_v16 = vsub.s32 255, %v2449_v45 }
 0x289   : > { %v2458_v26 = vpop.xlane.xlu1 %2457  ;;  %v2456_v32 = vpop.xlane.xlu0 %2455 }
 0x28a   : > { %v2460_v57 = vcvt.f32.s32 %v2458_v26  ;;  %vm2769_vm6 = vcmp.lt.s32.totalorder %v2733_v16, 51  ;;  %v2459_v52 = vcvt.f32.s32 %v2456_v32 }
 0x28b   : > { %v2978_v2 = vsel %vm2769_vm6, %v7828_v12, -1e+30 }
 0x28c   : > { %v2461_v50 = vshll.u32 %v2460_v57, 16  ;;  %3052 = vperm.xlu1 %3828, %v2978_v2  }
 0x28e   : > { %v2462_v4 = vadd.s32 %v2461_v50, %v2459_v52  ;;  %v7834_v52 = vld [vmem:[#allocation52_spill] sm:$0xff] }
 0x290   : > { %v2734_v33 = vsub.s32 255, %v2462_v4 }
 0x291   : > { %v2471_v10 = vpop.xlane.xlu1 %2470  ;;  %v2469_v28 = vpop.xlane.xlu0 %2468 }
 0x292   : > { %v2473_v3 = vcvt.f32.s32 %v2471_v10  ;;  %vm2770_vm4 = vcmp.lt.s32.totalorder %v2734_v33, 51  ;;  %v2472_v51 = vcvt.f32.s32 %v2469_v28 }
 0x293   : > { %v2979_v6 = vsel %vm2770_vm4, %v7829_v9, -1e+30 }
 0x294   : > { %v2474_v47 = vshll.u32 %v2473_v3, 16  ;;  %3057 = vperm.xlu0 %3827, %v2979_v6  }
 0x295   : > { %v2484_v42 = vpop.xlane.xlu1 %2483  ;;  %v2482_v11 = vpop.xlane.xlu0 %2481 }
 0x296   : > { %v2475_v60 = vadd.s32 %v2474_v47, %v2472_v51  ;;  %v2486_v1 = vcvt.f32.s32 %v2484_v42  ;;  %v2485_v27 = vcvt.f32.s32 %v2482_v11  ;;  %v7835_v51 = vld [vmem:[#allocation53_spill] sm:$0xff] }
 0x298   : > { %v2735_v40 = vsub.s32 255, %v2475_v60  ;;  %v2487_v7 = vshll.u32 %v2486_v1, 16 }
 0x299   : > { %v2497_v20 = vpop.xlane.xlu1 %2496  ;;  %v2495_v17 = vpop.xlane.xlu0 %2494 }
 0x29a   : > { %vm2771_vm1 = vcmp.lt.s32.totalorder %v2735_v40, 51  ;;  %v2488_v15 = vadd.s32 %v2487_v7, %v2485_v27  ;;  %v2499_v22 = vcvt.f32.s32 %v2497_v20  ;;  %v2498_v56 = vcvt.f32.s32 %v2495_v17  ;;  %v7836_v27 = vld [vmem:[#allocation55_spill] sm:$0xff] }
 0x29b   : > { %v2980_v24 = vsel %vm2771_vm1, %v7830_v8, -1e+30 }
 0x29c   : > { %v2736_v25 = vsub.s32 255, %v2488_v15  ;;  %v2500_v34 = vshll.u32 %v2499_v22, 16  ;;  %3062 = vperm.xlu1 %3828, %v2980_v24  }
 0x29d   : > { %v2510_v44 = vpop.xlane.xlu1 %2509  ;;  %v2508_v54 = vpop.xlane.xlu0 %2507 }
 0x29e   : > { %vm2772_vm5 = vcmp.lt.s32.totalorder %v2736_v25, 51  ;;  %v2501_v61 = vadd.s32 %v2500_v34, %v2498_v56  ;;  %v2512_v23 = vcvt.f32.s32 %v2510_v44  ;;  %v2511_v13 = vcvt.f32.s32 %v2508_v54  ;;  %v7837_v56 = vld [vmem:[#allocation54_spill] sm:$0xff] }
 0x29f   : > { %v2981_v48 = vsel %vm2772_vm5, %v7831_v63, -1e+30 }
 0x2a0   : > { %v2737_v31 = vsub.s32 255, %v2501_v61  ;;  %v2513_v49 = vshll.u32 %v2512_v23, 16  ;;  %3067 = vperm.xlu0 %3827, %v2981_v48  }
 0x2a1   : > { %v2523_v21 = vpop.xlane.xlu1 %2522  ;;  %v2521_v58 = vpop.xlane.xlu0 %2520 }
 0x2a2   : > { %vm2773_vm7 = vcmp.lt.s32.totalorder %v2737_v31, 51  ;;  %v2514_v41 = vadd.s32 %v2513_v49, %v2511_v13  ;;  %v2525_v35 = vcvt.f32.s32 %v2523_v21  ;;  %v2524_v30 = vcvt.f32.s32 %v2521_v58  ;;  %v7838_v13 = vld [vmem:[#allocation57_spill] sm:$0xff] }
 0x2a3   : > { %v2982_v18 = vsel %vm2773_vm7, %v7832_v29, -1e+30 }
 0x2a4   : > { %v2738_v19 = vsub.s32 255, %v2514_v41  ;;  %v2526_v37 = vshll.u32 %v2525_v35, 16  ;;  %3072 = vperm.xlu1 %3828, %v2982_v18  }
 0x2a5   : > { %v2536_v53 = vpop.xlane.xlu1 %2535  ;;  %v2534_v46 = vpop.xlane.xlu0 %2533 }
 0x2a6   : > { %vm2774_vm13 = vcmp.lt.s32.totalorder %v2738_v19, 51  ;;  %v2527_v38 = vadd.s32 %v2526_v37, %v2524_v30  ;;  %v2538_v43 = vcvt.f32.s32 %v2536_v53  ;;  %v2537_v16 = vcvt.f32.s32 %v2534_v46  ;;  %v7839_v30 = vld [vmem:[#allocation56_spill] sm:$0xff] }
 0x2a7   : > { %v2983_v0 = vsel %vm2774_vm13, %v7833_v14, -1e+30 }
 0x2a8   : > { %v2739_v39 = vsub.s32 255, %v2527_v38  ;;  %v2539_v45 = vshll.u32 %v2538_v43, 16  ;;  %3077 = vperm.xlu0 %3827, %v2983_v0  }
 0x2a9   : > { %v2549_v26 = vpop.xlane.xlu1 %2548  ;;  %v2547_v32 = vpop.xlane.xlu0 %2546 }
 0x2aa   : > { %vm2775_vm12 = vcmp.lt.s32.totalorder %v2739_v39, 51  ;;  %v2540_v57 = vadd.s32 %v2539_v45, %v2537_v16  ;;  %v2551_v50 = vcvt.f32.s32 %v2549_v26  ;;  %v2550_v33 = vcvt.f32.s32 %v2547_v32  ;;  %v7840_v26 = vld [vmem:[#allocation59_spill] sm:$0xff] }
 0x2ab   : > { %v2984_v12 = vsel %vm2775_vm12, %v7834_v52, -1e+30 }
 0x2ac   : > { %v2740_v2 = vsub.s32 255, %v2540_v57  ;;  %v2552_v4 = vshll.u32 %v2551_v50, 16  ;;  %3082 = vperm.xlu1 %3828, %v2984_v12  }
 0x2ad   : > { %v2562_v10 = vpop.xlane.xlu1 %2561  ;;  %v2560_v28 = vpop.xlane.xlu0 %2559 }
 0x2ae   : > { %vm2776_vm10 = vcmp.lt.s32.totalorder %v2740_v2, 51  ;;  %v2553_v3 = vadd.s32 %v2552_v4, %v2550_v33  ;;  %v2564_v47 = vcvt.f32.s32 %v2562_v10  ;;  %v2563_v11 = vcvt.f32.s32 %v2560_v28  ;;  %v7841_v10 = vld [vmem:[#allocation58_spill] sm:$0xff] }
 0x2af   : > { %v2985_v9 = vsel %vm2776_vm10, %v7835_v51, -1e+30 }
 0x2b0   : > { %v2741_v6 = vsub.s32 255, %v2553_v3  ;;  %v2565_v42 = vshll.u32 %v2564_v47, 16  ;;  %3087 = vperm.xlu0 %3827, %v2985_v9  }
 0x2b1   : > { %v2575_v60 = vpop.xlane.xlu1 %2574  ;;  %v2573_v1 = vpop.xlane.xlu0 %2572 }
 0x2b2   : > { %vm2777_vm0 = vcmp.lt.s32.totalorder %v2741_v6, 51  ;;  %v2566_v40 = vadd.s32 %v2565_v42, %v2563_v11  ;;  %v2577_v7 = vcvt.f32.s32 %v2575_v60  ;;  %v2576_v22 = vcvt.f32.s32 %v2573_v1 }
 0x2b3   : > { %v2986_v20 = vsel %vm2777_vm0, %v7836_v27, -1e+30 }
 0x2b4   : > { %v2742_v17 = vsub.s32 255, %v2566_v40  ;;  %v2578_v15 = vshll.u32 %v2577_v7, 16  ;;  %3092 = vperm.xlu1 %3828, %v2986_v20   ;;  %v7842_v7 = vld [vmem:[#allocation60_spill] sm:$0xff]  ;;  %v7843_v20 = vld [vmem:[#allocation61_spill] sm:$0xff] }
 0x2b5   : > { %v2588_v8 = vpop.xlane.xlu1 %2587  ;;  %v2586_v24 = vpop.xlane.xlu0 %2585 }
 0x2b6   : > { %vm2778_vm3 = vcmp.lt.s32.totalorder %v2742_v17, 51  ;;  %v2579_v25 = vadd.s32 %v2578_v15, %v2576_v22  ;;  %v2590_v34 = vcvt.f32.s32 %v2588_v8  ;;  %v2589_v23 = vcvt.f32.s32 %v2586_v24 }
 0x2b7   : > { %v2987_v44 = vsel %vm2778_vm3, %v7837_v56, -1e+30 }
 0x2b8   : > { %v2743_v54 = vsub.s32 255, %v2579_v25  ;;  %v2591_v61 = vshll.u32 %v2590_v34, 16  ;;  %3097 = vperm.xlu0 %3827, %v2987_v44  }
 0x2b9   : > { %v2601_v63 = vpop.xlane.xlu1 %2600  ;;  %v2599_v48 = vpop.xlane.xlu0 %2598 }
 0x2ba   : > { %vm2779_vm2 = vcmp.lt.s32.totalorder %v2743_v54, 51  ;;  %v2592_v31 = vadd.s32 %v2591_v61, %v2589_v23  ;;  %v2603_v49 = vcvt.f32.s32 %v2601_v63  ;;  %v2602_v35 = vcvt.f32.s32 %v2599_v48 }
 0x2bb   : > { %v2988_v21 = vsel %vm2779_vm2, %v7838_v13, -1e+30 }
 0x2bc   : > { %v2744_v58 = vsub.s32 255, %v2592_v31  ;;  %v2604_v41 = vshll.u32 %v2603_v49, 16  ;;  %3102 = vperm.xlu1 %3828, %v2988_v21   ;;  %v7844_v49 = vld [vmem:[#allocation62_spill] sm:$0xff]  ;;  %v7845_v21 = vld [vmem:[#allocation63_spill] sm:$0xff] }
 0x2bd   : > { %v2612_v29 = vpop.xlane.xlu1 %2611  ;;  %v2614_v18 = vpop.xlane.xlu0 %2613 }
 0x2be   : > { %vm2780_vm15 = vcmp.lt.s32.totalorder %v2744_v58, 51  ;;  %v2605_v19 = vadd.s32 %v2604_v41, %v2602_v35  ;;  %v2616_v37 = vcvt.f32.s32 %v2614_v18  ;;  %v2615_v38 = vcvt.f32.s32 %v2612_v29 }
 0x2bf   : > { %v2989_v53 = vsel %vm2780_vm15, %v7839_v30, -1e+30 }
 0x2c0   : > { %v2745_v46 = vsub.s32 255, %v2605_v19  ;;  %v2617_v43 = vshll.u32 %v2616_v37, 16  ;;  %3107 = vperm.xlu0 %3827, %v2989_v53  }
 0x2c1   : > { %v2640_v14 = vpop.xlane.xlu1 %2639  ;;  %v2627_v0 = vpop.xlane.xlu0 %2626 }
 0x2c2   : > { %vm2781_vm8 = vcmp.lt.s32.totalorder %v2745_v46, 51  ;;  %v2618_v39 = vadd.s32 %v2617_v43, %v2615_v38  ;;  %v2642_v45 = vcvt.f32.s32 %v2640_v14  ;;  %v2629_v16 = vcvt.f32.s32 %v2627_v0 }
 0x2c3   : > { %v2990_v32 = vsel %vm2781_vm8, %v7840_v26, -1e+30  ;;  %v7847_v26 = vld [vmem:[#allocation65_spill] sm:$0xff] }
 0x2c4   : > { %v2746_v57 = vsub.s32 255, %v2618_v39  ;;  %3112 = vperm.xlu1 %3828, %v2990_v32   ;;  %v2643_v50 = vshll.u32 %v2642_v45, 16  ;;  %v2630_v2 = vshll.u32 %v2629_v16, 16  ;;  %v7846_v45 = vld [vmem:[#allocation64_spill] sm:$0xff] }
 0x2c5   : > { %v2638_v52 = vpop.xlane.xlu1 %2637  ;;  %v2625_v12 = vpop.xlane.xlu0 %2624 }
 0x2c6   : > { %vm2782_vm6 = vcmp.lt.s32.totalorder %v2746_v57, 51  ;;  %v2641_v4 = vcvt.f32.s32 %v2638_v52  ;;  %v2628_v33 = vcvt.f32.s32 %v2625_v12 }
 0x2c7   : > { %v2991_v28 = vsel %vm2782_vm6, %v7841_v10, -1e+30 }
 0x2c8   : > { %v2644_v3 = vadd.s32 %v2643_v50, %v2641_v4  ;;  %v2631_v47 = vadd.s32 %v2630_v2, %v2628_v33  ;;  %3117 = vperm.xlu0 %3827, %v2991_v28   ;;  %v7848_v28 = vld [vmem:[#allocation66_spill] sm:$0xff] }
 0x2c9   : > { %v2666_v51 = vpop.xlane.xlu1 %2665  ;;  %v2653_v9 = vpop.xlane.xlu0 %2652 }
 0x2ca   : > { %v2748_v6 = vsub.s32 255, %v2644_v3  ;;  %v2747_v42 = vsub.s32 255, %v2631_v47  ;;  %v2668_v11 = vcvt.f32.s32 %v2666_v51  ;;  %v2655_v60 = vcvt.f32.s32 %v2653_v9  ;;  %v7849_v47 = vld [vmem:[#allocation67_spill] sm:$0xff] }
 0x2cc   : > { %vm2784_vm4 = vcmp.lt.s32.totalorder %v2748_v6, 51  ;;  %vm2783_vm1 = vcmp.lt.s32.totalorder %v2747_v42, 51  ;;  %v2669_v15 = vshll.u32 %v2668_v11, 16  ;;  %v2656_v22 = vshll.u32 %v2655_v60, 16 }
 0x2cd   : > { %v2664_v1 = vpop.xlane.xlu1 %2663  ;;  %v2651_v40 = vpop.xlane.xlu0 %2650  ;;  %v2993_v27 = vsel %vm2784_vm4, %v7842_v7, -1e+30  ;;  %v2992_v17 = vsel %vm2783_vm1, %v7843_v20, -1e+30  ;;  %v6400_v60 = vrot.slane %v6313_v55, %v7734_v36  ;;  %v6405_v7 = vrot.slane %v6320_v62, %v7734_v36  ;;  %v7850_v55 = vld [vmem:[#allocation24_spill] sm:$0xff]  ;;  %v7857_v62 = vld [vmem:[#allocation18_spill] sm:$0xff] }
 0x2ce   : > { %v2667_v8 = vcvt.f32.s32 %v2664_v1  ;;  %v2654_v24 = vcvt.f32.s32 %v2651_v40  ;;  %3127 = vperm.xlu0 %3827, %v2993_v27   ;;  %3122 = vperm.xlu1 %3828, %v2992_v17   ;;  %v7851_v20 = vld [vmem:[#allocation16_spill] sm:$0xff] }
 0x2cf   : > { %vm7852_vm1 = vcmp.lt.s32.totalorder %v7850_v55, %v7851_v20  ;;  %vm7858_vm9 = vcmp.lt.s32.totalorder %v7857_v62, %v7851_v20  ;;  %v7973_v55 = vmov 0 }
 0x2d0   : > { %v2670_v25 = vadd.s32 %v2669_v15, %v2667_v8  ;;  %v2657_v34 = vadd.s32 %v2656_v22, %v2654_v24  ;;  %v7853_v15 = vld [vmem:[#allocation2_spill] sm:$0xff] }
 0x2d1   : > { %v2692_v56 = vpop.xlane.xlu1 %2691  ;;  %v2679_v44 = vpop.xlane.xlu0 %2678 }
 0x2d2   : > { %v2750_v54 = vsub.s32 255, %v2670_v25  ;;  %v2749_v61 = vsub.s32 255, %v2657_v34  ;;  %v2694_v23 = vcvt.f32.s32 %v2692_v56  ;;  %v2681_v63 = vcvt.f32.s32 %v2679_v44  ;;  %v7865_v34 = vld [vmem:[#allocation26_spill] sm:$0xff] }
 0x2d3   : > { %v7867_v44 = vmov 0 }
 0x2d4   : > { %vm2786_vm5 = vcmp.lt.s32.totalorder %v2750_v54, 51  ;;  %vm2785_vm7 = vcmp.lt.s32.totalorder %v2749_v61, 51  ;;  %v2695_v41 = vshll.u32 %v2694_v23, 16  ;;  %v2682_v35 = vshll.u32 %v2681_v63, 16  ;;  %v7872_v61 = vld [vmem:[#allocation19_spill] sm:$0xff] }
 0x2d5   : > { %v2690_v48 = vpop.xlane.xlu1 %2689  ;;  %v2677_v31 = vpop.xlane.xlu0 %2676  ;;  %v2995_v13 = vsel %vm2786_vm5, %v7844_v49, -1e+30  ;;  %v2994_v58 = vsel %vm2785_vm7, %v7845_v21, -1e+30  ;;  %vm7854_vm7 = vcmp.lt.s32.totalorder %v7853_v15, %v7851_v20  ;;  %v7870_v54 = vmov 0  ;;  %v7978_v15 = vld [vmem:[#allocation15_spill] sm:$0xff] }
 0x2d6   : > { %v2693_v29 = vcvt.f32.s32 %v2690_v48  ;;  %v2680_v18 = vcvt.f32.s32 %v2677_v31  ;;  %3137 = vperm.xlu0 %3827, %v2995_v13   ;;  %3132 = vperm.xlu1 %3828, %v2994_v58   ;;  %v7876_v23 = vmov 0  ;;  %v7879_v63 = vmov 0  ;;  %v7885_v31 = vld [vmem:[#allocation29_spill] sm:$0xff] }
 0x2d7   : > { %v7883_v48 = vmov 0  ;;  %v7890_v13 = vmov 0  ;;  %v7892_v21 = vmov 0 }
 0x2d8   : > { %v2696_v19 = vadd.s32 %v2695_v41, %v2693_v29  ;;  %v2683_v37 = vadd.s32 %v2682_v35, %v2680_v18  ;;  %v7897_v35 = vld [vmem:[#allocation20_spill] sm:$0xff]  ;;  %v7903_v18 = vld [vmem:[#allocation30_spill] sm:$0xff] }
 0x2d9   : > { %v2718_v30 = vpop.xlane.xlu1 %2717  ;;  %v2705_v53 = vpop.xlane.xlu0 %2704 }
 0x2da   : > { %v2752_v46 = vsub.s32 255, %v2696_v19  ;;  %v2751_v38 = vsub.s32 255, %v2683_v37  ;;  %v2720_v43 = vcvt.f32.s32 %v2718_v30  ;;  %v2707_v14 = vcvt.f32.s32 %v2705_v53  ;;  %v7910_v30 = vld [vmem:[#allocation22_spill] sm:$0xff]  ;;  %v8056_v19 = vld [vmem:[#allocation36_spill] sm:$0xff] }
 0x2dc   : > { %vm2788_vm13 = vcmp.lt.s32.totalorder %v2752_v46, 51  ;;  %vm2787_vm12 = vcmp.lt.s32.totalorder %v2751_v38, 51  ;;  %v2721_v57 = vshll.u32 %v2720_v43, 16  ;;  %v2708_v50 = vshll.u32 %v2707_v14, 16 }
 0x2dd   : > { %v2716_v0 = vpop.xlane.xlu1 %2715  ;;  %v2703_v39 = vpop.xlane.xlu0 %2702  ;;  %v2997_v16 = vsel %vm2788_vm13, %v7846_v45, -1e+30  ;;  %v2996_v32 = vsel %vm2787_vm12, %v7847_v26, -1e+30  ;;  %v7919_v43 = vmov 0 }
 0x2de   : > { %v2719_v52 = vcvt.f32.s32 %v2716_v0  ;;  %v2706_v12 = vcvt.f32.s32 %v2703_v39  ;;  %3147 = vperm.xlu0 %3827, %v2997_v16   ;;  %3142 = vperm.xlu1 %3828, %v2996_v32   ;;  %v7924_v39 = vld [vmem:[#allocation31_spill] sm:$0xff]  ;;  %v7929_v16 = vmov 0  }
 0x2e0   : > { %v2722_v2 = vadd.s32 %v2721_v57, %v2719_v52  ;;  %v2709_v4 = vadd.s32 %v2708_v50, %v2706_v12  ;;  %v7932_v57 = vmov 0  ;;  %v7935_v50 = vmov 0  ;;  %v7937_v52 = vld [vmem:[#allocation23_spill] sm:$0xff] }
 0x2e1   : > { %v3008_v9 = vpop.permute.xlu1 %3007 }
 0x2e2   : > { %v2754_v33 = vsub.s32 255, %v2722_v2  ;;  %v2753_v10 = vsub.s32 255, %v2709_v4  ;;  %vm3234_vm3 = vcmp.eq.f32.partialorder %v3008_v9, %v6400_v60  ;;  %vm3170_vm8 = vcmp.gt.f32.partialorder %v3008_v9, %v6400_v60  ;;  %v7946_v4 = vld [vmem:[#allocation32_spill] sm:$0xff] }
 0x2e3   : > { %vm3171_vm6 = vcmp.gt.f32.partialorder %v3008_v9, %v6405_v7  ;;  %vm3235_vm4 = vcmp.eq.f32.partialorder %v3008_v9, %v6405_v7  ;;  %vm3298_vm5 = vmand %vm3234_vm3, %vm7852_vm1  ;;  %vm7886_vm3 = vcmp.lt.s32.totalorder %v7885_v31, %v7851_v20  ;;  %v7999_v31 = vld [vmem:[#allocation25_spill] sm:$0xff] }
 0x2e4   : > { %vm2790_vm10 = vcmp.lt.s32.totalorder %v2754_v33, 51  ;;  %vm2789_vm0 = vcmp.lt.s32.totalorder %v2753_v10, 51  ;;  %vm6435_vm1 = vmor %vm3170_vm8, %vm3298_vm5  ;;  %vm7866_vm8 = vcmp.lt.s32.totalorder %v7865_v34, %v7851_v20 }
 0x2e5   : > { %v2999_v3 = vsel %vm2790_vm10, %v7848_v28, -1e+30  ;;  %v2998_v51 = vsel %vm2789_vm0, %v7849_v47, -1e+30  ;;  %v3003_v6 = vpop.permute.xlu0 %3002  ;;  %v3013_v42 = vpop.permute.xlu1 %3012  ;;  %v3490_v26 = vsel %vm6435_vm1, 1, %v7929_v16  ;;  %v7954_v47 = vmov 0 }
 0x2e6   : > { %3157 = vperm.xlu0 %3827, %v2999_v3   ;;  %3152 = vperm.xlu1 %3828, %v2998_v51   ;;  %vm3232_vm2 = vcmp.eq.f32.partialorder %v3003_v6, %v6400_v60  ;;  %vm3236_vm15 = vcmp.eq.f32.partialorder %v3013_v42, %v6400_v60  ;;  %vm3168_vm10 = vcmp.gt.f32.partialorder %v3003_v6, %v6400_v60  ;;  %v7958_v51 = vmov 0 }
 0x2e7   : > { %vm6420_vm13 = vmand %vm3232_vm2, %vm7854_vm7  ;;  %vm3237_vm0 = vcmp.eq.f32.partialorder %v3013_v42, %v6405_v7  ;;  %vm7873_vm7 = vcmp.lt.s32.totalorder %v7872_v61, %v7851_v20 }
 0x2e8   : > { %vm6430_vm11 = vmand %vm3236_vm15, %vm7858_vm9 }
 0x2e9   : > { %v3018_v11 = vpop.permute.xlu0 %3017  ;;  %v3023_v1 = vpop.permute.xlu1 %3022  ;;  %vm6439_vm2 = vmor %vm3171_vm6, %vm3235_vm4 }
 0x2ea   : > { %vm3238_vm12 = vcmp.eq.f32.partialorder %v3018_v11, %v6400_v60  ;;  %vm6462_vm9 = vmor %vm3168_vm10, %vm6420_vm13  ;;  %vm3176_vm4 = vcmp.gt.f32.partialorder %v3023_v1, %v6400_v60  ;;  %vm7874_vm6 = vcmp.eq.f32.partialorder %v3023_v1, %v6400_v60  ;;  %vm7875_vm13 = vcmp.gt.f32.partialorder %v3013_v42, %v6405_v7 }
 0x2eb   : > { %vm3302_vm5 = vmand %vm3238_vm12, %vm7866_vm8  ;;  %v7868_v44 = vsel %vm6462_vm9, 4294967295, %v7867_v44  ;;  %vm7869_vm12 = vcmp.gt.f32.partialorder %v3013_v42, %v6400_v60  ;;  %vm7878_vm14 = vcmp.gt.f32.partialorder %v3018_v11, %v6400_v60  ;;  %v3491_v32 = vsel %vm6439_vm2, 1, %v7929_v16  ;;  %v7964_v42 = vld [vmem:[#allocation21_spill] sm:$0xff] }
 0x2ec   : > { %vm6470_vm8 = vmor %vm7869_vm12, %vm6430_vm11  ;;  %vm3241_vm11 = vcmp.eq.f32.partialorder %v3023_v1, %v6405_v7 }
 0x2ed   : > { %v3028_v40 = vpop.permute.xlu0 %3027  ;;  %v3033_v27 = vpop.permute.xlu1 %3032  ;;  %v7871_v54 = vsel %vm6470_vm8, 4294967295, %v7870_v54  ;;  %vm3304_vm15 = vmand %vm7874_vm6, %vm7873_vm7  ;;  %vm7881_vm7 = vcmp.eq.f32.partialorder %v3018_v11, %v6405_v7  ;;  %vm7882_vm6 = vcmp.gt.f32.partialorder %v3018_v11, %v6405_v7  ;;  %v8078_v11 = vld [vmem:[#allocation40_spill] sm:$0xff] }
 0x2ee   : > { %vm6482_vm10 = vmor %vm7875_vm13, %vm3237_vm0  ;;  %vm7887_vm12 = vcmp.eq.f32.partialorder %v3028_v40, %v6400_v60 }
 0x2ef   : > { %v7877_v23 = vsel %vm6482_vm10, 4294967295, %v7876_v23  ;;  %vm6491_vm8 = vmor %vm7878_vm14, %vm3302_vm5  ;;  %vm7888_vm5 = vcmp.eq.f32.partialorder %v3003_v6, %v6405_v7  ;;  %vm7894_vm14 = vcmp.gt.f32.partialorder %v3023_v1, %v6405_v7 }
 0x2f0   : > { %v7880_v63 = vsel %vm6491_vm8, 4294967295, %v7879_v63  ;;  %vm6499_vm0 = vmor %vm7882_vm6, %vm7881_vm7  ;;  %vm7889_vm7 = vcmp.gt.f32.partialorder %v3003_v6, %v6405_v7  ;;  %v7962_v6 = vmov 0 }
 0x2f1   : > { %v6415_v17 = vpop.permute.xlu0 %3037  ;;  %v7884_v48 = vsel %vm6499_vm0, 4294967295, %v7883_v48  ;;  %vm3306_vm10 = vmand %vm7887_vm12, %vm7886_vm3  ;;  %vm3179_vm0 = vcmp.gt.f32.partialorder %v3028_v40, %v6405_v7  ;;  %vm3243_vm3 = vcmp.eq.f32.partialorder %v3028_v40, %v6405_v7 }
 0x2f2   : > { %vm6517_vm6 = vmor %vm7889_vm7, %vm7888_vm5  ;;  %vm3245_vm5 = vcmp.eq.f32.partialorder %v3033_v27, %v6405_v7  ;;  %vm7898_vm7 = vcmp.lt.s32.totalorder %v7897_v35, %v7851_v20 }
 0x2f3   : > { %v7891_v13 = vsel %vm6517_vm6, 4294967295, %v7890_v13  ;;  %vm6521_vm13 = vmor %vm3176_vm4, %vm3304_vm15  ;;  %vm7900_vm6 = vcmp.gt.f32.partialorder %v3028_v40, %v6400_v60  ;;  %vm7905_vm4 = vcmp.eq.f32.partialorder %v6415_v17, %v6400_v60 }
 0x2f4   : > { %v7893_v21 = vsel %vm6521_vm13, 4294967295, %v7892_v21  ;;  %vm6533_vm8 = vmor %vm7894_vm14, %vm3241_vm11  ;;  %vm7899_vm13 = vcmp.eq.f32.partialorder %v3033_v27, %v6400_v60  ;;  %vm7904_vm14 = vcmp.lt.s32.totalorder %v7903_v18, %v7851_v20  ;;  %vm7918_vm11 = vcmp.gt.f32.partialorder %v3033_v27, %v6405_v7  ;;  %v8007_v18 = vld [vmem:[#allocation17_spill] sm:$0xff] }
 0x2f5   : > { %vm3308_vm12 = vmand %vm7899_vm13, %vm7898_vm7  ;;  %v3497_v34 = vsel %vm6533_vm8, 1, %v7929_v16 }
 0x2f6   : > { %vm6547_vm9 = vmor %vm7900_vm6, %vm3306_vm10 }
 0x2f7   : > { %vm6559_vm15 = vmand %vm7905_vm4, %vm7904_vm14  ;;  %vm7911_vm4 = vcmp.lt.s32.totalorder %v7910_v30, %v7851_v20 }
 0x2f8   : > { %vm6565_vm10 = vmor %vm3179_vm0, %vm3243_vm3  ;;  %vm7915_vm3 = vcmp.gt.f32.partialorder %v3033_v27, %v6400_v60  ;;  %vm7925_vm0 = vcmp.lt.s32.totalorder %v7924_v39, %v7851_v20 }
 0x2f9   : > { %vm6589_vm6 = vmor %vm7915_vm3, %vm3308_vm12  ;;  %vm7921_vm12 = vcmp.gt.f32.partialorder %v6415_v17, %v6400_v60 }
 0x2fa   : > { %vm6595_vm7 = vmor %vm7918_vm11, %vm3245_vm5  ;;  %v3500_v35 = vsel %vm6589_vm6, 1, %v7929_v16 }
 0x2fb   : > { %v7920_v43 = vsel %vm6595_vm7, 4294967295, %v7919_v43  ;;  %vm6610_vm3 = vmor %vm7921_vm12, %vm6559_vm15  ;;  %vm7930_vm15 = vcmp.eq.f32.partialorder %v6415_v17, %v6405_v7  ;;  %vm7931_vm12 = vcmp.gt.f32.partialorder %v6415_v17, %v6405_v7 }
 0x2fc   : > { %v6445_v25 = vpop.permute.xlu1 %3042  ;;  %vm6642_vm11 = vmor %vm7931_vm12, %vm7930_vm15  ;;  %v3502_v30 = vsel %vm6610_vm3, 1, %v7929_v16 }
 0x2fd   : > { %vm7912_vm14 = vcmp.eq.f32.partialorder %v6445_v25, %v6400_v60  ;;  %v7933_v57 = vsel %vm6642_vm11, 4294967295, %v7932_v57 }
 0x2fe   : > { %vm6581_vm13 = vmand %vm7912_vm14, %vm7911_vm4  ;;  %vm7947_vm4 = vcmp.lt.s32.totalorder %v7946_v4, %v7851_v20 }
 0x304   : > { %v6454_v56 = vpop.permute.xlu0 %3047 }
 0x305   : > { %vm7926_vm14 = vcmp.eq.f32.partialorder %v6454_v56, %v6400_v60  ;;  %vm7953_vm2 = vcmp.gt.f32.partialorder %v6454_v56, %v6400_v60 }
 0x306   : > { %vm6626_vm7 = vmand %vm7926_vm14, %vm7925_vm0  ;;  %vm7934_vm0 = vcmp.gt.f32.partialorder %v6445_v25, %v6400_v60  ;;  %vm7938_vm14 = vcmp.lt.s32.totalorder %v7937_v52, %v7851_v20 }
 0x307   : > { %vm6651_vm1 = vmor %vm7934_vm0, %vm6581_vm13  ;;  %vm7942_vm13 = vcmp.eq.f32.partialorder %v6445_v25, %v6405_v7  ;;  %vm7943_vm0 = vcmp.gt.f32.partialorder %v6445_v25, %v6405_v7 }
 0x308   : > { %v7936_v50 = vsel %vm6651_vm1, 4294967295, %v7935_v50  ;;  %vm6674_vm5 = vmor %vm7943_vm0, %vm7942_vm13  ;;  %vm7951_vm0 = vnez %v7868_v44  ;;  %vm7957_vm13 = vcmp.gt.f32.partialorder %v6454_v56, %v6405_v7 }
 0x309   : > { %v3488_v28 = vsel %vm7951_vm0, 1, %v7929_v16  ;;  %vm8016_vm3 = vnez %v7936_v50  ;;  %v3505_v45 = vsel %vm6674_vm5, 1, %v7929_v16 }
 0x30b   : > { %v6511_v49 = vpop.permute.xlu1 %3052 }
 0x30c   : > { %vm7939_vm15 = vcmp.eq.f32.partialorder %v6511_v49, %v6400_v60 }
 0x30d   : > { %vm6663_vm12 = vmand %vm7939_vm15, %vm7938_vm14  ;;  %vm7952_vm15 = vnez %v7871_v54  ;;  %vm7965_vm14 = vcmp.lt.s32.totalorder %v7964_v42, %v7851_v20  ;;  %v8034_v42 = vld [vmem:[#allocation33_spill] sm:$0xff] }
 0x30e   : > { %v3492_v3 = vsel %vm7952_vm15, 1, %v7929_v16  ;;  %vm7972_vm15 = vcmp.gt.f32.partialorder %v6511_v49, %v6405_v7 }
 0x30f   : > { %v3552_v24 = vadd.s32 %v3492_v3, %v3488_v28  ;;  %v8029_v28 = vld [vmem:[#allocation27_spill] sm:$0xff] }
 0x310   : > { %v8074_v3 = vld [vmem:[#allocation39_spill] sm:$0xff] }
 0x313   : > { %v6529_v58 = vpop.permute.xlu0 %3057 }
 0x314   : > { %vm7948_vm1 = vcmp.eq.f32.partialorder %v6529_v58, %v6400_v60 }
 0x315   : > { %vm6690_vm11 = vmand %vm7948_vm1, %vm7947_vm4  ;;  %vm7956_vm1 = vcmp.eq.f32.partialorder %v6454_v56, %v6405_v7 }
 0x316   : > { %vm6706_vm4 = vmor %vm7953_vm2, %vm6626_vm7  ;;  %vm7960_vm7 = vnez %v7877_v23  ;;  %vm7961_vm2 = vcmp.gt.f32.partialorder %v6511_v49, %v6400_v60 }
 0x317   : > { %v7955_v47 = vsel %vm6706_vm4, 4294967295, %v7954_v47  ;;  %vm6716_vm0 = vmor %vm7957_vm13, %vm7956_vm1  ;;  %v3493_v9 = vsel %vm7960_vm7, 1, %v7929_v16  ;;  %vm7971_vm1 = vcmp.eq.f32.partialorder %v6511_v49, %v6405_v7 }
 0x318   : > { %v7959_v51 = vsel %vm6716_vm0, 4294967295, %v7958_v51  ;;  %vm6732_vm4 = vmor %vm7961_vm2, %vm6663_vm12  ;;  %vm7969_vm12 = vnez %v7880_v63  ;;  %vm7970_vm2 = vnez %v7884_v48  ;;  %v3498_v63 = vsel %vm6547_vm9, 1, %v7929_v16 }
 0x319   : > { %v7963_v6 = vsel %vm6732_vm4, 4294967295, %v7962_v6  ;;  %v3494_v40 = vsel %vm7969_vm12, 1, %v7929_v16  ;;  %v3495_v27 = vsel %vm7970_vm2, 1, %v7929_v16  ;;  %vm6760_vm13 = vmor %vm7972_vm15, %vm7971_vm1  ;;  %vm7979_vm2 = vcmp.lt.s32.totalorder %v7978_v15, %v7851_v20 }
 0x31a   : > { %v7974_v55 = vsel %vm6760_vm13, 4294967295, %v7973_v55  ;;  %vm7983_vm13 = vnez %v7891_v13  ;;  %vm7986_vm12 = vcmp.gt.f32.partialorder %v6529_v58, %v6405_v7  ;;  %v3553_v61 = vadd.s32 %v3494_v40, %v3490_v26 }
 0x31b   : > { %v3063_v46 = vpop.permute.xlu1 %3062  ;;  %v3489_v62 = vsel %vm7983_vm13, 1, %v7929_v16  ;;  %v3590_v23 = vadd.s32 %v3495_v27, %v3491_v32  ;;  %v7997_v48 = vmov 0  ;;  %v3499_v13 = vsel %vm6565_vm10, 1, %v7929_v16 }
 0x31c   : > { %vm7966_vm7 = vcmp.eq.f32.partialorder %v3063_v46, %v6400_v60  ;;  %v3589_v25 = vadd.s32 %v3493_v9, %v3489_v62  ;;  %vm7989_vm13 = vcmp.gt.f32.partialorder %v3063_v46, %v6400_v60  ;;  %vm8006_vm10 = vnez %v7920_v43 }
 0x31d   : > { %vm6744_vm0 = vmand %vm7966_vm7, %vm7965_vm14  ;;  %vm7975_vm14 = vcmp.gt.f32.partialorder %v6529_v58, %v6400_v60  ;;  %v3501_v29 = vsel %vm8006_vm10, 1, %v7929_v16  ;;  %v3555_v37 = vadd.s32 %v3553_v61, %v3498_v63  ;;  %v3504_v43 = vsel %vm8016_vm3, 1, %v7929_v16 }
 0x31e   : > { %vm6769_vm7 = vmor %vm7975_vm14, %vm6690_vm11  ;;  %vm7984_vm11 = vnez %v7893_v21  ;;  %vm7985_vm14 = vcmp.eq.f32.partialorder %v6529_v58, %v6405_v7  ;;  %v3591_v41 = vadd.s32 %v3589_v25, %v3497_v34  ;;  %vm8024_vm5 = vnez %v7959_v51  ;;  %v8095_v21 = vld [vmem:[#allocation43_spill] sm:$0xff] }
 0x31f   : > { %v3068_v14 = vpop.permute.xlu0 %3067  ;;  %v3496_v22 = vsel %vm7984_vm11, 1, %v7929_v16  ;;  %vm6809_vm11 = vmor %vm7989_vm13, %vm6744_vm0  ;;  %v3507_v52 = vsel %vm8024_vm5, 1, %v7929_v16 }
 0x320   : > { %vm7980_vm4 = vcmp.eq.f32.partialorder %v3068_v14, %v6400_v60  ;;  %vm7996_vm8 = vcmp.gt.f32.partialorder %v3068_v14, %v6400_v60  ;;  %v3554_v49 = vadd.s32 %v3552_v24, %v3496_v22  ;;  %vm8002_vm9 = vcmp.eq.f32.partialorder %v3068_v14, %v6405_v7 }
 0x321   : > { %vm6779_vm15 = vmand %vm7980_vm4, %vm7979_vm2  ;;  %v3593_v39 = vadd.s32 %v3591_v41, %v3501_v29  ;;  %v3512_v62 = vsel %vm6809_vm11, 1, %v7929_v16 }
 0x322   : > { %vm6796_vm4 = vmor %vm7986_vm12, %vm7985_vm14  ;;  %vm7992_vm12 = vcmp.eq.f32.partialorder %v3063_v46, %v6405_v7  ;;  %vm7993_vm14 = vcmp.gt.f32.partialorder %v3063_v46, %v6405_v7  ;;  %v3592_v46 = vadd.s32 %v3590_v23, %v3499_v13  ;;  %v3556_v0 = vadd.s32 %v3554_v49, %v3500_v35  ;;  %v8052_v13 = vld [vmem:[#allocation35_spill] sm:$0xff] }
 0x323   : > { %v3073_v10 = vpop.permute.xlu1 %3072  ;;  %vm6817_vm2 = vmor %vm7993_vm14, %vm7992_vm12  ;;  %vm8000_vm12 = vcmp.lt.s32.totalorder %v7999_v31, %v7851_v20  ;;  %v3595_v51 = vadd.s32 %v3593_v39, %v3505_v45  ;;  %v3511_v27 = vsel %vm6796_vm4, 1, %v7929_v16  ;;  %v8105_v39 = vld [vmem:[#allocation44_spill] sm:$0xff] }
 0x324   : > { %vm6831_vm0 = vmor %vm7996_vm8, %vm6779_vm15  ;;  %vm8001_vm14 = vcmp.eq.f32.partialorder %v3073_v10, %v6400_v60  ;;  %vm8003_vm15 = vcmp.gt.f32.partialorder %v3068_v14, %v6405_v7  ;;  %vm8012_vm6 = vcmp.gt.f32.partialorder %v3073_v10, %v6400_v60  ;;  %v3558_v4 = vadd.s32 %v3556_v0, %v3504_v43 }
 0x325   : > { %v7998_v48 = vsel %vm6831_vm0, 4294967295, %v7997_v48  ;;  %vm3324_vm1 = vmand %vm8001_vm14, %vm8000_vm12  ;;  %vm3261_vm0 = vcmp.eq.f32.partialorder %v3073_v10, %v6405_v7  ;;  %vm8008_vm14 = vcmp.lt.s32.totalorder %v8007_v18, %v7851_v20  ;;  %v3513_v22 = vsel %vm6817_vm2, 1, %v7929_v16 }
 0x326   : > { %vm6848_vm8 = vmor %vm8003_vm15, %vm8002_vm9  ;;  %vm8046_vm11 = vnez %v7998_v48 }
 0x327   : > { %v3078_v1 = vpop.permute.xlu0 %3077  ;;  %vm6877_vm13 = vmor %vm8012_vm6, %vm3324_vm1  ;;  %vm8017_vm1 = vcmp.gt.f32.partialorder %v3073_v10, %v6405_v7  ;;  %v8028_v10 = vld [vmem:[#allocation28_spill] sm:$0xff]  ;;  %v3514_v34 = vsel %vm8046_vm11, 1, %v7929_v16  ;;  %v3515_v23 = vsel %vm6848_vm8, 1, %v7929_v16 }
 0x328   : > { %vm8009_vm9 = vcmp.eq.f32.partialorder %v3078_v1, %v6400_v60  ;;  %vm3199_vm10 = vcmp.gt.f32.partialorder %v3078_v1, %v6405_v7  ;;  %vm3263_vm12 = vcmp.eq.f32.partialorder %v3078_v1, %v6405_v7  ;;  %v3516_v63 = vsel %vm6877_vm13, 1, %v7929_v16 }
 0x329   : > { %vm6868_vm15 = vmand %vm8009_vm9, %vm8008_vm14  ;;  %vm8015_vm14 = vnez %v7933_v57  ;;  %v3557_v57 = vadd.s32 %v3555_v37, %v3502_v30 }
 0x32a   : > { %v3503_v38 = vsel %vm8015_vm14, 1, %v7929_v16  ;;  %vm6895_vm9 = vmor %vm8017_vm1, %vm3261_vm0  ;;  %vm8020_vm14 = vcmp.gt.f32.partialorder %v3078_v1, %v6400_v60  ;;  %vm8023_vm1 = vnez %v7955_v47  ;;  %vm8030_vm0 = vcmp.lt.s32.totalorder %v8028_v10, %v8029_v28 }
 0x32b   : > { %v6822_v54 = vpop.permute.xlu1 %3082  ;;  %vm6908_vm3 = vmor %vm8020_vm14, %vm6868_vm15  ;;  %v3506_v50 = vsel %vm8023_vm1, 1, %v7929_v16  ;;  %v3594_v2 = vadd.s32 %v3592_v46, %v3503_v38  ;;  %vm8027_vm1 = vnez %v7963_v6  ;;  %v3510_v6 = vsel %vm6769_vm7, 1, %v7929_v16  ;;  %v8060_v46 = vld [vmem:[#allocation37_spill] sm:$0xff] }
 0x32c   : > { %vm3265_vm6 = vcmp.eq.f32.partialorder %v6822_v54, %v6405_v7  ;;  %vm6926_vm15 = vmor %vm3199_vm10, %vm3263_vm12  ;;  %v3508_v33 = vsel %vm8027_vm1, 1, %v7929_v16  ;;  %vm8033_vm10 = vnez %v7974_v55  ;;  %v3559_v1 = vadd.s32 %v3557_v57, %v3506_v50  ;;  %v8039_v55 = vld [vmem:[#allocation34_spill] sm:$0xff] }
 0x32d   : > { %vm6943_vm12 = vmand %vm3265_vm6, %vm8030_vm0  ;;  %v3509_v9 = vsel %vm8033_vm10, 1, %v7929_v16  ;;  %vm8035_vm6 = vcmp.lt.s32.totalorder %v8034_v42, %v8029_v28  ;;  %v3596_v40 = vadd.s32 %v3594_v2, %v3507_v52  ;;  %vm8040_vm10 = vcmp.lt.s32.totalorder %v8039_v55, %v8029_v28 }
 0x32e   : > { %v3560_v36 = vadd.s32 %v3558_v4, %v3508_v33  ;;  %vm8043_vm4 = vcmp.gt.f32.partialorder %v6822_v54, %v6405_v7  ;;  %v3597_v24 = vadd.s32 %v3595_v51, %v3509_v9  ;;  %v3561_v25 = vadd.s32 %v3559_v1, %v3510_v6  ;;  %v8070_v33 = vld [vmem:[#allocation38_spill] sm:$0xff] }
 0x32f   : > { %v6854_v58 = vpop.permute.xlu0 %3087  ;;  %v3598_v61 = vadd.s32 %v3596_v40, %v3511_v27  ;;  %vm3200_vm8 = vcmp.gt.f32.partialorder %v6822_v54, %v6400_v60  ;;  %v3517_v29 = vsel %vm6895_vm9, 1, %v7929_v16  ;;  %v3518_v18 = vsel %vm6908_vm3, 1, %v7929_v16 }
 0x330   : > { %vm8036_vm0 = vcmp.eq.f32.partialorder %v6854_v58, %v6405_v7  ;;  %vm8047_vm2 = vcmp.gt.f32.partialorder %v6854_v58, %v6405_v7  ;;  %v3562_v31 = vadd.s32 %v3560_v36, %v3512_v62  ;;  %v3599_v49 = vadd.s32 %v3597_v24, %v3513_v22 }
 0x331   : > { %vm6963_vm5 = vmand %vm8036_vm0, %vm8035_vm6  ;;  %v3563_v35 = vadd.s32 %v3561_v25, %v3514_v34  ;;  %v3600_v30 = vadd.s32 %v3598_v61, %v3515_v23  ;;  %vm3202_vm9 = vcmp.gt.f32.partialorder %v6854_v58, %v6400_v60  ;;  %v3519_v14 = vsel %vm6926_vm15, 1, %v7929_v16  ;;  %v8089_v61 = vld [vmem:[#allocation41_spill] sm:$0xff] }
 0x332   : > { %vm7009_vm0 = vmor %vm8047_vm2, %vm6963_vm5  ;;  %v3564_v53 = vadd.s32 %v3562_v31, %v3516_v63  ;;  %vm8061_vm2 = vcmp.lt.s32.totalorder %v8060_v46, %v8029_v28  ;;  %v3520_v58 = vsel %vm3200_vm8, 1, %v7929_v16  ;;  %v3601_v45 = vadd.s32 %v3599_v49, %v3517_v29  ;;  %v8093_v31 = vld [vmem:[#allocation42_spill] sm:$0xff] }
 0x333   : > { %v6883_v20 = vpop.permute.xlu1 %3092  ;;  %v3565_v26 = vadd.s32 %v3563_v35, %v3518_v18  ;;  %v3522_v50 = vsel %vm3202_vm9, 1, %v7929_v16  ;;  %v3602_v4 = vadd.s32 %v3600_v30, %v3519_v14 }
 0x334   : > { %vm3269_vm14 = vcmp.eq.f32.partialorder %v6883_v20, %v6405_v7  ;;  %vm3205_vm7 = vcmp.gt.f32.partialorder %v6883_v20, %v6405_v7  ;;  %v3566_v12 = vadd.s32 %v3564_v53, %v3520_v58 }
 0x335   : > { %vm6978_vm1 = vmand %vm3269_vm14, %vm8040_vm10  ;;  %v3567_v9 = vadd.s32 %v3565_v26, %v3522_v50 }
 0x336   : > { %vm6995_vm14 = vmor %vm8043_vm4, %vm6943_vm12  ;;  %vm8053_vm4 = vcmp.lt.s32.totalorder %v8052_v13, %v8029_v28 }
 0x337   : > { %v6914_v32 = vpop.permute.xlu0 %3097  ;;  %vm7028_vm5 = vmor %vm3205_vm7, %vm6978_vm1  ;;  %v3521_v0 = vsel %vm6995_vm14, 1, %v7929_v16 }
 0x338   : > { %vm3271_vm6 = vcmp.eq.f32.partialorder %v6914_v32, %v6405_v7  ;;  %vm3207_vm13 = vcmp.gt.f32.partialorder %v6914_v32, %v6405_v7  ;;  %v3603_v2 = vadd.s32 %v3601_v45, %v3521_v0  ;;  %v3525_v55 = vsel %vm7028_vm5, 1, %v7929_v16 }
 0x339   : > { %vm7044_vm1 = vmand %vm3271_vm6, %vm8053_vm4  ;;  %vm8057_vm6 = vcmp.lt.s32.totalorder %v8056_v19, %v8029_v28 }
 0x33a   : > { %v3605_v34 = vadd.s32 %v3603_v2, %v3525_v55 }
 0x33b   : > { %v6947_v47 = vpop.permute.xlu1 %3102 }
 0x33c   : > { %vm3273_vm12 = vcmp.eq.f32.partialorder %v6947_v47, %v6405_v7  ;;  %vm3209_vm7 = vcmp.gt.f32.partialorder %v6947_v47, %v6405_v7  ;;  %vm3208_vm9 = vcmp.gt.f32.partialorder %v6947_v47, %v6400_v60 }
 0x33d   : > { %vm7064_vm11 = vmand %vm3273_vm12, %vm8057_vm6  ;;  %vm8071_vm6 = vcmp.lt.s32.totalorder %v8070_v33, %v8029_v28  ;;  %v3528_v62 = vsel %vm3208_vm9, 1, %v7929_v16 }
 0x33e   : > { %vm7099_vm12 = vmor %vm3207_vm13, %vm7044_vm1  ;;  %vm3206_vm13 = vcmp.gt.f32.partialorder %v6914_v32, %v6400_v60 }
 0x33f   : > { %v6982_v15 = vpop.permute.xlu0 %3107  ;;  %vm7112_vm14 = vmor %vm3209_vm7, %vm7064_vm11  ;;  %v3526_v42 = vsel %vm3206_vm13, 1, %v7929_v16  ;;  %v3527_v47 = vsel %vm7099_vm12, 1, %v7929_v16 }
 0x340   : > { %vm3275_vm10 = vcmp.eq.f32.partialorder %v6982_v15, %v6405_v7  ;;  %vm3211_vm3 = vcmp.gt.f32.partialorder %v6982_v15, %v6405_v7  ;;  %v3569_v24 = vadd.s32 %v3567_v9, %v3526_v42 }
 0x341   : > { %vm7078_vm4 = vmand %vm3275_vm10, %vm8061_vm2  ;;  %vm3204_vm10 = vcmp.gt.f32.partialorder %v6883_v20, %v6400_v60  ;;  %v3523_v20 = vsel %vm7009_vm0, 1, %v7929_v16 }
 0x342   : > { %vm7131_vm1 = vmor %vm3211_vm3, %vm7078_vm4  ;;  %v3524_v10 = vsel %vm3204_vm10, 1, %v7929_v16  ;;  %vm3210_vm3 = vcmp.gt.f32.partialorder %v6982_v15, %v6400_v60  ;;  %vm8075_vm4 = vcmp.lt.s32.totalorder %v8074_v3, %v8029_v28  ;;  %v3604_v6 = vadd.s32 %v3602_v4, %v3523_v20  ;;  %v8109_v4 = vld [vmem:[#allocation45_spill] sm:$0xff] }
 0x343   : > { %v7015_v44 = vpop.permute.xlu1 %3112  ;;  %v3568_v36 = vadd.s32 %v3566_v12, %v3524_v10  ;;  %v3530_v22 = vsel %vm3210_vm3, 1, %v7929_v16  ;;  %v3529_v15 = vsel %vm7112_vm14, 1, %v7929_v16  ;;  %vm8090_vm14 = vcmp.lt.s32.totalorder %v8089_v61, %v8029_v28 }
 0x344   : > { %vm3277_vm15 = vcmp.eq.f32.partialorder %v7015_v44, %v6405_v7  ;;  %vm3213_vm0 = vcmp.gt.f32.partialorder %v7015_v44, %v6405_v7  ;;  %v3571_v48 = vadd.s32 %v3569_v24, %v3530_v22  ;;  %v3606_v49 = vadd.s32 %v3604_v6, %v3527_v47 }
 0x345   : > { %vm7145_vm11 = vmand %vm3277_vm15, %vm8071_vm6  ;;  %vm8079_vm6 = vcmp.lt.s32.totalorder %v8078_v11, %v8029_v28  ;;  %v3570_v63 = vadd.s32 %v3568_v36, %v3528_v62  ;;  %v3607_v13 = vadd.s32 %v3605_v34, %v3529_v15  ;;  %v3531_v35 = vsel %vm7131_vm1, 1, %v7929_v16  ;;  %v8111_v62 = vld [vmem:[#allocation46_spill] sm:$0xff] }
 0x346   : > { %vm7189_vm13 = vmor %vm3213_vm0, %vm7145_vm11  ;;  %v3608_v45 = vadd.s32 %v3606_v49, %v3531_v35 }
 0x347   : > { %v7048_v41 = vpop.permute.xlu0 %3117  ;;  %v3533_v29 = vsel %vm7189_vm13, 1, %v7929_v16 }
 0x348   : > { %vm3279_vm8 = vcmp.eq.f32.partialorder %v7048_v41, %v6405_v7  ;;  %vm8084_vm5 = vcmp.gt.f32.partialorder %v7048_v41, %v6405_v7  ;;  %v3609_v26 = vadd.s32 %v3607_v13, %v3533_v29 }
 0x349   : > { %vm7162_vm15 = vmand %vm3279_vm8, %vm8075_vm4  ;;  %vm3212_vm8 = vcmp.gt.f32.partialorder %v7015_v44, %v6400_v60 }
 0x34a   : > { %vm7210_vm0 = vmor %vm8084_vm5, %vm7162_vm15  ;;  %v3532_v56 = vsel %vm3212_vm8, 1, %v7929_v16  ;;  %vm8096_vm5 = vcmp.lt.s32.totalorder %v8095_v21, %v8029_v28 }
 0x34b   : > { %v3572_v18 = vadd.s32 %v3570_v63, %v3532_v56  ;;  %v3535_v30 = vsel %vm7210_vm0, 1, %v7929_v16 }
 0x34c   : > { %v3610_v33 = vadd.s32 %v3608_v45, %v3535_v30 }
 0x34d   : > { %v7082_v43 = vpop.permute.xlu1 %3122  ;;  %v7118_v57 = vpop.permute.xlu0 %3127 }
 0x34e   : > { %vm3281_vm7 = vcmp.eq.f32.partialorder %v7082_v43, %v6405_v7  ;;  %vm3217_vm10 = vcmp.gt.f32.partialorder %v7082_v43, %v6405_v7  ;;  %vm3283_vm4 = vcmp.eq.f32.partialorder %v7118_v57, %v6405_v7  ;;  %vm3219_vm12 = vcmp.gt.f32.partialorder %v7118_v57, %v6405_v7 }
 0x34f   : > { %vm7175_vm2 = vmand %vm3281_vm7, %vm8079_vm6  ;;  %vm3214_vm7 = vcmp.gt.f32.partialorder %v7048_v41, %v6400_v60  ;;  %vm3216_vm15 = vcmp.gt.f32.partialorder %v7082_v43, %v6400_v60  ;;  %vm8094_vm6 = vcmp.lt.s32.totalorder %v8093_v31, %v8029_v28 }
 0x350   : > { %vm7226_vm9 = vmor %vm3217_vm10, %vm7175_vm2  ;;  %v3534_v44 = vsel %vm3214_vm7, 1, %v7929_v16  ;;  %vm3218_vm7 = vcmp.gt.f32.partialorder %v7118_v57, %v6400_v60  ;;  %v3536_v53 = vsel %vm3216_vm15, 1, %v7929_v16 }
 0x351   : > { %vm7241_vm2 = vmand %vm3283_vm4, %vm8090_vm14  ;;  %v3573_v19 = vadd.s32 %v3571_v48, %v3534_v44  ;;  %v3537_v14 = vsel %vm7226_vm9, 1, %v7929_v16  ;;  %v3538_v58 = vsel %vm3218_vm7, 1, %v7929_v16  ;;  %vm8106_vm9 = vcmp.lt.s32.totalorder %v8105_v39, %v8029_v28 }
 0x352   : > { %v3574_v20 = vadd.s32 %v3572_v18, %v3536_v53  ;;  %v3611_v32 = vadd.s32 %v3609_v26, %v3537_v14 }
 0x353   : > { %v3575_v12 = vadd.s32 %v3573_v19, %v3538_v58 }
 0x355   : > { %v3133_v40 = vpop.permute.xlu1 %3132  ;;  %v3138_v27 = vpop.permute.xlu0 %3137 }
 0x356   : > { %vm3285_vm11 = vcmp.eq.f32.partialorder %v3133_v40, %v6405_v7  ;;  %vm3287_vm3 = vcmp.eq.f32.partialorder %v3138_v27, %v6405_v7  ;;  %vm3221_vm10 = vcmp.gt.f32.partialorder %v3133_v40, %v6405_v7  ;;  %vm3223_vm4 = vcmp.gt.f32.partialorder %v3138_v27, %v6405_v7 }
 0x357   : > { %vm3349_vm8 = vmand %vm3285_vm11, %vm8094_vm6  ;;  %vm3220_vm1 = vcmp.gt.f32.partialorder %v3133_v40, %v6400_v60 }
 0x358   : > { %vm7261_vm14 = vmand %vm3287_vm3, %vm8096_vm5  ;;  %vm3222_vm3 = vcmp.gt.f32.partialorder %v3138_v27, %v6400_v60  ;;  %v3540_v54 = vsel %vm3220_vm1, 1, %v7929_v16  ;;  %vm8110_vm5 = vcmp.lt.s32.totalorder %v8109_v4, %v8029_v28 }
 0x359   : > { %vm7276_vm11 = vmor %vm3219_vm12, %vm7241_vm2  ;;  %v3542_v57 = vsel %vm3222_vm3, 1, %v7929_v16  ;;  %v3576_v51 = vadd.s32 %v3574_v20, %v3540_v54 }
 0x35a   : > { %vm7287_vm13 = vmor %vm3221_vm10, %vm3349_vm8  ;;  %v3539_v52 = vsel %vm7276_vm11, 1, %v7929_v16  ;;  %v3577_v9 = vadd.s32 %v3575_v12, %v3542_v57 }
 0x35b   : > { %vm7303_vm0 = vmor %vm3223_vm4, %vm7261_vm14  ;;  %v3541_v2 = vsel %vm7287_vm13, 1, %v7929_v16  ;;  %v3612_v6 = vadd.s32 %v3610_v33, %v3539_v52 }
 0x35c   : > { %v3613_v42 = vadd.s32 %v3611_v32, %v3541_v2  ;;  %v3543_v11 = vsel %vm7303_vm0, 1, %v7929_v16  ;;  %vm8112_vm0 = vcmp.lt.s32.totalorder %v8111_v62, %v8029_v28 }
 0x35d   : > { %v3143_v38 = vpop.permute.xlu1 %3142  ;;  %v3148_v43 = vpop.permute.xlu0 %3147  ;;  %v3614_v47 = vadd.s32 %v3612_v6, %v3543_v11 }
 0x35e   : > { %vm3225_vm12 = vcmp.gt.f32.partialorder %v3143_v38, %v6405_v7  ;;  %vm3289_vm2 = vcmp.eq.f32.partialorder %v3143_v38, %v6405_v7  ;;  %vm3224_vm15 = vcmp.gt.f32.partialorder %v3143_v38, %v6400_v60  ;;  %vm3226_vm6 = vcmp.gt.f32.partialorder %v3148_v43, %v6400_v60  ;;  %v8117_v38 = vld [vmem:[#allocation48_spill] sm:$0xff] }
 0x35f   : > { %vm3353_vm10 = vmand %vm3289_vm2, %vm8106_vm9  ;;  %vm3227_vm8 = vcmp.gt.f32.partialorder %v3148_v43, %v6405_v7  ;;  %vm3291_vm7 = vcmp.eq.f32.partialorder %v3148_v43, %v6405_v7  ;;  %v3544_v10 = vsel %vm3224_vm15, 1, %v7929_v16  ;;  %v3546_v3 = vsel %vm3226_vm6, 1, %v7929_v16 }
 0x360   : > { %vm7322_vm4 = vmor %vm3225_vm12, %vm3353_vm10  ;;  %v3578_v40 = vadd.s32 %v3576_v51, %v3544_v10  ;;  %v3579_v55 = vadd.s32 %v3577_v9, %v3546_v3 }
 0x361   : > { %vm3355_vm14 = vmand %vm3291_vm7, %vm8110_vm5  ;;  %v3545_v1 = vsel %vm7322_vm4, 1, %v7929_v16  ;;  %vm8115_vm5 = vcmp.lt.s32.totalorder %v6302_v5, 51  ;;  %v8118_v5 = vld [vmem:[#allocation49_spill] sm:$0xff] }
 0x362   : > { %vm3419_vm1 = vmor %vm3227_vm8, %vm3355_vm14  ;;  %v3615_v24 = vadd.s32 %v3613_v42, %v3545_v1 }
 0x363   : > { %v3547_v27 = vsel %vm3419_vm1, 1, %v7929_v16 }
 0x364   : > { %v3616_v56 = vadd.s32 %v3614_v47, %v3547_v27 }
 0x365   : > { %v3153_v17 = vpop.permute.xlu1 %3152  ;;  %v3158_v36 = vpop.permute.xlu0 %3157 }
 0x366   : > { %vm3228_vm11 = vcmp.gt.f32.partialorder %v3153_v17, %v6400_v60  ;;  %vm3229_vm13 = vcmp.gt.f32.partialorder %v3153_v17, %v6405_v7  ;;  %vm3293_vm3 = vcmp.eq.f32.partialorder %v3153_v17, %v6405_v7  ;;  %vm3230_vm12 = vcmp.gt.f32.partialorder %v3158_v36, %v6400_v60  ;;  %v8113_v60 = vld [vmem:[#allocation47_spill] sm:$0xff] }
 0x367   : > { %vm3357_vm2 = vmand %vm3293_vm3, %vm8112_vm0  ;;  %v3548_v22 = vsel %vm3228_vm11, 1, %v7929_v16  ;;  %vm3231_vm15 = vcmp.gt.f32.partialorder %v3158_v36, %v6405_v7  ;;  %vm3295_vm9 = vcmp.eq.f32.partialorder %v3158_v36, %v6405_v7  ;;  %v3550_v8 = vsel %vm3230_vm12, 1, %v7929_v16 }
 0x368   : > { %vm3421_vm10 = vmor %vm3229_vm13, %vm3357_vm2  ;;  %v3580_v15 = vadd.s32 %v3578_v40, %v3548_v22  ;;  %v3581_v25 = vadd.s32 %v3579_v55, %v3550_v8  ;;  %vm8114_vm6 = vcmp.lt.s32.totalorder %v8113_v60, %v8029_v28  ;;  %vm8116_vm11 = vcmp.lt.s32.totalorder %v6307_v59, 51 }
 0x369   : > { %v3549_v34 = vsel %vm3421_vm10, 1, %v7929_v16  ;;  %vm3359_vm8 = vmand %vm3295_vm9, %vm8114_vm6  ;;  %vm8119_vm3 = vnez %v8118_v5 }
 0x36a   : > { %v3617_v44 = vadd.s32 %v3615_v24, %v3549_v34  ;;  %vm3423_vm7 = vmor %vm3231_vm15, %vm3359_vm8  ;;  %v3582_v61 = vadd.s32 %v3581_v25, %v3580_v15 }
 0x36b   : > { %v3551_v23 = vsel %vm3423_vm7, 1, %v7929_v16 }
 0x36c   : > { %v3583_v7 = vrot.slane %v3582_v61, 4  ;;  %v3618_v63 = vadd.s32 %v3616_v56, %v3551_v23 }
 0x36e   : > { %v3584_v48 = vadd.s32 %v3583_v7, %v3582_v61  ;;  %v3619_v31 = vadd.s32 %v3618_v63, %v3617_v44 }
 0x370   : > { %v3585_v49 = vrot.slane %v3584_v48, 2  ;;  %v3620_v13 = vrot.slane %v3619_v31, 4 }
 0x372   : > { %v3586_v21 = vadd.s32 %v3585_v49, %v3584_v48  ;;  %v3621_v41 = vadd.s32 %v3620_v13, %v3619_v31 }
 0x374   : > { %v3587_v35 = vrot.slane %v3586_v21, 1  ;;  %v3622_v29 = vrot.slane %v3621_v41, 2 }
 0x376   : > { %v3588_v18 = vadd.s32 %v3587_v35, %v3586_v21  ;;  %v3623_v28 = vadd.s32 %v3622_v29, %v3621_v41 }
 0x378   : > { %v3624_v19 = vrot.slane %v3623_v28, 1  ;;  %vm3626_vm4 = vcmp.lt.s32.totalorder %v3588_v18, 2 }
 0x379   : > { %vm3628_vm14 = vmand %vm8115_vm5, %vm3626_vm4 }
 0x37a   : > { %v3625_v37 = vadd.s32 %v3624_v19, %v3623_v28  ;;  %v3630_v30 = vsel %vm3628_vm14, 1, %v7929_v16 }
 0x37c   : > { %vm3627_vm1 = vcmp.lt.s32.totalorder %v3625_v37, 2 }
 0x37d   : > { %vm3629_vm13 = vmand %vm8116_vm11, %vm3627_vm1 }
 0x37e   : > { %v3631_v53 = vsel %vm3629_vm13, 1, %v7929_v16 }
 0x37f   : > { %v3632_v46 = vcombine.low %v3630_v30, %v3631_v53 }
 0x381   : > { %v3639_v43 = vrot.slane %v3632_v46, %v8117_v38 }
 0x383   : > { %v3646_v14 = vrot.slane %v3639_v43, %v8117_v38 }
 0x385   : > { %3647 = vst.msk [vmem:[%s378_s9] sm:$0x3] %vm8119_vm3, %v3646_v14 }
 0x386 PF: > { %s18_s24 = sadd.s32 1, %s3969_s24  }
 0x387   : > { %p15_p4 = scmp.ge.s32.totalorder %s18_s24, 4  }
 0x389   :  { %17 = sbr.rel (!%p15_p4) target bundleno = 1 (0x1), region = 101 }

</bundles_post_ra>
